<compile_context>
chip_gen: v7x
topology: tpu7x:2x2x1
jax: 0.10.0
libtpu: 0.0.40
codegen_flags: <defaults>
</compile_context>

<pallas_src>
import jax
import jax.numpy as jnp
from jax.experimental import pallas as pl
from jax.experimental.pallas import tpu as pltpu

# ----------------------------------------------------------------------------
# Layout constants
# ----------------------------------------------------------------------------
N_SUB = 7        # stride-4 phase plane size (28 / 4)
PLANE = 49       # 7 * 7 flattened phase plane
NB = 2           # samples per grid block (NB * PLANE = 98 <= 128 lanes)
LANES = 128

# Haar DWT sign table, indexed [band, phase_h, phase_w]; bands = LL, HL, LH, HH
_S = jnp.array(
    [[[1.0, 1.0], [1.0, 1.0]],      # LL =  x1 + x2 + x3 + x4
     [[-1.0, 1.0], [-1.0, 1.0]],    # HL = -x1 - x2 + x3 + x4
     [[-1.0, -1.0], [1.0, 1.0]],    # LH = -x1 + x2 - x3 + x4
     [[1.0, -1.0], [-1.0, 1.0]]],   # HH =  x1 - x2 - x3 + x4
    dtype=jnp.float32)


def fold_dwt_conv(w, b):
    """Fold DWT(conv(x) + b) into a stride-2, 6x6 conv (weights precomputed).

    w: (Cout, Cin, 5, 5), b: (Cout,)  ->  we: (4*Cout, Cin, 6, 6), be: (4*Cout,)
    Output channel order = band-major (LL, HL, LH, HH), matching torch.cat.
    """
    cout, cin, kh, kw = w.shape
    we = jnp.zeros((4, cout, cin, kh + 1, kw + 1), jnp.float32)
    for ph in range(2):
        for pw in range(2):
            we = we.at[:, :, :, ph:ph + kh, pw:pw + kw].add(
                0.5 * _S[:, ph, pw][:, None, None, None, None]
                * w.astype(jnp.float32)[None])
    we = we.reshape(4 * cout, cin, kh + 1, kw + 1)
    band_sum = _S.sum(axis=(1, 2))                    # [4, 0, 0, 0]
    be = (0.5 * band_sum[:, None] * b.astype(jnp.float32)[None, :]).reshape(-1)
    return we, be


# ----------------------------------------------------------------------------
# Fused kernel: conv1+DWT (stride-2) -> ReLU -> conv2+DWT (stride-2) -> ReLU -> fc
# ----------------------------------------------------------------------------
def fused_net_kernel(x16_ref, wa_ref, ba_ref, wb_ref, bb_ref,
                     wfc_ref, bfc_ref, out_ref,
                     cols1_ref, a1_ref, cols2_ref):
    # One-time zero of the activation pad region (layer-2 gather for the last
    # parity segment may read up to 16 lanes past 512; scratch persists across
    # grid steps, so do it only on the first iteration).
    @pl.when(pl.program_id(0) == 0)
    def _():
        a1_ref[:, 4 * LANES:5 * LANES] = jnp.zeros((40, LANES), jnp.float32)

    # ---- layer 1: in-kernel im2col (36, 4*128), contiguous lane slices only.
    # Column layout per 128-lane block sidx: m = nb*49 + U*7 + V where (U, V)
    # indexes the 6x6 parity plane sidx of the 12x12 output grid.
    # Taps whose source rows are consecutive phase planes with the same
    # in-plane offset are copied as one (r, 128) block (run-merged im2col).
    for kh in range(6):
        for sh in range(2):
            eh = 2 * sh + kh
            q_base = (eh % 4) * 4              # row-phase contribution
            off_h = (eh // 4) * N_SUB          # in-plane row shift
            for sw in range(2):
                sidx = sh * 2 + sw
                kw = 0
                while kw < 6:
                    ew = 2 * sw + kw
                    r = min(6 - kw, 4 - (ew % 4))    # run length (same ew//4)
                    t0 = kh * 6 + kw
                    q0 = q_base + (ew % 4)
                    off = off_h + (ew // 4)
                    cols1_ref[t0:t0 + r, sidx * LANES:(sidx + 1) * LANES] = (
                        x16_ref[q0:q0 + r, off:off + LANES])
                    kw += r

    z1 = jnp.dot(wa_ref[...], cols1_ref[...],
                 preferred_element_type=jnp.float32)       # (40, 512)
    a1_ref[:, 0:4 * LANES] = jnp.maximum(z1 + ba_ref[...], 0.0)  # ReLU

    # ---- layer 2: gather im2col (36*40, 128) as 36 contiguous block copies.
    for a in range(6):
        for b in range(6):
            t = a * 6 + b
            sidx = (a % 2) * 2 + (b % 2)
            off = sidx * LANES + (a // 2) * N_SUB + (b // 2)
            cols2_ref[t * 40:(t + 1) * 40, :] = a1_ref[:, off:off + LANES]

    z2 = jnp.dot(wb_ref[...], cols2_ref[...],
                 preferred_element_type=jnp.float32)       # (20, 128)
    z2 = jnp.maximum(z2 + bb_ref[...], 0.0)

    # ---- fc epilogue (weights pre-scattered to the 7x7 plane; garbage lanes
    # are multiplied by zero weights).
    wfc = wfc_ref[...]                                     # (10, 20, 49)
    bfc = bfc_ref[...]                                     # (10, 1)
    for nb in range(NB):
        zn = z2[:, nb * PLANE:(nb + 1) * PLANE]            # (20, 49)
        prod = wfc * zn[None, :, :]                        # (10, 20, 49)
        s = jnp.sum(jnp.sum(prod, axis=2), axis=1, keepdims=True)  # (10, 1)
        out_ref[0, :, nb:nb + 1] = s + bfc


# ----------------------------------------------------------------------------
# Wrapper: weight folding + input phase decomposition + single pallas_call
# ----------------------------------------------------------------------------
def net_forward(params, x):
    n_in = x.shape[0]
    nblk = -(-n_in // NB)
    n_pad = nblk * NB
    if n_pad != n_in:
        x = jnp.pad(x, ((0, n_pad - n_in), (0, 0), (0, 0), (0, 0)))

    # Fold DWT into conv weights (host-side weight prep).
    wa, ba = fold_dwt_conv(params["w1"], params["b1"])     # (40,1,6,6), (40,)
    wa_mat = wa.reshape(40, 36)
    wb, bb = fold_dwt_conv(params["w2"], params["b2"])     # (20,40,6,6), (20,)
    wb_mat = wb.transpose(0, 2, 3, 1).reshape(20, 36 * 40)  # K order = (tap, c2)

    # Scatter fc weights onto the 7x7 plane layout (zeros on garbage positions).
    wfc4 = params["wfc"].astype(jnp.float32).reshape(10, 20, 4, 4)
    wfc_arr = jnp.zeros((10, 20, 7, 7), jnp.float32).at[:, :, :4, :4].set(wfc4)
    wfc_arr = wfc_arr.reshape(10, 20, PLANE)

    # Input: 16 stride-4 phase planes per sample, flattened lane-dense.
    xp = x[:, 0].astype(jnp.float32)                                   # (Np,28,28)
    x16 = xp.reshape(n_pad, 7, 4, 7, 4).transpose(0, 2, 4, 1, 3)       # (Np,4,4,7,7)
    x16 = x16.reshape(n_pad, 16, PLANE)
    x16 = x16.reshape(nblk, NB, 16, PLANE).transpose(0, 2, 1, 3)
    x16 = x16.reshape(nblk, 16, NB * PLANE)
    x16 = jnp.pad(x16, ((0, 0), (0, 0), (0, 256 - NB * PLANE)))
    x16 = x16.reshape(nblk * 16, 256)

    out = pl.pallas_call(
        fused_net_kernel,
        out_shape=jax.ShapeDtypeStruct((nblk, 10, NB), jnp.float32),
        grid=(nblk,),
        in_specs=[
            pl.BlockSpec((16, 256), lambda i: (i, 0)),          # x16 (per block)
            pl.BlockSpec((40, 36), lambda i: (0, 0)),           # folded conv1
            pl.BlockSpec((40, 1), lambda i: (0, 0)),
            pl.BlockSpec((20, 1440), lambda i: (0, 0)),         # folded conv2
            pl.BlockSpec((20, 1), lambda i: (0, 0)),
            pl.BlockSpec((10, 20, PLANE), lambda i: (0, 0, 0)),  # fc weights
            pl.BlockSpec((10, 1), lambda i: (0, 0)),
        ],
        out_specs=pl.BlockSpec((1, 10, NB), lambda i: (i, 0, 0)),
        scratch_shapes=[
            pltpu.VMEM((36, 512), jnp.float32),     # im2col, layer 1
            pltpu.VMEM((40, 640), jnp.float32),     # activations (phase planes)
            pltpu.VMEM((1440, 128), jnp.float32),   # im2col, layer 2
        ],
        compiler_params=pltpu.CompilerParams(
            dimension_semantics=("parallel",)),
    )(x16, wa_mat, ba.reshape(40, 1), wb_mat, bb.reshape(20, 1),
      wfc_arr, params["bfc"].astype(jnp.float32).reshape(10, 1))

    return out.transpose(0, 2, 1).reshape(n_pad, 10)[:n_in]


# ----------------------------------------------------------------------------
# Deterministic parameter init (PyTorch-style uniform bounds, synthetic values)
# ----------------------------------------------------------------------------
def init_params(key):
    ks = jax.random.split(key, 6)

    def u(k, shape, fan_in):
        bound = 1.0 / jnp.sqrt(float(fan_in))
        return jax.random.uniform(k, shape, jnp.float32, -bound, bound)

    return {
        "w1": u(ks[0], (10, 1, 5, 5), 1 * 5 * 5),
        "b1": u(ks[1], (10,), 1 * 5 * 5),
        "w2": u(ks[2], (5, 40, 5, 5), 40 * 5 * 5),
        "b2": u(ks[3], (5,), 40 * 5 * 5),
        "wfc": u(ks[4], (10, 320), 320),
        "bfc": u(ks[5], (10,), 320),
    }


# ----------------------------------------------------------------------------
# Pure-JAX reference (mirrors the PyTorch module, for correctness check)
# ----------------------------------------------------------------------------
def reference_forward(params, x):
    def conv(x, w, b):
        y = jax.lax.conv_general_dilated(
            x, w, (1, 1), "VALID", dimension_numbers=("NCHW", "OIHW", "NCHW"))
        return y + b[None, :, None, None]

    def dwt(x):
        x01 = x[:, :, 0::2, :] / 2
        x02 = x[:, :, 1::2, :] / 2
        x1 = x01[:, :, :, 0::2]
        x2 = x02[:, :, :, 0::2]
        x3 = x01[:, :, :, 1::2]
        x4 = x02[:, :, :, 1::2]
        ll = x1 + x2 + x3 + x4
        hl = -x1 - x2 + x3 + x4
        lh = -x1 + x2 - x3 + x4
        hh = x1 - x2 - x3 + x4
        return jnp.concatenate([ll, hl, lh, hh], axis=1)

    y = jnp.maximum(dwt(conv(x, params["w1"], params["b1"])), 0.0)
    y = jnp.maximum(dwt(conv(y, params["w2"], params["b2"])), 0.0)
    y = y.reshape(x.shape[0], -1)
    return y @ params["wfc"].T + params["bfc"]


if __name__ == "__main__":
    key = jax.random.PRNGKey(0)
    pkey, xkey = jax.random.split(key)
    params = init_params(pkey)
    # Input consistent with fc(320): 28x28 single-channel images, batch of 2.
    x = jax.random.normal(xkey, (2, 1, 28, 28), dtype=jnp.float32)

    fwd = jax.jit(net_forward)
    out = jax.block_until_ready(fwd(params, x))
    ref = jax.block_until_ready(reference_forward(params, x))

    assert out.shape == (2, 10), f"bad output shape {out.shape}"
    assert jnp.allclose(out, ref, atol=5e-4, rtol=5e-4), (
        "mismatch vs reference, max abs err = "
        f"{jnp.max(jnp.abs(out - ref))}")

    print("KERNEL_OK")
</pallas_src>

<mosaic_0001>
module attributes {stable_mosaic.version = 11 : i64} {
  func.func @fused_net_kernel(%arg0: i32, %arg1: memref<16x256xf32, #tpu.memory_space<vmem>>, %arg2: memref<40x36xf32, #tpu.memory_space<vmem>>, %arg3: memref<40x1xf32, #tpu.memory_space<vmem>>, %arg4: memref<20x1440xf32, #tpu.memory_space<vmem>>, %arg5: memref<20x1xf32, #tpu.memory_space<vmem>>, %arg6: memref<10x20x49xf32, #tpu.memory_space<vmem>>, %arg7: memref<10x1xf32, #tpu.memory_space<vmem>>, %arg8: memref<1x10x2xf32, #tpu.memory_space<vmem>>, %arg9: memref<36x512xf32, #tpu.memory_space<vmem>>, %arg10: memref<40x640xf32, #tpu.memory_space<vmem>>, %arg11: memref<1440x128xf32, #tpu.memory_space<vmem>>) attributes {dimension_semantics = [#tpu.dimension_semantics<parallel>], iteration_bounds = array<i64: 1>, scalar_prefetch = 0 : i64, scratch_operands = 3 : i64, tpu.core_type = #tpu.core_type<tc>, window_params = [{transform_indices = @transform_0, window_bounds = array<i64: 16, 256>}, {pipeline_mode = #tpu.pipeline_mode<synchronous>, transform_indices = @transform_1, window_bounds = array<i64: 40, 36>}, {pipeline_mode = #tpu.pipeline_mode<synchronous>, transform_indices = @transform_2, window_bounds = array<i64: 40, 1>}, {pipeline_mode = #tpu.pipeline_mode<synchronous>, transform_indices = @transform_3, window_bounds = array<i64: 20, 1440>}, {pipeline_mode = #tpu.pipeline_mode<synchronous>, transform_indices = @transform_4, window_bounds = array<i64: 20, 1>}, {pipeline_mode = #tpu.pipeline_mode<synchronous>, transform_indices = @transform_5, window_bounds = array<i64: 10, 20, 49>}, {pipeline_mode = #tpu.pipeline_mode<synchronous>, transform_indices = @transform_6, window_bounds = array<i64: 10, 1>}, {transform_indices = @transform_7, window_bounds = array<i64: 1, 10, 2>}]} {
    %c0_i32 = arith.constant 0 : i32
    %0 = arith.cmpi eq, %arg0, %c0_i32 : i32
    %1 = arith.extui %0 : i1 to i32
    %c0_i32_0 = arith.constant 0 : i32
    %2 = arith.cmpi ne, %1, %c0_i32_0 : i32
    scf.if %2 {
      %cst_286 = arith.constant 0.000000e+00 : f32
      %212 = vector.broadcast %cst_286 : f32 to vector<40x128xf32>
      %c0_287 = arith.constant 0 : index
      %c512 = arith.constant 512 : index
      %213 = vector.load %arg10[%c0_287, %c512] : memref<40x640xf32, #tpu.memory_space<vmem>>, vector<40x128xf32>
      tpu.vector_store %arg10[%c0_287, %c512], %212 {strides = array<i32>} : memref<40x640xf32, #tpu.memory_space<vmem>>, vector<40x128xf32>,
    } else {
    }
    %c0 = arith.constant 0 : index
    %c0_1 = arith.constant 0 : index
    %3 = vector.load %arg1[%c0, %c0_1] : memref<16x256xf32, #tpu.memory_space<vmem>>, vector<4x128xf32>
    %c0_2 = arith.constant 0 : index
    %c0_3 = arith.constant 0 : index
    %4 = vector.load %arg9[%c0_2, %c0_3] : memref<36x512xf32, #tpu.memory_space<vmem>>, vector<4x128xf32>
    tpu.vector_store %arg9[%c0_2, %c0_3], %3 {strides = array<i32>} : memref<36x512xf32, #tpu.memory_space<vmem>>, vector<4x128xf32>,
    %c0_4 = arith.constant 0 : index
    %c1 = arith.constant 1 : index
    %5 = vector.load %arg1[%c0_4, %c1] : memref<16x256xf32, #tpu.memory_space<vmem>>, vector<2x128xf32>
    %c4 = arith.constant 4 : index
    %c0_5 = arith.constant 0 : index
    %6 = vector.load %arg9[%c4, %c0_5] : memref<36x512xf32, #tpu.memory_space<vmem>>, vector<2x128xf32>
    tpu.vector_store %arg9[%c4, %c0_5], %5 {strides = array<i32>} : memref<36x512xf32, #tpu.memory_space<vmem>>, vector<2x128xf32>,
    %c2 = arith.constant 2 : index
    %c0_6 = arith.constant 0 : index
    %7 = vector.load %arg1[%c2, %c0_6] : memref<16x256xf32, #tpu.memory_space<vmem>>, vector<2x128xf32>
    %c0_7 = arith.constant 0 : index
    %c128 = arith.constant 128 : index
    %8 = vector.load %arg9[%c0_7, %c128] : memref<36x512xf32, #tpu.memory_space<vmem>>, vector<2x128xf32>
    tpu.vector_store %arg9[%c0_7, %c128], %7 {strides = array<i32>} : memref<36x512xf32, #tpu.memory_space<vmem>>, vector<2x128xf32>,
    %c0_8 = arith.constant 0 : index
    %c1_9 = arith.constant 1 : index
    %9 = vector.load %arg1[%c0_8, %c1_9] : memref<16x256xf32, #tpu.memory_space<vmem>>, vector<4x128xf32>
    %c2_10 = arith.constant 2 : index
    %c128_11 = arith.constant 128 : index
    %10 = vector.load %arg9[%c2_10, %c128_11] : memref<36x512xf32, #tpu.memory_space<vmem>>, vector<4x128xf32>
    tpu.vector_store %arg9[%c2_10, %c128_11], %9 {strides = array<i32>} : memref<36x512xf32, #tpu.memory_space<vmem>>, vector<4x128xf32>,
    %c8 = arith.constant 8 : index
    %c0_12 = arith.constant 0 : index
    %11 = vector.load %arg1[%c8, %c0_12] : memref<16x256xf32, #tpu.memory_space<vmem>>, vector<4x128xf32>
    %c0_13 = arith.constant 0 : index
    %c256 = arith.constant 256 : index
    %12 = vector.load %arg9[%c0_13, %c256] : memref<36x512xf32, #tpu.memory_space<vmem>>, vector<4x128xf32>
    tpu.vector_store %arg9[%c0_13, %c256], %11 {strides = array<i32>} : memref<36x512xf32, #tpu.memory_space<vmem>>, vector<4x128xf32>,
    %c8_14 = arith.constant 8 : index
    %c1_15 = arith.constant 1 : index
    %13 = vector.load %arg1[%c8_14, %c1_15] : memref<16x256xf32, #tpu.memory_space<vmem>>, vector<2x128xf32>
    %c4_16 = arith.constant 4 : index
    %c256_17 = arith.constant 256 : index
    %14 = vector.load %arg9[%c4_16, %c256_17] : memref<36x512xf32, #tpu.memory_space<vmem>>, vector<2x128xf32>
    tpu.vector_store %arg9[%c4_16, %c256_17], %13 {strides = array<i32>} : memref<36x512xf32, #tpu.memory_space<vmem>>, vector<2x128xf32>,
    %c10 = arith.constant 10 : index
    %c0_18 = arith.constant 0 : index
    %15 = vector.load %arg1[%c10, %c0_18] : memref<16x256xf32, #tpu.memory_space<vmem>>, vector<2x128xf32>
    %c0_19 = arith.constant 0 : index
    %c384 = arith.constant 384 : index
    %16 = vector.load %arg9[%c0_19, %c384] : memref<36x512xf32, #tpu.memory_space<vmem>>, vector<2x128xf32>
    tpu.vector_store %arg9[%c0_19, %c384], %15 {strides = array<i32>} : memref<36x512xf32, #tpu.memory_space<vmem>>, vector<2x128xf32>,
    %c8_20 = arith.constant 8 : index
    %c1_21 = arith.constant 1 : index
    %17 = vector.load %arg1[%c8_20, %c1_21] : memref<16x256xf32, #tpu.memory_space<vmem>>, vector<4x128xf32>
    %c2_22 = arith.constant 2 : index
    %c384_23 = arith.constant 384 : index
    %18 = vector.load %arg9[%c2_22, %c384_23] : memref<36x512xf32, #tpu.memory_space<vmem>>, vector<4x128xf32>
    tpu.vector_store %arg9[%c2_22, %c384_23], %17 {strides = array<i32>} : memref<36x512xf32, #tpu.memory_space<vmem>>, vector<4x128xf32>,
    %c4_24 = arith.constant 4 : index
    %c0_25 = arith.constant 0 : index
    %19 = vector.load %arg1[%c4_24, %c0_25] : memref<16x256xf32, #tpu.memory_space<vmem>>, vector<4x128xf32>
    %c6 = arith.constant 6 : index
    %c0_26 = arith.constant 0 : index
    %20 = vector.load %arg9[%c6, %c0_26] : memref<36x512xf32, #tpu.memory_space<vmem>>, vector<4x128xf32>
    tpu.vector_store %arg9[%c6, %c0_26], %19 {strides = array<i32>} : memref<36x512xf32, #tpu.memory_space<vmem>>, vector<4x128xf32>,
    %c4_27 = arith.constant 4 : index
    %c1_28 = arith.constant 1 : index
    %21 = vector.load %arg1[%c4_27, %c1_28] : memref<16x256xf32, #tpu.memory_space<vmem>>, vector<2x128xf32>
    %c10_29 = arith.constant 10 : index
    %c0_30 = arith.constant 0 : index
    %22 = vector.load %arg9[%c10_29, %c0_30] : memref<36x512xf32, #tpu.memory_space<vmem>>, vector<2x128xf32>
    tpu.vector_store %arg9[%c10_29, %c0_30], %21 {strides = array<i32>} : memref<36x512xf32, #tpu.memory_space<vmem>>, vector<2x128xf32>,
    %c6_31 = arith.constant 6 : index
    %c0_32 = arith.constant 0 : index
    %23 = vector.load %arg1[%c6_31, %c0_32] : memref<16x256xf32, #tpu.memory_space<vmem>>, vector<2x128xf32>
    %c6_33 = arith.constant 6 : index
    %c128_34 = arith.constant 128 : index
    %24 = vector.load %arg9[%c6_33, %c128_34] : memref<36x512xf32, #tpu.memory_space<vmem>>, vector<2x128xf32>
    tpu.vector_store %arg9[%c6_33, %c128_34], %23 {strides = array<i32>} : memref<36x512xf32, #tpu.memory_space<vmem>>, vector<2x128xf32>,
    %c4_35 = arith.constant 4 : index
    %c1_36 = arith.constant 1 : index
    %25 = vector.load %arg1[%c4_35, %c1_36] : memref<16x256xf32, #tpu.memory_space<vmem>>, vector<4x128xf32>
    %c8_37 = arith.constant 8 : index
    %c128_38 = arith.constant 128 : index
    %26 = vector.load %arg9[%c8_37, %c128_38] : memref<36x512xf32, #tpu.memory_space<vmem>>, vector<4x128xf32>
    tpu.vector_store %arg9[%c8_37, %c128_38], %25 {strides = array<i32>} : memref<36x512xf32, #tpu.memory_space<vmem>>, vector<4x128xf32>,
    %c12 = arith.constant 12 : index
    %c0_39 = arith.constant 0 : index
    %27 = vector.load %arg1[%c12, %c0_39] : memref<16x256xf32, #tpu.memory_space<vmem>>, vector<4x128xf32>
    %c6_40 = arith.constant 6 : index
    %c256_41 = arith.constant 256 : index
    %28 = vector.load %arg9[%c6_40, %c256_41] : memref<36x512xf32, #tpu.memory_space<vmem>>, vector<4x128xf32>
    tpu.vector_store %arg9[%c6_40, %c256_41], %27 {strides = array<i32>} : memref<36x512xf32, #tpu.memory_space<vmem>>, vector<4x128xf32>,
    %c12_42 = arith.constant 12 : index
    %c1_43 = arith.constant 1 : index
    %29 = vector.load %arg1[%c12_42, %c1_43] : memref<16x256xf32, #tpu.memory_space<vmem>>, vector<2x128xf32>
    %c10_44 = arith.constant 10 : index
    %c256_45 = arith.constant 256 : index
    %30 = vector.load %arg9[%c10_44, %c256_45] : memref<36x512xf32, #tpu.memory_space<vmem>>, vector<2x128xf32>
    tpu.vector_store %arg9[%c10_44, %c256_45], %29 {strides = array<i32>} : memref<36x512xf32, #tpu.memory_space<vmem>>, vector<2x128xf32>,
    %c14 = arith.constant 14 : index
    %c0_46 = arith.constant 0 : index
    %31 = vector.load %arg1[%c14, %c0_46] : memref<16x256xf32, #tpu.memory_space<vmem>>, vector<2x128xf32>
    %c6_47 = arith.constant 6 : index
    %c384_48 = arith.constant 384 : index
    %32 = vector.load %arg9[%c6_47, %c384_48] : memref<36x512xf32, #tpu.memory_space<vmem>>, vector<2x128xf32>
    tpu.vector_store %arg9[%c6_47, %c384_48], %31 {strides = array<i32>} : memref<36x512xf32, #tpu.memory_space<vmem>>, vector<2x128xf32>,
    %c12_49 = arith.constant 12 : index
    %c1_50 = arith.constant 1 : index
    %33 = vector.load %arg1[%c12_49, %c1_50] : memref<16x256xf32, #tpu.memory_space<vmem>>, vector<4x128xf32>
    %c8_51 = arith.constant 8 : index
    %c384_52 = arith.constant 384 : index
    %34 = vector.load %arg9[%c8_51, %c384_52] : memref<36x512xf32, #tpu.memory_space<vmem>>, vector<4x128xf32>
    tpu.vector_store %arg9[%c8_51, %c384_52], %33 {strides = array<i32>} : memref<36x512xf32, #tpu.memory_space<vmem>>, vector<4x128xf32>,
    %c8_53 = arith.constant 8 : index
    %c0_54 = arith.constant 0 : index
    %35 = vector.load %arg1[%c8_53, %c0_54] : memref<16x256xf32, #tpu.memory_space<vmem>>, vector<4x128xf32>
    %c12_55 = arith.constant 12 : index
    %c0_56 = arith.constant 0 : index
    %36 = vector.load %arg9[%c12_55, %c0_56] : memref<36x512xf32, #tpu.memory_space<vmem>>, vector<4x128xf32>
    tpu.vector_store %arg9[%c12_55, %c0_56], %35 {strides = array<i32>} : memref<36x512xf32, #tpu.memory_space<vmem>>, vector<4x128xf32>,
    %c8_57 = arith.constant 8 : index
    %c1_58 = arith.constant 1 : index
    %37 = vector.load %arg1[%c8_57, %c1_58] : memref<16x256xf32, #tpu.memory_space<vmem>>, vector<2x128xf32>
    %c16 = arith.constant 16 : index
    %c0_59 = arith.constant 0 : index
    %38 = vector.load %arg9[%c16, %c0_59] : memref<36x512xf32, #tpu.memory_space<vmem>>, vector<2x128xf32>
    tpu.vector_store %arg9[%c16, %c0_59], %37 {strides = array<i32>} : memref<36x512xf32, #tpu.memory_space<vmem>>, vector<2x128xf32>,
    %c10_60 = arith.constant 10 : index
    %c0_61 = arith.constant 0 : index
    %39 = vector.load %arg1[%c10_60, %c0_61] : memref<16x256xf32, #tpu.memory_space<vmem>>, vector<2x128xf32>
    %c12_62 = arith.constant 12 : index
    %c128_63 = arith.constant 128 : index
    %40 = vector.load %arg9[%c12_62, %c128_63] : memref<36x512xf32, #tpu.memory_space<vmem>>, vector<2x128xf32>
    tpu.vector_store %arg9[%c12_62, %c128_63], %39 {strides = array<i32>} : memref<36x512xf32, #tpu.memory_space<vmem>>, vector<2x128xf32>,
    %c8_64 = arith.constant 8 : index
    %c1_65 = arith.constant 1 : index
    %41 = vector.load %arg1[%c8_64, %c1_65] : memref<16x256xf32, #tpu.memory_space<vmem>>, vector<4x128xf32>
    %c14_66 = arith.constant 14 : index
    %c128_67 = arith.constant 128 : index
    %42 = vector.load %arg9[%c14_66, %c128_67] : memref<36x512xf32, #tpu.memory_space<vmem>>, vector<4x128xf32>
    tpu.vector_store %arg9[%c14_66, %c128_67], %41 {strides = array<i32>} : memref<36x512xf32, #tpu.memory_space<vmem>>, vector<4x128xf32>,
    %c0_68 = arith.constant 0 : index
    %c7 = arith.constant 7 : index
    %43 = vector.load %arg1[%c0_68, %c7] : memref<16x256xf32, #tpu.memory_space<vmem>>, vector<4x128xf32>
    %c12_69 = arith.constant 12 : index
    %c256_70 = arith.constant 256 : index
    %44 = vector.load %arg9[%c12_69, %c256_70] : memref<36x512xf32, #tpu.memory_space<vmem>>, vector<4x128xf32>
    tpu.vector_store %arg9[%c12_69, %c256_70], %43 {strides = array<i32>} : memref<36x512xf32, #tpu.memory_space<vmem>>, vector<4x128xf32>,
    %c0_71 = arith.constant 0 : index
    %c8_72 = arith.constant 8 : index
    %45 = vector.load %arg1[%c0_71, %c8_72] : memref<16x256xf32, #tpu.memory_space<vmem>>, vector<2x128xf32>
    %c16_73 = arith.constant 16 : index
    %c256_74 = arith.constant 256 : index
    %46 = vector.load %arg9[%c16_73, %c256_74] : memref<36x512xf32, #tpu.memory_space<vmem>>, vector<2x128xf32>
    tpu.vector_store %arg9[%c16_73, %c256_74], %45 {strides = array<i32>} : memref<36x512xf32, #tpu.memory_space<vmem>>, vector<2x128xf32>,
    %c2_75 = arith.constant 2 : index
    %c7_76 = arith.constant 7 : index
    %47 = vector.load %arg1[%c2_75, %c7_76] : memref<16x256xf32, #tpu.memory_space<vmem>>, vector<2x128xf32>
    %c12_77 = arith.constant 12 : index
    %c384_78 = arith.constant 384 : index
    %48 = vector.load %arg9[%c12_77, %c384_78] : memref<36x512xf32, #tpu.memory_space<vmem>>, vector<2x128xf32>
    tpu.vector_store %arg9[%c12_77, %c384_78], %47 {strides = array<i32>} : memref<36x512xf32, #tpu.memory_space<vmem>>, vector<2x128xf32>,
    %c0_79 = arith.constant 0 : index
    %c8_80 = arith.constant 8 : index
    %49 = vector.load %arg1[%c0_79, %c8_80] : memref<16x256xf32, #tpu.memory_space<vmem>>, vector<4x128xf32>
    %c14_81 = arith.constant 14 : index
    %c384_82 = arith.constant 384 : index
    %50 = vector.load %arg9[%c14_81, %c384_82] : memref<36x512xf32, #tpu.memory_space<vmem>>, vector<4x128xf32>
    tpu.vector_store %arg9[%c14_81, %c384_82], %49 {strides = array<i32>} : memref<36x512xf32, #tpu.memory_space<vmem>>, vector<4x128xf32>,
    %c12_83 = arith.constant 12 : index
    %c0_84 = arith.constant 0 : index
    %51 = vector.load %arg1[%c12_83, %c0_84] : memref<16x256xf32, #tpu.memory_space<vmem>>, vector<4x128xf32>
    %c18 = arith.constant 18 : index
    %c0_85 = arith.constant 0 : index
    %52 = vector.load %arg9[%c18, %c0_85] : memref<36x512xf32, #tpu.memory_space<vmem>>, vector<4x128xf32>
    tpu.vector_store %arg9[%c18, %c0_85], %51 {strides = array<i32>} : memref<36x512xf32, #tpu.memory_space<vmem>>, vector<4x128xf32>,
    %c12_86 = arith.constant 12 : index
    %c1_87 = arith.constant 1 : index
    %53 = vector.load %arg1[%c12_86, %c1_87] : memref<16x256xf32, #tpu.memory_space<vmem>>, vector<2x128xf32>
    %c22 = arith.constant 22 : index
    %c0_88 = arith.constant 0 : index
    %54 = vector.load %arg9[%c22, %c0_88] : memref<36x512xf32, #tpu.memory_space<vmem>>, vector<2x128xf32>
    tpu.vector_store %arg9[%c22, %c0_88], %53 {strides = array<i32>} : memref<36x512xf32, #tpu.memory_space<vmem>>, vector<2x128xf32>,
    %c14_89 = arith.constant 14 : index
    %c0_90 = arith.constant 0 : index
    %55 = vector.load %arg1[%c14_89, %c0_90] : memref<16x256xf32, #tpu.memory_space<vmem>>, vector<2x128xf32>
    %c18_91 = arith.constant 18 : index
    %c128_92 = arith.constant 128 : index
    %56 = vector.load %arg9[%c18_91, %c128_92] : memref<36x512xf32, #tpu.memory_space<vmem>>, vector<2x128xf32>
    tpu.vector_store %arg9[%c18_91, %c128_92], %55 {strides = array<i32>} : memref<36x512xf32, #tpu.memory_space<vmem>>, vector<2x128xf32>,
    %c12_93 = arith.constant 12 : index
    %c1_94 = arith.constant 1 : index
    %57 = vector.load %arg1[%c12_93, %c1_94] : memref<16x256xf32, #tpu.memory_space<vmem>>, vector<4x128xf32>
    %c20 = arith.constant 20 : index
    %c128_95 = arith.constant 128 : index
    %58 = vector.load %arg9[%c20, %c128_95] : memref<36x512xf32, #tpu.memory_space<vmem>>, vector<4x128xf32>
    tpu.vector_store %arg9[%c20, %c128_95], %57 {strides = array<i32>} : memref<36x512xf32, #tpu.memory_space<vmem>>, vector<4x128xf32>,
    %c4_96 = arith.constant 4 : index
    %c7_97 = arith.constant 7 : index
    %59 = vector.load %arg1[%c4_96, %c7_97] : memref<16x256xf32, #tpu.memory_space<vmem>>, vector<4x128xf32>
    %c18_98 = arith.constant 18 : index
    %c256_99 = arith.constant 256 : index
    %60 = vector.load %arg9[%c18_98, %c256_99] : memref<36x512xf32, #tpu.memory_space<vmem>>, vector<4x128xf32>
    tpu.vector_store %arg9[%c18_98, %c256_99], %59 {strides = array<i32>} : memref<36x512xf32, #tpu.memory_space<vmem>>, vector<4x128xf32>,
    %c4_100 = arith.constant 4 : index
    %c8_101 = arith.constant 8 : index
    %61 = vector.load %arg1[%c4_100, %c8_101] : memref<16x256xf32, #tpu.memory_space<vmem>>, vector<2x128xf32>
    %c22_102 = arith.constant 22 : index
    %c256_103 = arith.constant 256 : index
    %62 = vector.load %arg9[%c22_102, %c256_103] : memref<36x512xf32, #tpu.memory_space<vmem>>, vector<2x128xf32>
    tpu.vector_store %arg9[%c22_102, %c256_103], %61 {strides = array<i32>} : memref<36x512xf32, #tpu.memory_space<vmem>>, vector<2x128xf32>,
    %c6_104 = arith.constant 6 : index
    %c7_105 = arith.constant 7 : index
    %63 = vector.load %arg1[%c6_104, %c7_105] : memref<16x256xf32, #tpu.memory_space<vmem>>, vector<2x128xf32>
    %c18_106 = arith.constant 18 : index
    %c384_107 = arith.constant 384 : index
    %64 = vector.load %arg9[%c18_106, %c384_107] : memref<36x512xf32, #tpu.memory_space<vmem>>, vector<2x128xf32>
    tpu.vector_store %arg9[%c18_106, %c384_107], %63 {strides = array<i32>} : memref<36x512xf32, #tpu.memory_space<vmem>>, vector<2x128xf32>,
    %c4_108 = arith.constant 4 : index
    %c8_109 = arith.constant 8 : index
    %65 = vector.load %arg1[%c4_108, %c8_109] : memref<16x256xf32, #tpu.memory_space<vmem>>, vector<4x128xf32>
    %c20_110 = arith.constant 20 : index
    %c384_111 = arith.constant 384 : index
    %66 = vector.load %arg9[%c20_110, %c384_111] : memref<36x512xf32, #tpu.memory_space<vmem>>, vector<4x128xf32>
    tpu.vector_store %arg9[%c20_110, %c384_111], %65 {strides = array<i32>} : memref<36x512xf32, #tpu.memory_space<vmem>>, vector<4x128xf32>,
    %c0_112 = arith.constant 0 : index
    %c7_113 = arith.constant 7 : index
    %67 = vector.load %arg1[%c0_112, %c7_113] : memref<16x256xf32, #tpu.memory_space<vmem>>, vector<4x128xf32>
    %c24 = arith.constant 24 : index
    %c0_114 = arith.constant 0 : index
    %68 = vector.load %arg9[%c24, %c0_114] : memref<36x512xf32, #tpu.memory_space<vmem>>, vector<4x128xf32>
    tpu.vector_store %arg9[%c24, %c0_114], %67 {strides = array<i32>} : memref<36x512xf32, #tpu.memory_space<vmem>>, vector<4x128xf32>,
    %c0_115 = arith.constant 0 : index
    %c8_116 = arith.constant 8 : index
    %69 = vector.load %arg1[%c0_115, %c8_116] : memref<16x256xf32, #tpu.memory_space<vmem>>, vector<2x128xf32>
    %c28 = arith.constant 28 : index
    %c0_117 = arith.constant 0 : index
    %70 = vector.load %arg9[%c28, %c0_117] : memref<36x512xf32, #tpu.memory_space<vmem>>, vector<2x128xf32>
    tpu.vector_store %arg9[%c28, %c0_117], %69 {strides = array<i32>} : memref<36x512xf32, #tpu.memory_space<vmem>>, vector<2x128xf32>,
    %c2_118 = arith.constant 2 : index
    %c7_119 = arith.constant 7 : index
    %71 = vector.load %arg1[%c2_118, %c7_119] : memref<16x256xf32, #tpu.memory_space<vmem>>, vector<2x128xf32>
    %c24_120 = arith.constant 24 : index
    %c128_121 = arith.constant 128 : index
    %72 = vector.load %arg9[%c24_120, %c128_121] : memref<36x512xf32, #tpu.memory_space<vmem>>, vector<2x128xf32>
    tpu.vector_store %arg9[%c24_120, %c128_121], %71 {strides = array<i32>} : memref<36x512xf32, #tpu.memory_space<vmem>>, vector<2x128xf32>,
    %c0_122 = arith.constant 0 : index
    %c8_123 = arith.constant 8 : index
    %73 = vector.load %arg1[%c0_122, %c8_123] : memref<16x256xf32, #tpu.memory_space<vmem>>, vector<4x128xf32>
    %c26 = arith.constant 26 : index
    %c128_124 = arith.constant 128 : index
    %74 = vector.load %arg9[%c26, %c128_124] : memref<36x512xf32, #tpu.memory_space<vmem>>, vector<4x128xf32>
    tpu.vector_store %arg9[%c26, %c128_124], %73 {strides = array<i32>} : memref<36x512xf32, #tpu.memory_space<vmem>>, vector<4x128xf32>,
    %c8_125 = arith.constant 8 : index
    %c7_126 = arith.constant 7 : index
    %75 = vector.load %arg1[%c8_125, %c7_126] : memref<16x256xf32, #tpu.memory_space<vmem>>, vector<4x128xf32>
    %c24_127 = arith.constant 24 : index
    %c256_128 = arith.constant 256 : index
    %76 = vector.load %arg9[%c24_127, %c256_128] : memref<36x512xf32, #tpu.memory_space<vmem>>, vector<4x128xf32>
    tpu.vector_store %arg9[%c24_127, %c256_128], %75 {strides = array<i32>} : memref<36x512xf32, #tpu.memory_space<vmem>>, vector<4x128xf32>,
    %c8_129 = arith.constant 8 : index
    %c8_130 = arith.constant 8 : index
    %77 = vector.load %arg1[%c8_129, %c8_130] : memref<16x256xf32, #tpu.memory_space<vmem>>, vector<2x128xf32>
    %c28_131 = arith.constant 28 : index
    %c256_132 = arith.constant 256 : index
    %78 = vector.load %arg9[%c28_131, %c256_132] : memref<36x512xf32, #tpu.memory_space<vmem>>, vector<2x128xf32>
    tpu.vector_store %arg9[%c28_131, %c256_132], %77 {strides = array<i32>} : memref<36x512xf32, #tpu.memory_space<vmem>>, vector<2x128xf32>,
    %c10_133 = arith.constant 10 : index
    %c7_134 = arith.constant 7 : index
    %79 = vector.load %arg1[%c10_133, %c7_134] : memref<16x256xf32, #tpu.memory_space<vmem>>, vector<2x128xf32>
    %c24_135 = arith.constant 24 : index
    %c384_136 = arith.constant 384 : index
    %80 = vector.load %arg9[%c24_135, %c384_136] : memref<36x512xf32, #tpu.memory_space<vmem>>, vector<2x128xf32>
    tpu.vector_store %arg9[%c24_135, %c384_136], %79 {strides = array<i32>} : memref<36x512xf32, #tpu.memory_space<vmem>>, vector<2x128xf32>,
    %c8_137 = arith.constant 8 : index
    %c8_138 = arith.constant 8 : index
    %81 = vector.load %arg1[%c8_137, %c8_138] : memref<16x256xf32, #tpu.memory_space<vmem>>, vector<4x128xf32>
    %c26_139 = arith.constant 26 : index
    %c384_140 = arith.constant 384 : index
    %82 = vector.load %arg9[%c26_139, %c384_140] : memref<36x512xf32, #tpu.memory_space<vmem>>, vector<4x128xf32>
    tpu.vector_store %arg9[%c26_139, %c384_140], %81 {strides = array<i32>} : memref<36x512xf32, #tpu.memory_space<vmem>>, vector<4x128xf32>,
    %c4_141 = arith.constant 4 : index
    %c7_142 = arith.constant 7 : index
    %83 = vector.load %arg1[%c4_141, %c7_142] : memref<16x256xf32, #tpu.memory_space<vmem>>, vector<4x128xf32>
    %c30 = arith.constant 30 : index
    %c0_143 = arith.constant 0 : index
    %84 = vector.load %arg9[%c30, %c0_143] : memref<36x512xf32, #tpu.memory_space<vmem>>, vector<4x128xf32>
    tpu.vector_store %arg9[%c30, %c0_143], %83 {strides = array<i32>} : memref<36x512xf32, #tpu.memory_space<vmem>>, vector<4x128xf32>,
    %c4_144 = arith.constant 4 : index
    %c8_145 = arith.constant 8 : index
    %85 = vector.load %arg1[%c4_144, %c8_145] : memref<16x256xf32, #tpu.memory_space<vmem>>, vector<2x128xf32>
    %c34 = arith.constant 34 : index
    %c0_146 = arith.constant 0 : index
    %86 = vector.load %arg9[%c34, %c0_146] : memref<36x512xf32, #tpu.memory_space<vmem>>, vector<2x128xf32>
    tpu.vector_store %arg9[%c34, %c0_146], %85 {strides = array<i32>} : memref<36x512xf32, #tpu.memory_space<vmem>>, vector<2x128xf32>,
    %c6_147 = arith.constant 6 : index
    %c7_148 = arith.constant 7 : index
    %87 = vector.load %arg1[%c6_147, %c7_148] : memref<16x256xf32, #tpu.memory_space<vmem>>, vector<2x128xf32>
    %c30_149 = arith.constant 30 : index
    %c128_150 = arith.constant 128 : index
    %88 = vector.load %arg9[%c30_149, %c128_150] : memref<36x512xf32, #tpu.memory_space<vmem>>, vector<2x128xf32>
    tpu.vector_store %arg9[%c30_149, %c128_150], %87 {strides = array<i32>} : memref<36x512xf32, #tpu.memory_space<vmem>>, vector<2x128xf32>,
    %c4_151 = arith.constant 4 : index
    %c8_152 = arith.constant 8 : index
    %89 = vector.load %arg1[%c4_151, %c8_152] : memref<16x256xf32, #tpu.memory_space<vmem>>, vector<4x128xf32>
    %c32 = arith.constant 32 : index
    %c128_153 = arith.constant 128 : index
    %90 = vector.load %arg9[%c32, %c128_153] : memref<36x512xf32, #tpu.memory_space<vmem>>, vector<4x128xf32>
    tpu.vector_store %arg9[%c32, %c128_153], %89 {strides = array<i32>} : memref<36x512xf32, #tpu.memory_space<vmem>>, vector<4x128xf32>,
    %c12_154 = arith.constant 12 : index
    %c7_155 = arith.constant 7 : index
    %91 = vector.load %arg1[%c12_154, %c7_155] : memref<16x256xf32, #tpu.memory_space<vmem>>, vector<4x128xf32>
    %c30_156 = arith.constant 30 : index
    %c256_157 = arith.constant 256 : index
    %92 = vector.load %arg9[%c30_156, %c256_157] : memref<36x512xf32, #tpu.memory_space<vmem>>, vector<4x128xf32>
    tpu.vector_store %arg9[%c30_156, %c256_157], %91 {strides = array<i32>} : memref<36x512xf32, #tpu.memory_space<vmem>>, vector<4x128xf32>,
    %c12_158 = arith.constant 12 : index
    %c8_159 = arith.constant 8 : index
    %93 = vector.load %arg1[%c12_158, %c8_159] : memref<16x256xf32, #tpu.memory_space<vmem>>, vector<2x128xf32>
    %c34_160 = arith.constant 34 : index
    %c256_161 = arith.constant 256 : index
    %94 = vector.load %arg9[%c34_160, %c256_161] : memref<36x512xf32, #tpu.memory_space<vmem>>, vector<2x128xf32>
    tpu.vector_store %arg9[%c34_160, %c256_161], %93 {strides = array<i32>} : memref<36x512xf32, #tpu.memory_space<vmem>>, vector<2x128xf32>,
    %c14_162 = arith.constant 14 : index
    %c7_163 = arith.constant 7 : index
    %95 = vector.load %arg1[%c14_162, %c7_163] : memref<16x256xf32, #tpu.memory_space<vmem>>, vector<2x128xf32>
    %c30_164 = arith.constant 30 : index
    %c384_165 = arith.constant 384 : index
    %96 = vector.load %arg9[%c30_164, %c384_165] : memref<36x512xf32, #tpu.memory_space<vmem>>, vector<2x128xf32>
    tpu.vector_store %arg9[%c30_164, %c384_165], %95 {strides = array<i32>} : memref<36x512xf32, #tpu.memory_space<vmem>>, vector<2x128xf32>,
    %c12_166 = arith.constant 12 : index
    %c8_167 = arith.constant 8 : index
    %97 = vector.load %arg1[%c12_166, %c8_167] : memref<16x256xf32, #tpu.memory_space<vmem>>, vector<4x128xf32>
    %c32_168 = arith.constant 32 : index
    %c384_169 = arith.constant 384 : index
    %98 = vector.load %arg9[%c32_168, %c384_169] : memref<36x512xf32, #tpu.memory_space<vmem>>, vector<4x128xf32>
    tpu.vector_store %arg9[%c32_168, %c384_169], %97 {strides = array<i32>} : memref<36x512xf32, #tpu.memory_space<vmem>>, vector<4x128xf32>,
    %c0_170 = arith.constant 0 : index
    %c0_171 = arith.constant 0 : index
    %99 = vector.load %arg2[%c0_170, %c0_171] : memref<40x36xf32, #tpu.memory_space<vmem>>, vector<40x36xf32>
    %c0_172 = arith.constant 0 : index
    %c0_173 = arith.constant 0 : index
    %100 = vector.load %arg9[%c0_172, %c0_173] : memref<36x512xf32, #tpu.memory_space<vmem>>, vector<36x512xf32>
    %cst = arith.constant dense<0.000000e+00> : vector<40x512xf32>
    %101 = tpu.matmul %99, %100, %cst {dimension_numbers = #tpu.dot_dimension_numbers<[1], [0], [0], [1], [0, 0, 1, 1], [], []>} : vector<40x36xf32>, vector<36x512xf32>, vector<40x512xf32> -> vector<40x512xf32>
    %c0_174 = arith.constant 0 : index
    %c0_175 = arith.constant 0 : index
    %102 = vector.load %arg3[%c0_174, %c0_175] : memref<40x1xf32, #tpu.memory_space<vmem>>, vector<40x1xf32>
    %103 = vector.broadcast %102 : vector<40x1xf32> to vector<40x512xf32>
    %104 = arith.addf %101, %103 : vector<40x512xf32>
    %cst_176 = arith.constant 0.000000e+00 : f32
    %105 = vector.broadcast %cst_176 : f32 to vector<40x512xf32>
    %106 = arith.maximumf %104, %105 : vector<40x512xf32>
    %c0_177 = arith.constant 0 : index
    %c0_178 = arith.constant 0 : index
    %107 = vector.load %arg10[%c0_177, %c0_178] : memref<40x640xf32, #tpu.memory_space<vmem>>, vector<40x512xf32>
    tpu.vector_store %arg10[%c0_177, %c0_178], %106 {strides = array<i32>} : memref<40x640xf32, #tpu.memory_space<vmem>>, vector<40x512xf32>,
    %c0_179 = arith.constant 0 : index
    %c0_180 = arith.constant 0 : index
    %108 = vector.load %arg10[%c0_179, %c0_180] : memref<40x640xf32, #tpu.memory_space<vmem>>, vector<40x128xf32>
    %c0_181 = arith.constant 0 : index
    %c0_182 = arith.constant 0 : index
    %109 = vector.load %arg11[%c0_181, %c0_182] : memref<1440x128xf32, #tpu.memory_space<vmem>>, vector<40x128xf32>
    tpu.vector_store %arg11[%c0_181, %c0_182], %108 {strides = array<i32>} : memref<1440x128xf32, #tpu.memory_space<vmem>>, vector<40x128xf32>,
    %c0_183 = arith.constant 0 : index
    %c128_184 = arith.constant 128 : index
    %110 = vector.load %arg10[%c0_183, %c128_184] : memref<40x640xf32, #tpu.memory_space<vmem>>, vector<40x128xf32>
    %c40 = arith.constant 40 : index
    %c0_185 = arith.constant 0 : index
    %111 = vector.load %arg11[%c40, %c0_185] : memref<1440x128xf32, #tpu.memory_space<vmem>>, vector<40x128xf32>
    tpu.vector_store %arg11[%c40, %c0_185], %110 {strides = array<i32>} : memref<1440x128xf32, #tpu.memory_space<vmem>>, vector<40x128xf32>,
    %c0_186 = arith.constant 0 : index
    %c1_187 = arith.constant 1 : index
    %112 = vector.load %arg10[%c0_186, %c1_187] : memref<40x640xf32, #tpu.memory_space<vmem>>, vector<40x128xf32>
    %c80 = arith.constant 80 : index
    %c0_188 = arith.constant 0 : index
    %113 = vector.load %arg11[%c80, %c0_188] : memref<1440x128xf32, #tpu.memory_space<vmem>>, vector<40x128xf32>
    tpu.vector_store %arg11[%c80, %c0_188], %112 {strides = array<i32>} : memref<1440x128xf32, #tpu.memory_space<vmem>>, vector<40x128xf32>,
    %c0_189 = arith.constant 0 : index
    %c129 = arith.constant 129 : index
    %114 = vector.load %arg10[%c0_189, %c129] : memref<40x640xf32, #tpu.memory_space<vmem>>, vector<40x128xf32>
    %c120 = arith.constant 120 : index
    %c0_190 = arith.constant 0 : index
    %115 = vector.load %arg11[%c120, %c0_190] : memref<1440x128xf32, #tpu.memory_space<vmem>>, vector<40x128xf32>
    tpu.vector_store %arg11[%c120, %c0_190], %114 {strides = array<i32>} : memref<1440x128xf32, #tpu.memory_space<vmem>>, vector<40x128xf32>,
    %c0_191 = arith.constant 0 : index
    %c2_192 = arith.constant 2 : index
    %116 = vector.load %arg10[%c0_191, %c2_192] : memref<40x640xf32, #tpu.memory_space<vmem>>, vector<40x128xf32>
    %c160 = arith.constant 160 : index
    %c0_193 = arith.constant 0 : index
    %117 = vector.load %arg11[%c160, %c0_193] : memref<1440x128xf32, #tpu.memory_space<vmem>>, vector<40x128xf32>
    tpu.vector_store %arg11[%c160, %c0_193], %116 {strides = array<i32>} : memref<1440x128xf32, #tpu.memory_space<vmem>>, vector<40x128xf32>,
    %c0_194 = arith.constant 0 : index
    %c130 = arith.constant 130 : index
    %118 = vector.load %arg10[%c0_194, %c130] : memref<40x640xf32, #tpu.memory_space<vmem>>, vector<40x128xf32>
    %c200 = arith.constant 200 : index
    %c0_195 = arith.constant 0 : index
    %119 = vector.load %arg11[%c200, %c0_195] : memref<1440x128xf32, #tpu.memory_space<vmem>>, vector<40x128xf32>
    tpu.vector_store %arg11[%c200, %c0_195], %118 {strides = array<i32>} : memref<1440x128xf32, #tpu.memory_space<vmem>>, vector<40x128xf32>,
    %c0_196 = arith.constant 0 : index
    %c256_197 = arith.constant 256 : index
    %120 = vector.load %arg10[%c0_196, %c256_197] : memref<40x640xf32, #tpu.memory_space<vmem>>, vector<40x128xf32>
    %c240 = arith.constant 240 : index
    %c0_198 = arith.constant 0 : index
    %121 = vector.load %arg11[%c240, %c0_198] : memref<1440x128xf32, #tpu.memory_space<vmem>>, vector<40x128xf32>
    tpu.vector_store %arg11[%c240, %c0_198], %120 {strides = array<i32>} : memref<1440x128xf32, #tpu.memory_space<vmem>>, vector<40x128xf32>,
    %c0_199 = arith.constant 0 : index
    %c384_200 = arith.constant 384 : index
    %122 = vector.load %arg10[%c0_199, %c384_200] : memref<40x640xf32, #tpu.memory_space<vmem>>, vector<40x128xf32>
    %c280 = arith.constant 280 : index
    %c0_201 = arith.constant 0 : index
    %123 = vector.load %arg11[%c280, %c0_201] : memref<1440x128xf32, #tpu.memory_space<vmem>>, vector<40x128xf32>
    tpu.vector_store %arg11[%c280, %c0_201], %122 {strides = array<i32>} : memref<1440x128xf32, #tpu.memory_space<vmem>>, vector<40x128xf32>,
    %c0_202 = arith.constant 0 : index
    %c257 = arith.constant 257 : index
    %124 = vector.load %arg10[%c0_202, %c257] : memref<40x640xf32, #tpu.memory_space<vmem>>, vector<40x128xf32>
    %c320 = arith.constant 320 : index
    %c0_203 = arith.constant 0 : index
    %125 = vector.load %arg11[%c320, %c0_203] : memref<1440x128xf32, #tpu.memory_space<vmem>>, vector<40x128xf32>
    tpu.vector_store %arg11[%c320, %c0_203], %124 {strides = array<i32>} : memref<1440x128xf32, #tpu.memory_space<vmem>>, vector<40x128xf32>,
    %c0_204 = arith.constant 0 : index
    %c385 = arith.constant 385 : index
    %126 = vector.load %arg10[%c0_204, %c385] : memref<40x640xf32, #tpu.memory_space<vmem>>, vector<40x128xf32>
    %c360 = arith.constant 360 : index
    %c0_205 = arith.constant 0 : index
    %127 = vector.load %arg11[%c360, %c0_205] : memref<1440x128xf32, #tpu.memory_space<vmem>>, vector<40x128xf32>
    tpu.vector_store %arg11[%c360, %c0_205], %126 {strides = array<i32>} : memref<1440x128xf32, #tpu.memory_space<vmem>>, vector<40x128xf32>,
    %c0_206 = arith.constant 0 : index
    %c258 = arith.constant 258 : index
    %128 = vector.load %arg10[%c0_206, %c258] : memref<40x640xf32, #tpu.memory_space<vmem>>, vector<40x128xf32>
    %c400 = arith.constant 400 : index
    %c0_207 = arith.constant 0 : index
    %129 = vector.load %arg11[%c400, %c0_207] : memref<1440x128xf32, #tpu.memory_space<vmem>>, vector<40x128xf32>
    tpu.vector_store %arg11[%c400, %c0_207], %128 {strides = array<i32>} : memref<1440x128xf32, #tpu.memory_space<vmem>>, vector<40x128xf32>,
    %c0_208 = arith.constant 0 : index
    %c386 = arith.constant 386 : index
    %130 = vector.load %arg10[%c0_208, %c386] : memref<40x640xf32, #tpu.memory_space<vmem>>, vector<40x128xf32>
    %c440 = arith.constant 440 : index
    %c0_209 = arith.constant 0 : index
    %131 = vector.load %arg11[%c440, %c0_209] : memref<1440x128xf32, #tpu.memory_space<vmem>>, vector<40x128xf32>
    tpu.vector_store %arg11[%c440, %c0_209], %130 {strides = array<i32>} : memref<1440x128xf32, #tpu.memory_space<vmem>>, vector<40x128xf32>,
    %c0_210 = arith.constant 0 : index
    %c7_211 = arith.constant 7 : index
    %132 = vector.load %arg10[%c0_210, %c7_211] : memref<40x640xf32, #tpu.memory_space<vmem>>, vector<40x128xf32>
    %c480 = arith.constant 480 : index
    %c0_212 = arith.constant 0 : index
    %133 = vector.load %arg11[%c480, %c0_212] : memref<1440x128xf32, #tpu.memory_space<vmem>>, vector<40x128xf32>
    tpu.vector_store %arg11[%c480, %c0_212], %132 {strides = array<i32>} : memref<1440x128xf32, #tpu.memory_space<vmem>>, vector<40x128xf32>,
    %c0_213 = arith.constant 0 : index
    %c135 = arith.constant 135 : index
    %134 = vector.load %arg10[%c0_213, %c135] : memref<40x640xf32, #tpu.memory_space<vmem>>, vector<40x128xf32>
    %c520 = arith.constant 520 : index
    %c0_214 = arith.constant 0 : index
    %135 = vector.load %arg11[%c520, %c0_214] : memref<1440x128xf32, #tpu.memory_space<vmem>>, vector<40x128xf32>
    tpu.vector_store %arg11[%c520, %c0_214], %134 {strides = array<i32>} : memref<1440x128xf32, #tpu.memory_space<vmem>>, vector<40x128xf32>,
    %c0_215 = arith.constant 0 : index
    %c8_216 = arith.constant 8 : index
    %136 = vector.load %arg10[%c0_215, %c8_216] : memref<40x640xf32, #tpu.memory_space<vmem>>, vector<40x128xf32>
    %c560 = arith.constant 560 : index
    %c0_217 = arith.constant 0 : index
    %137 = vector.load %arg11[%c560, %c0_217] : memref<1440x128xf32, #tpu.memory_space<vmem>>, vector<40x128xf32>
    tpu.vector_store %arg11[%c560, %c0_217], %136 {strides = array<i32>} : memref<1440x128xf32, #tpu.memory_space<vmem>>, vector<40x128xf32>,
    %c0_218 = arith.constant 0 : index
    %c136 = arith.constant 136 : index
    %138 = vector.load %arg10[%c0_218, %c136] : memref<40x640xf32, #tpu.memory_space<vmem>>, vector<40x128xf32>
    %c600 = arith.constant 600 : index
    %c0_219 = arith.constant 0 : index
    %139 = vector.load %arg11[%c600, %c0_219] : memref<1440x128xf32, #tpu.memory_space<vmem>>, vector<40x128xf32>
    tpu.vector_store %arg11[%c600, %c0_219], %138 {strides = array<i32>} : memref<1440x128xf32, #tpu.memory_space<vmem>>, vector<40x128xf32>,
    %c0_220 = arith.constant 0 : index
    %c9 = arith.constant 9 : index
    %140 = vector.load %arg10[%c0_220, %c9] : memref<40x640xf32, #tpu.memory_space<vmem>>, vector<40x128xf32>
    %c640 = arith.constant 640 : index
    %c0_221 = arith.constant 0 : index
    %141 = vector.load %arg11[%c640, %c0_221] : memref<1440x128xf32, #tpu.memory_space<vmem>>, vector<40x128xf32>
    tpu.vector_store %arg11[%c640, %c0_221], %140 {strides = array<i32>} : memref<1440x128xf32, #tpu.memory_space<vmem>>, vector<40x128xf32>,
    %c0_222 = arith.constant 0 : index
    %c137 = arith.constant 137 : index
    %142 = vector.load %arg10[%c0_222, %c137] : memref<40x640xf32, #tpu.memory_space<vmem>>, vector<40x128xf32>
    %c680 = arith.constant 680 : index
    %c0_223 = arith.constant 0 : index
    %143 = vector.load %arg11[%c680, %c0_223] : memref<1440x128xf32, #tpu.memory_space<vmem>>, vector<40x128xf32>
    tpu.vector_store %arg11[%c680, %c0_223], %142 {strides = array<i32>} : memref<1440x128xf32, #tpu.memory_space<vmem>>, vector<40x128xf32>,
    %c0_224 = arith.constant 0 : index
    %c263 = arith.constant 263 : index
    %144 = vector.load %arg10[%c0_224, %c263] : memref<40x640xf32, #tpu.memory_space<vmem>>, vector<40x128xf32>
    %c720 = arith.constant 720 : index
    %c0_225 = arith.constant 0 : index
    %145 = vector.load %arg11[%c720, %c0_225] : memref<1440x128xf32, #tpu.memory_space<vmem>>, vector<40x128xf32>
    tpu.vector_store %arg11[%c720, %c0_225], %144 {strides = array<i32>} : memref<1440x128xf32, #tpu.memory_space<vmem>>, vector<40x128xf32>,
    %c0_226 = arith.constant 0 : index
    %c391 = arith.constant 391 : index
    %146 = vector.load %arg10[%c0_226, %c391] : memref<40x640xf32, #tpu.memory_space<vmem>>, vector<40x128xf32>
    %c760 = arith.constant 760 : index
    %c0_227 = arith.constant 0 : index
    %147 = vector.load %arg11[%c760, %c0_227] : memref<1440x128xf32, #tpu.memory_space<vmem>>, vector<40x128xf32>
    tpu.vector_store %arg11[%c760, %c0_227], %146 {strides = array<i32>} : memref<1440x128xf32, #tpu.memory_space<vmem>>, vector<40x128xf32>,
    %c0_228 = arith.constant 0 : index
    %c264 = arith.constant 264 : index
    %148 = vector.load %arg10[%c0_228, %c264] : memref<40x640xf32, #tpu.memory_space<vmem>>, vector<40x128xf32>
    %c800 = arith.constant 800 : index
    %c0_229 = arith.constant 0 : index
    %149 = vector.load %arg11[%c800, %c0_229] : memref<1440x128xf32, #tpu.memory_space<vmem>>, vector<40x128xf32>
    tpu.vector_store %arg11[%c800, %c0_229], %148 {strides = array<i32>} : memref<1440x128xf32, #tpu.memory_space<vmem>>, vector<40x128xf32>,
    %c0_230 = arith.constant 0 : index
    %c392 = arith.constant 392 : index
    %150 = vector.load %arg10[%c0_230, %c392] : memref<40x640xf32, #tpu.memory_space<vmem>>, vector<40x128xf32>
    %c840 = arith.constant 840 : index
    %c0_231 = arith.constant 0 : index
    %151 = vector.load %arg11[%c840, %c0_231] : memref<1440x128xf32, #tpu.memory_space<vmem>>, vector<40x128xf32>
    tpu.vector_store %arg11[%c840, %c0_231], %150 {strides = array<i32>} : memref<1440x128xf32, #tpu.memory_space<vmem>>, vector<40x128xf32>,
    %c0_232 = arith.constant 0 : index
    %c265 = arith.constant 265 : index
    %152 = vector.load %arg10[%c0_232, %c265] : memref<40x640xf32, #tpu.memory_space<vmem>>, vector<40x128xf32>
    %c880 = arith.constant 880 : index
    %c0_233 = arith.constant 0 : index
    %153 = vector.load %arg11[%c880, %c0_233] : memref<1440x128xf32, #tpu.memory_space<vmem>>, vector<40x128xf32>
    tpu.vector_store %arg11[%c880, %c0_233], %152 {strides = array<i32>} : memref<1440x128xf32, #tpu.memory_space<vmem>>, vector<40x128xf32>,
    %c0_234 = arith.constant 0 : index
    %c393 = arith.constant 393 : index
    %154 = vector.load %arg10[%c0_234, %c393] : memref<40x640xf32, #tpu.memory_space<vmem>>, vector<40x128xf32>
    %c920 = arith.constant 920 : index
    %c0_235 = arith.constant 0 : index
    %155 = vector.load %arg11[%c920, %c0_235] : memref<1440x128xf32, #tpu.memory_space<vmem>>, vector<40x128xf32>
    tpu.vector_store %arg11[%c920, %c0_235], %154 {strides = array<i32>} : memref<1440x128xf32, #tpu.memory_space<vmem>>, vector<40x128xf32>,
    %c0_236 = arith.constant 0 : index
    %c14_237 = arith.constant 14 : index
    %156 = vector.load %arg10[%c0_236, %c14_237] : memref<40x640xf32, #tpu.memory_space<vmem>>, vector<40x128xf32>
    %c960 = arith.constant 960 : index
    %c0_238 = arith.constant 0 : index
    %157 = vector.load %arg11[%c960, %c0_238] : memref<1440x128xf32, #tpu.memory_space<vmem>>, vector<40x128xf32>
    tpu.vector_store %arg11[%c960, %c0_238], %156 {strides = array<i32>} : memref<1440x128xf32, #tpu.memory_space<vmem>>, vector<40x128xf32>,
    %c0_239 = arith.constant 0 : index
    %c142 = arith.constant 142 : index
    %158 = vector.load %arg10[%c0_239, %c142] : memref<40x640xf32, #tpu.memory_space<vmem>>, vector<40x128xf32>
    %c1000 = arith.constant 1000 : index
    %c0_240 = arith.constant 0 : index
    %159 = vector.load %arg11[%c1000, %c0_240] : memref<1440x128xf32, #tpu.memory_space<vmem>>, vector<40x128xf32>
    tpu.vector_store %arg11[%c1000, %c0_240], %158 {strides = array<i32>} : memref<1440x128xf32, #tpu.memory_space<vmem>>, vector<40x128xf32>,
    %c0_241 = arith.constant 0 : index
    %c15 = arith.constant 15 : index
    %160 = vector.load %arg10[%c0_241, %c15] : memref<40x640xf32, #tpu.memory_space<vmem>>, vector<40x128xf32>
    %c1040 = arith.constant 1040 : index
    %c0_242 = arith.constant 0 : index
    %161 = vector.load %arg11[%c1040, %c0_242] : memref<1440x128xf32, #tpu.memory_space<vmem>>, vector<40x128xf32>
    tpu.vector_store %arg11[%c1040, %c0_242], %160 {strides = array<i32>} : memref<1440x128xf32, #tpu.memory_space<vmem>>, vector<40x128xf32>,
    %c0_243 = arith.constant 0 : index
    %c143 = arith.constant 143 : index
    %162 = vector.load %arg10[%c0_243, %c143] : memref<40x640xf32, #tpu.memory_space<vmem>>, vector<40x128xf32>
    %c1080 = arith.constant 1080 : index
    %c0_244 = arith.constant 0 : index
    %163 = vector.load %arg11[%c1080, %c0_244] : memref<1440x128xf32, #tpu.memory_space<vmem>>, vector<40x128xf32>
    tpu.vector_store %arg11[%c1080, %c0_244], %162 {strides = array<i32>} : memref<1440x128xf32, #tpu.memory_space<vmem>>, vector<40x128xf32>,
    %c0_245 = arith.constant 0 : index
    %c16_246 = arith.constant 16 : index
    %164 = vector.load %arg10[%c0_245, %c16_246] : memref<40x640xf32, #tpu.memory_space<vmem>>, vector<40x128xf32>
    %c1120 = arith.constant 1120 : index
    %c0_247 = arith.constant 0 : index
    %165 = vector.load %arg11[%c1120, %c0_247] : memref<1440x128xf32, #tpu.memory_space<vmem>>, vector<40x128xf32>
    tpu.vector_store %arg11[%c1120, %c0_247], %164 {strides = array<i32>} : memref<1440x128xf32, #tpu.memory_space<vmem>>, vector<40x128xf32>,
    %c0_248 = arith.constant 0 : index
    %c144 = arith.constant 144 : index
    %166 = vector.load %arg10[%c0_248, %c144] : memref<40x640xf32, #tpu.memory_space<vmem>>, vector<40x128xf32>
    %c1160 = arith.constant 1160 : index
    %c0_249 = arith.constant 0 : index
    %167 = vector.load %arg11[%c1160, %c0_249] : memref<1440x128xf32, #tpu.memory_space<vmem>>, vector<40x128xf32>
    tpu.vector_store %arg11[%c1160, %c0_249], %166 {strides = array<i32>} : memref<1440x128xf32, #tpu.memory_space<vmem>>, vector<40x128xf32>,
    %c0_250 = arith.constant 0 : index
    %c270 = arith.constant 270 : index
    %168 = vector.load %arg10[%c0_250, %c270] : memref<40x640xf32, #tpu.memory_space<vmem>>, vector<40x128xf32>
    %c1200 = arith.constant 1200 : index
    %c0_251 = arith.constant 0 : index
    %169 = vector.load %arg11[%c1200, %c0_251] : memref<1440x128xf32, #tpu.memory_space<vmem>>, vector<40x128xf32>
    tpu.vector_store %arg11[%c1200, %c0_251], %168 {strides = array<i32>} : memref<1440x128xf32, #tpu.memory_space<vmem>>, vector<40x128xf32>,
    %c0_252 = arith.constant 0 : index
    %c398 = arith.constant 398 : index
    %170 = vector.load %arg10[%c0_252, %c398] : memref<40x640xf32, #tpu.memory_space<vmem>>, vector<40x128xf32>
    %c1240 = arith.constant 1240 : index
    %c0_253 = arith.constant 0 : index
    %171 = vector.load %arg11[%c1240, %c0_253] : memref<1440x128xf32, #tpu.memory_space<vmem>>, vector<40x128xf32>
    tpu.vector_store %arg11[%c1240, %c0_253], %170 {strides = array<i32>} : memref<1440x128xf32, #tpu.memory_space<vmem>>, vector<40x128xf32>,
    %c0_254 = arith.constant 0 : index
    %c271 = arith.constant 271 : index
    %172 = vector.load %arg10[%c0_254, %c271] : memref<40x640xf32, #tpu.memory_space<vmem>>, vector<40x128xf32>
    %c1280 = arith.constant 1280 : index
    %c0_255 = arith.constant 0 : index
    %173 = vector.load %arg11[%c1280, %c0_255] : memref<1440x128xf32, #tpu.memory_space<vmem>>, vector<40x128xf32>
    tpu.vector_store %arg11[%c1280, %c0_255], %172 {strides = array<i32>} : memref<1440x128xf32, #tpu.memory_space<vmem>>, vector<40x128xf32>,
    %c0_256 = arith.constant 0 : index
    %c399 = arith.constant 399 : index
    %174 = vector.load %arg10[%c0_256, %c399] : memref<40x640xf32, #tpu.memory_space<vmem>>, vector<40x128xf32>
    %c1320 = arith.constant 1320 : index
    %c0_257 = arith.constant 0 : index
    %175 = vector.load %arg11[%c1320, %c0_257] : memref<1440x128xf32, #tpu.memory_space<vmem>>, vector<40x128xf32>
    tpu.vector_store %arg11[%c1320, %c0_257], %174 {strides = array<i32>} : memref<1440x128xf32, #tpu.memory_space<vmem>>, vector<40x128xf32>,
    %c0_258 = arith.constant 0 : index
    %c272 = arith.constant 272 : index
    %176 = vector.load %arg10[%c0_258, %c272] : memref<40x640xf32, #tpu.memory_space<vmem>>, vector<40x128xf32>
    %c1360 = arith.constant 1360 : index
    %c0_259 = arith.constant 0 : index
    %177 = vector.load %arg11[%c1360, %c0_259] : memref<1440x128xf32, #tpu.memory_space<vmem>>, vector<40x128xf32>
    tpu.vector_store %arg11[%c1360, %c0_259], %176 {strides = array<i32>} : memref<1440x128xf32, #tpu.memory_space<vmem>>, vector<40x128xf32>,
    %c0_260 = arith.constant 0 : index
    %c400_261 = arith.constant 400 : index
    %178 = vector.load %arg10[%c0_260, %c400_261] : memref<40x640xf32, #tpu.memory_space<vmem>>, vector<40x128xf32>
    %c1400 = arith.constant 1400 : index
    %c0_262 = arith.constant 0 : index
    %179 = vector.load %arg11[%c1400, %c0_262] : memref<1440x128xf32, #tpu.memory_space<vmem>>, vector<40x128xf32>
    tpu.vector_store %arg11[%c1400, %c0_262], %178 {strides = array<i32>} : memref<1440x128xf32, #tpu.memory_space<vmem>>, vector<40x128xf32>,
    %c0_263 = arith.constant 0 : index
    %c0_264 = arith.constant 0 : index
    %180 = vector.load %arg4[%c0_263, %c0_264] : memref<20x1440xf32, #tpu.memory_space<vmem>>, vector<20x1440xf32>
    %c0_265 = arith.constant 0 : index
    %c0_266 = arith.constant 0 : index
    %181 = vector.load %arg11[%c0_265, %c0_266] : memref<1440x128xf32, #tpu.memory_space<vmem>>, vector<1440x128xf32>
    %cst_267 = arith.constant dense<0.000000e+00> : vector<20x128xf32>
    %182 = tpu.matmul %180, %181, %cst_267 {dimension_numbers = #tpu.dot_dimension_numbers<[1], [0], [0], [1], [0, 0, 1, 1], [], []>} : vector<20x1440xf32>, vector<1440x128xf32>, vector<20x128xf32> -> vector<20x128xf32>
    %c0_268 = arith.constant 0 : index
    %c0_269 = arith.constant 0 : index
    %183 = vector.load %arg5[%c0_268, %c0_269] : memref<20x1xf32, #tpu.memory_space<vmem>>, vector<20x1xf32>
    %184 = vector.broadcast %183 : vector<20x1xf32> to vector<20x128xf32>
    %185 = arith.addf %182, %184 : vector<20x128xf32>
    %cst_270 = arith.constant 0.000000e+00 : f32
    %186 = vector.broadcast %cst_270 : f32 to vector<20x128xf32>
    %187 = arith.maximumf %185, %186 : vector<20x128xf32>
    %c0_271 = arith.constant 0 : index
    %c0_272 = arith.constant 0 : index
    %c0_273 = arith.constant 0 : index
    %188 = vector.load %arg6[%c0_271, %c0_272, %c0_273] : memref<10x20x49xf32, #tpu.memory_space<vmem>>, vector<10x20x49xf32>
    %c0_274 = arith.constant 0 : index
    %c0_275 = arith.constant 0 : index
    %189 = vector.load %arg7[%c0_274, %c0_275] : memref<10x1xf32, #tpu.memory_space<vmem>>, vector<10x1xf32>
    %190 = vector.extract_strided_slice %187 {offsets = [0, 0], sizes = [20, 49], strides = [1, 1]} : vector<20x128xf32> to vector<20x49xf32>
    %191 = vector.shape_cast %190 : vector<20x49xf32> to vector<1x20x49xf32>
    %192 = vector.broadcast %191 : vector<1x20x49xf32> to vector<10x20x49xf32>
    %193 = arith.mulf %188, %192 : vector<10x20x49xf32>
    %cst_276 = arith.constant dense<0.000000e+00> : vector<10x20xf32>
    %194 = vector.multi_reduction <add>, %193, %cst_276 [2] : vector<10x20x49xf32> to vector<10x20xf32>
    %cst_277 = arith.constant dense<0.000000e+00> : vector<10xf32>
    %195 = vector.multi_reduction <add>, %194, %cst_277 [1] : vector<10x20xf32> to vector<10xf32>
    %196 = vector.shape_cast %195 : vector<10xf32> to vector<10x1xf32>
    %197 = arith.addf %196, %189 : vector<10x1xf32>
    %c0_278 = arith.constant 0 : index
    %c0_279 = arith.constant 0 : index
    %c0_280 = arith.constant 0 : index
    %198 = vector.load %arg8[%c0_278, %c0_279, %c0_280] : memref<1x10x2xf32, #tpu.memory_space<vmem>>, vector<1x10x1xf32>
    %199 = vector.shape_cast %198 : vector<1x10x1xf32> to vector<10x1xf32>
    %200 = vector.shape_cast %197 : vector<10x1xf32> to vector<1x10x1xf32>
    tpu.vector_store %arg8[%c0_278, %c0_279, %c0_280], %200 {strides = array<i32>} : memref<1x10x2xf32, #tpu.memory_space<vmem>>, vector<1x10x1xf32>,
    %201 = vector.extract_strided_slice %187 {offsets = [0, 49], sizes = [20, 49], strides = [1, 1]} : vector<20x128xf32> to vector<20x49xf32>
    %202 = vector.shape_cast %201 : vector<20x49xf32> to vector<1x20x49xf32>
    %203 = vector.broadcast %202 : vector<1x20x49xf32> to vector<10x20x49xf32>
    %204 = arith.mulf %188, %203 : vector<10x20x49xf32>
    %cst_281 = arith.constant dense<0.000000e+00> : vector<10x20xf32>
    %205 = vector.multi_reduction <add>, %204, %cst_281 [2] : vector<10x20x49xf32> to vector<10x20xf32>
    %cst_282 = arith.constant dense<0.000000e+00> : vector<10xf32>
    %206 = vector.multi_reduction <add>, %205, %cst_282 [1] : vector<10x20xf32> to vector<10xf32>
    %207 = vector.shape_cast %206 : vector<10xf32> to vector<10x1xf32>
    %208 = arith.addf %207, %189 : vector<10x1xf32>
    %c0_283 = arith.constant 0 : index
    %c0_284 = arith.constant 0 : index
    %c1_285 = arith.constant 1 : index
    %209 = vector.load %arg8[%c0_283, %c0_284, %c1_285] : memref<1x10x2xf32, #tpu.memory_space<vmem>>, vector<1x10x1xf32>
    %210 = vector.shape_cast %209 : vector<1x10x1xf32> to vector<10x1xf32>
    %211 = vector.shape_cast %208 : vector<10x1xf32> to vector<1x10x1xf32>
    tpu.vector_store %arg8[%c0_283, %c0_284, %c1_285], %211 {strides = array<i32>} : memref<1x10x2xf32, #tpu.memory_space<vmem>>, vector<1x10x1xf32>,
    return
  }
  func.func @transform_0(%arg0: i32) -> (i32, i32) {
    %c0_i32 = arith.constant 0 : i32
    %c0_i32_0 = arith.constant 0 : i32
    return %arg0, %c0_i32 : i32, i32
  }
  func.func @transform_1(%arg0: i32) -> (i32, i32) {
    %c0_i32 = arith.constant 0 : i32
    %c0_i32_0 = arith.constant 0 : i32
    %c0_i32_1 = arith.constant 0 : i32
    return %c0_i32, %c0_i32_0 : i32, i32
  }
  func.func @transform_2(%arg0: i32) -> (i32, i32) {
    %c0_i32 = arith.constant 0 : i32
    %c0_i32_0 = arith.constant 0 : i32
    %c0_i32_1 = arith.constant 0 : i32
    return %c0_i32, %c0_i32_0 : i32, i32
  }
  func.func @transform_3(%arg0: i32) -> (i32, i32) {
    %c0_i32 = arith.constant 0 : i32
    %c0_i32_0 = arith.constant 0 : i32
    %c0_i32_1 = arith.constant 0 : i32
    return %c0_i32, %c0_i32_0 : i32, i32
  }
  func.func @transform_4(%arg0: i32) -> (i32, i32) {
    %c0_i32 = arith.constant 0 : i32
    %c0_i32_0 = arith.constant 0 : i32
    %c0_i32_1 = arith.constant 0 : i32
    return %c0_i32, %c0_i32_0 : i32, i32
  }
  func.func @transform_5(%arg0: i32) -> (i32, i32, i32) {
    %c0_i32 = arith.constant 0 : i32
    %c0_i32_0 = arith.constant 0 : i32
    %c0_i32_1 = arith.constant 0 : i32
    %c0_i32_2 = arith.constant 0 : i32
    return %c0_i32, %c0_i32_0, %c0_i32_1 : i32, i32, i32
  }
  func.func @transform_6(%arg0: i32) -> (i32, i32) {
    %c0_i32 = arith.constant 0 : i32
    %c0_i32_0 = arith.constant 0 : i32
    %c0_i32_1 = arith.constant 0 : i32
    return %c0_i32, %c0_i32_0 : i32, i32
  }
  func.func @transform_7(%arg0: i32) -> (i32, i32, i32) {
    %c0_i32 = arith.constant 0 : i32
    %c0_i32_0 = arith.constant 0 : i32
    %c0_i32_1 = arith.constant 0 : i32
    return %arg0, %c0_i32, %c0_i32_0 : i32, i32, i32
  }
}

</mosaic_0001>

<bundles_post_ra>
// kernel: squeeze.1
= control target key start
LH: loop header
LB: loop body
LE: loop exit
PB: predicated region body
PF: predicated region fallthrough
CT: control target
= control target key end

     0   :  { %vm141_vm0 = vcmask 31744   ;;  %vm281_vm1 = vcmask 1047556   ;;  %s988_s2 = smov 124   ;;  %s989_s30 = smov 120   ;;  %s1590_s0 = inlined_call_operand.vmem [shape: f32[2,1,28,28], index: 0, kind: input, shape index: {}]   ;;  %s1591_s1 = inlined_call_operand.vmem [shape: f32[2,7,4,7,4], index: 1, kind: output, shape index: {}]  }
   0x1   :  { %v868_v0 = vld [vmem:[%s1590_s0 + $0x6] sm:$0x3]  ;;  %v869_v1 = vld [vmem:[%s1590_s0 + $0x4] sm:$0x3]  ;;  %v870_v2 = vld [vmem:[%s1590_s0 + $0x2] sm:$0x3] }
   0x2   :  { %128 = vst [vmem:[#allocation0 + $0x18] sm:$0x3] %v868_v0  ;;  %133 = vst [vmem:[#allocation0 + $0x10] sm:$0x3] %v869_v1  ;;  %v138_v3 = vld [vmem:[%s1590_s0] sm:$0x3] }
   0x3   :  { %137 = vst [vmem:[#allocation0 + $0x8] sm:$0x3] %v870_v2  ;;  %139 = vst [vmem:[#allocation0] sm:$0x3] %v138_v3  ;;  %v860_v4 = vld [vmem:[%s1590_s0 + $0x16] sm:$0x3] }
   0x4   :  { %v861_v5 = vld [vmem:[%s1590_s0 + $0x14] sm:$0x3]  ;;  %v862_v6 = vld [vmem:[%s1590_s0 + $0x12] sm:$0x3]  ;;  %88 = vst [vmem:[#allocation0 + $0x58] sm:$0x3] %v860_v4 }
   0x5   :  { %93 = vst [vmem:[#allocation0 + $0x50] sm:$0x3] %v861_v5  ;;  %98 = vst [vmem:[#allocation0 + $0x48] sm:$0x3] %v862_v6  ;;  %v863_v7 = vld [vmem:[%s1590_s0 + $0x10] sm:$0x3] }
   0x6   :  { %v864_v8 = vld [vmem:[%s1590_s0 + $0xe] sm:$0x3]  ;;  %v865_v9 = vld [vmem:[%s1590_s0 + $0xc] sm:$0x3]  ;;  %103 = vst [vmem:[#allocation0 + $0x40] sm:$0x3] %v863_v7 }
   0x7   :  { %108 = vst [vmem:[#allocation0 + $0x38] sm:$0x3] %v864_v8  ;;  %113 = vst [vmem:[#allocation0 + $0x30] sm:$0x3] %v865_v9  ;;  %v866_v10 = vld [vmem:[%s1590_s0 + $0xa] sm:$0x3] }
   0x8   :  { %v867_v11 = vld [vmem:[%s1590_s0 + $0x8] sm:$0x3]  ;;  %v856_v12 = vld [vmem:[%s1590_s0 + $0x1e] sm:$0x3]  ;;  %118 = vst [vmem:[#allocation0 + $0x28] sm:$0x3] %v866_v10 }
   0x9   :  { %123 = vst [vmem:[#allocation0 + $0x20] sm:$0x3] %v867_v11  ;;  %68 = vst [vmem:[#allocation0 + $0x78] sm:$0x3] %v856_v12  ;;  %v857_v13 = vld [vmem:[%s1590_s0 + $0x1c] sm:$0x3] }
   0xa   :  { %v858_v14 = vld [vmem:[%s1590_s0 + $0x1a] sm:$0x3]  ;;  %v859_v15 = vld [vmem:[%s1590_s0 + $0x18] sm:$0x3]  ;;  %73 = vst [vmem:[#allocation0 + $0x70] sm:$0x3] %v857_v13 }
   0xb   :  { %78 = vst [vmem:[#allocation0 + $0x68] sm:$0x3] %v858_v14  ;;  %83 = vst [vmem:[#allocation0 + $0x60] sm:$0x3] %v859_v15  ;;  %v852_v16 = vld [vmem:[%s1590_s0 + $0x26] sm:$0x3] }
   0xc   :  { %v853_v17 = vld [vmem:[%s1590_s0 + $0x24] sm:$0x3]  ;;  %v854_v18 = vld [vmem:[%s1590_s0 + $0x22] sm:$0x3]  ;;  %48 = vst [vmem:[#allocation0 + $0x98] sm:$0x3] %v852_v16 }
   0xd   :  { %53 = vst [vmem:[#allocation0 + $0x90] sm:$0x3] %v853_v17  ;;  %58 = vst [vmem:[#allocation0 + $0x88] sm:$0x3] %v854_v18  ;;  %v855_v19 = vld [vmem:[%s1590_s0 + $0x20] sm:$0x3] }
   0xe   :  { %v848_v20 = vld [vmem:[%s1590_s0 + $0x2e] sm:$0x3]  ;;  %v849_v21 = vld [vmem:[%s1590_s0 + $0x2c] sm:$0x3]  ;;  %v144_v22 = vld [vmem:[#allocation0 + $0x8] sm:$0x3]  }
   0xf   :  { %v149_v23 = vld [vmem:[#allocation0 + $0x10] sm:$0x3]   ;;  %v154_v24 = vld [vmem:[#allocation0 + $0x18] sm:$0x3]   ;;  %63 = vst [vmem:[#allocation0 + $0x80] sm:$0x3] %v855_v19 }
  0x10   :  { %28 = vst [vmem:[#allocation0 + $0xb8] sm:$0x3] %v848_v20  ;;  %33 = vst [vmem:[#allocation0 + $0xb0] sm:$0x3] %v849_v21  ;;  %v140_v25 = vld [vmem:[#allocation0] sm:$0x3]  }
  0x11   :  { %871 = vst.msk [vmem:[%s1591_s1 + $0x10] ss:$8 sm:$0x3] %vm141_vm0, %v144_v22   ;;  %872 = vst.msk [vmem:[%s1591_s1 + $0x20] ss:$8 sm:$0x3] %vm141_vm0, %v149_v23  }
  0x12   :  { %v278_v26 = vld.sshfl [vmem:[#allocation0] sm:$0xff pattern:$0x99999810]   ;;  %873 = vst.msk [vmem:[%s1591_s1 + $0x30] ss:$8 sm:$0x3] %vm141_vm0, %v154_v24  }
  0x13   :  { %142 = vst.msk [vmem:[%s1591_s1] ss:$8 sm:$0x3] %vm141_vm0, %v140_v25   ;;  %v280_v27 = vld.sshfl [vmem:[#allocation0 + $0x10] sm:$0xff pattern:$0x98100000]  }
  0x14   :  { %v184_v28 = vld [vmem:[#allocation0 + $0x48] sm:$0x3]   ;;  %v1087_v29 = vsel %vm281_vm1, %v280_v27, %v278_v26  ;;  %v179_v30 = vld [vmem:[#allocation0 + $0x40] sm:$0x3]   ;;  %v189_v31 = vld [vmem:[#allocation0 + $0x50] sm:$0x3]  }
  0x15   :  { %879 = vst.msk [vmem:[%s1591_s1 + $0x90] ss:$8 sm:$0x3] %vm141_vm0, %v184_v28   ;;  %v194_v32 = vld [vmem:[#allocation0 + $0x58] sm:$0x3]   ;;  %283 = vrot.lane.b32.xlu0 %v1087_v29, %s988_s2  ;;  %s990_s3 = smov 116  }
  0x16   :  { %878 = vst.msk [vmem:[%s1591_s1 + $0x80] ss:$8 sm:$0x3] %vm141_vm0, %v179_v30   ;;  %880 = vst.msk [vmem:[%s1591_s1 + $0xa0] ss:$8 sm:$0x3] %vm141_vm0, %v189_v31  }
  0x17   :  { %v304_v33 = vld.sshfl [vmem:[#allocation0 + $0x40] sm:$0xff pattern:$0x99999810]   ;;  %v306_v34 = vld.sshfl [vmem:[#allocation0 + $0x50] sm:$0xff pattern:$0x98100000]  }
  0x18   :  { %881 = vst.msk [vmem:[%s1591_s1 + $0xb0] ss:$8 sm:$0x3] %vm141_vm0, %v194_v32   ;;  %v1108_v35 = vsel %vm281_vm1, %v306_v34, %v304_v33  ;;  %v291_v36 = vld.sshfl [vmem:[#allocation0 + $0x20] sm:$0xff pattern:$0x99999810]  }
  0x19   :  { %v293_v37 = vld.sshfl [vmem:[#allocation0 + $0x30] sm:$0xff pattern:$0x98100000]   ;;  %309 = vrot.lane.b32.xlu1 %v1108_v35, %s988_s2  ;;  %v317_v40 = vld.sshfl [vmem:[#allocation0 + $0x60] sm:$0xff pattern:$0x99999810]  }
  0x1a   :  { %v1113_v38 = vsel %vm281_vm1, %v293_v37, %v291_v36  ;;  %v209_v39 = vld [vmem:[#allocation0 + $0x70] sm:$0x3]   ;;  %v214_v42 = vld [vmem:[#allocation0 + $0x78] sm:$0x3]   ;;  %v850_v47 = vld [vmem:[%s1590_s0 + $0x2a] sm:$0x3] }
  0x1b   :  { %884 = vst.msk [vmem:[%s1591_s1 + $0xe0] ss:$8 sm:$0x3] %vm141_vm0, %v209_v39   ;;  %v319_v41 = vld.sshfl [vmem:[#allocation0 + $0x70] sm:$0xff pattern:$0x98100000]   ;;  %296 = vrot.lane.b32.xlu0 %v1113_v38, %s988_s2 }
  0x1c   :  { %v1122_v43 = vsel %vm281_vm1, %v319_v41, %v317_v40  ;;  %885 = vst.msk [vmem:[%s1591_s1 + $0xf0] ss:$8 sm:$0x3] %vm141_vm0, %v214_v42   ;;  %v330_v44 = vld.sshfl [vmem:[#allocation0 + $0x80] sm:$0xff pattern:$0x99999810]  }
  0x1d   :  { %v332_v45 = vld.sshfl [vmem:[#allocation0 + $0x90] sm:$0xff pattern:$0x98100000]   ;;  %v851_v48 = vld [vmem:[%s1590_s0 + $0x28] sm:$0x3]  ;;  %322 = vrot.lane.b32.xlu1 %v1122_v43, %s988_s2  ;;  %s991_s4 = smov 112  }
  0x1e   :  { %v1129_v46 = vsel %vm281_vm1, %v332_v45, %v330_v44  ;;  %v844_v49 = vld [vmem:[%s1590_s0 + $0x36] sm:$0x3]  ;;  %38 = vst [vmem:[#allocation0 + $0xa8] sm:$0x3] %v850_v47  ;;  %43 = vst [vmem:[#allocation0 + $0xa0] sm:$0x3] %v851_v48 }
  0x1f   :  { %8 = vst [vmem:[#allocation0 + $0xd8] sm:$0x3] %v844_v49  ;;  %v845_v50 = vld [vmem:[%s1590_s0 + $0x34] sm:$0x3]  ;;  %v846_v51 = vld [vmem:[%s1590_s0 + $0x32] sm:$0x3]  ;;  %335 = vrot.lane.b32.xlu0 %v1129_v46, %s988_s2 }
  0x20   :  { %13 = vst [vmem:[#allocation0 + $0xd0] sm:$0x3] %v845_v50  ;;  %v847_v52 = vld [vmem:[%s1590_s0 + $0x30] sm:$0x3]  ;;  %v219_v53 = vld [vmem:[#allocation0 + $0x80] sm:$0x3]  }
  0x21   :  { %18 = vst [vmem:[#allocation0 + $0xc8] sm:$0x3] %v846_v51  ;;  %23 = vst [vmem:[#allocation0 + $0xc0] sm:$0x3] %v847_v52  ;;  %v224_v54 = vld [vmem:[#allocation0 + $0x88] sm:$0x3]  }
  0x22   :  { %886 = vst.msk [vmem:[%s1591_s1 + $0x100] ss:$8 sm:$0x3] %vm141_vm0, %v219_v53   ;;  %v159_v55 = vld [vmem:[#allocation0 + $0x20] sm:$0x3]   ;;  %s992_s5 = smov 108  }
  0x23   :  { %v164_v56 = vld [vmem:[#allocation0 + $0x28] sm:$0x3]   ;;  %v345_v57 = vld.sshfl [vmem:[#allocation0 + $0xb0] sm:$0xff pattern:$0x98100000]   ;;  %s993_s6 = smov 104  }
  0x24   :  { %887 = vst.msk [vmem:[%s1591_s1 + $0x110] ss:$8 sm:$0x3] %vm141_vm0, %v224_v54   ;;  %874 = vst.msk [vmem:[%s1591_s1 + $0x40] ss:$8 sm:$0x3] %vm141_vm0, %v159_v55  }
  0x25   :  { %875 = vst.msk [vmem:[%s1591_s1 + $0x50] ss:$8 sm:$0x3] %vm141_vm0, %v164_v56   ;;  %v169_v58 = vld [vmem:[#allocation0 + $0x30] sm:$0x3]  }
  0x26   :  { %v174_v59 = vld [vmem:[#allocation0 + $0x38] sm:$0x3]   ;;  %v199_v60 = vld [vmem:[#allocation0 + $0x60] sm:$0x3]   ;;  %v204_v61 = vld [vmem:[#allocation0 + $0x68] sm:$0x3]  }
  0x27   :  { %876 = vst.msk [vmem:[%s1591_s1 + $0x60] ss:$8 sm:$0x3] %vm141_vm0, %v169_v58   ;;  %877 = vst.msk [vmem:[%s1591_s1 + $0x70] ss:$8 sm:$0x3] %vm141_vm0, %v174_v59  }
  0x28   :  { %882 = vst.msk [vmem:[%s1591_s1 + $0xc0] ss:$8 sm:$0x3] %vm141_vm0, %v199_v60   ;;  %v249_v62 = vld [vmem:[#allocation0 + $0xb0] sm:$0x3]  }
  0x29   :  { %v254_v63 = vld [vmem:[#allocation0 + $0xb8] sm:$0x3]   ;;  %883 = vst.msk [vmem:[%s1591_s1 + $0xd0] ss:$8 sm:$0x3] %vm141_vm0, %v204_v61  }
  0x2a   :  { %892 = vst.msk [vmem:[%s1591_s1 + $0x160] ss:$8 sm:$0x3] %vm141_vm0, %v249_v62   ;;  %893 = vst.msk [vmem:[%s1591_s1 + $0x170] ss:$8 sm:$0x3] %vm141_vm0, %v254_v63  }
  0x2b   :  { %v229_v0 = vld [vmem:[#allocation0 + $0x90] sm:$0x3]   ;;  %v234_v1 = vld [vmem:[#allocation0 + $0x98] sm:$0x3]   ;;  %v239_v3 = vld [vmem:[#allocation0 + $0xa0] sm:$0x3]  }
  0x2c   :  { %888 = vst.msk [vmem:[%s1591_s1 + $0x120] ss:$8 sm:$0x3] %vm141_vm0, %v229_v0   ;;  %889 = vst.msk [vmem:[%s1591_s1 + $0x130] ss:$8 sm:$0x3] %vm141_vm0, %v234_v1  }
  0x2d   :  { %v343_v2 = vld.sshfl [vmem:[#allocation0 + $0xa0] sm:$0xff pattern:$0x99999810]   ;;  %v358_v5 = vld.sshfl [vmem:[#allocation0 + $0xd0] sm:$0xff pattern:$0x98100000]  }
  0x2e   :  { %v347_v4 = vsel %vm281_vm1, %v345_v57, %v343_v2  ;;  %890 = vst.msk [vmem:[%s1591_s1 + $0x140] ss:$8 sm:$0x3] %vm141_vm0, %v239_v3   ;;  %v244_v6 = vld [vmem:[#allocation0 + $0xa8] sm:$0x3]  }
  0x2f   :  { %348 = vrot.lane.b32.xlu1 %v347_v4, %s988_s2  ;;  %v356_v7 = vld.sshfl [vmem:[#allocation0 + $0xc0] sm:$0xff pattern:$0x99999810]   ;;  %891 = vst.msk [vmem:[%s1591_s1 + $0x150] ss:$8 sm:$0x3] %vm141_vm0, %v244_v6  }
  0x30   :  { %v259_v8 = vld [vmem:[#allocation0 + $0xc0] sm:$0x3]   ;;  %v360_v9 = vsel %vm281_vm1, %v358_v5, %v356_v7  ;;  %v264_v10 = vld [vmem:[#allocation0 + $0xc8] sm:$0x3]   ;;  %v269_v11 = vld [vmem:[#allocation0 + $0xd0] sm:$0x3]  }
  0x31   :  { %894 = vst.msk [vmem:[%s1591_s1 + $0x180] ss:$8 sm:$0x3] %vm141_vm0, %v259_v8   ;;  %v274_v12 = vld [vmem:[#allocation0 + $0xd8] sm:$0x3]   ;;  %361 = vrot.lane.b32.xlu0 %v360_v9, %s988_s2 }
  0x32   :  { %895 = vst.msk [vmem:[%s1591_s1 + $0x190] ss:$8 sm:$0x3] %vm141_vm0, %v264_v10   ;;  %896 = vst.msk [vmem:[%s1591_s1 + $0x1a0] ss:$8 sm:$0x3] %vm141_vm0, %v269_v11  }
  0x33   :  { %897 = vst.msk [vmem:[%s1591_s1 + $0x1b0] ss:$8 sm:$0x3] %vm141_vm0, %v274_v12   ;;  %373 = vrot.lane.b32.xlu1 %v1087_v29, %s989_s30 }
  0x35   :  { %386 = vrot.lane.b32.xlu0 %v1113_v38, %s989_s30 }
  0x37   :  { %399 = vrot.lane.b32.xlu1 %v1108_v35, %s989_s30 }
  0x39   :  { %412 = vrot.lane.b32.xlu0 %v1122_v43, %s989_s30 }
  0x3b   :  { %425 = vrot.lane.b32.xlu1 %v1129_v46, %s989_s30 }
  0x3d   :  { %438 = vrot.lane.b32.xlu0 %v347_v4, %s989_s30 }
  0x3f   :  { %451 = vrot.lane.b32.xlu1 %v360_v9, %s989_s30 }
  0x41   :  { %463 = vrot.lane.b32.xlu0 %v1087_v29, %s990_s3 }
  0x43   :  { %476 = vrot.lane.b32.xlu1 %v1113_v38, %s990_s3 }
  0x45   :  { %489 = vrot.lane.b32.xlu0 %v1108_v35, %s990_s3 }
  0x47   :  { %502 = vrot.lane.b32.xlu1 %v1122_v43, %s990_s3 }
  0x49   :  { %515 = vrot.lane.b32.xlu0 %v1129_v46, %s990_s3 }
  0x4b   :  { %528 = vrot.lane.b32.xlu1 %v347_v4, %s990_s3 }
  0x4d   :  { %541 = vrot.lane.b32.xlu0 %v360_v9, %s990_s3 }
  0x4f   :  { %553 = vrot.lane.b32.xlu1 %v1087_v29, %s991_s4 }
  0x51   :  { %566 = vrot.lane.b32.xlu0 %v1113_v38, %s991_s4 }
  0x53   :  { %579 = vrot.lane.b32.xlu1 %v1108_v35, %s991_s4 }
  0x55   :  { %592 = vrot.lane.b32.xlu0 %v1122_v43, %s991_s4 }
  0x57   :  { %605 = vrot.lane.b32.xlu1 %v1129_v46, %s991_s4 }
  0x59   :  { %618 = vrot.lane.b32.xlu0 %v347_v4, %s991_s4 }
  0x5b   :  { %631 = vrot.lane.b32.xlu1 %v360_v9, %s991_s4 }
  0x5d   :  { %643 = vrot.lane.b32.xlu0 %v1087_v29, %s992_s5 }
  0x5f   :  { %656 = vrot.lane.b32.xlu1 %v1113_v38, %s992_s5 }
  0x61   :  { %669 = vrot.lane.b32.xlu0 %v1108_v35, %s992_s5 }
  0x63   :  { %682 = vrot.lane.b32.xlu1 %v1122_v43, %s992_s5 }
  0x65   :  { %695 = vrot.lane.b32.xlu0 %v1129_v46, %s992_s5 }
  0x67   :  { %708 = vrot.lane.b32.xlu1 %v347_v4, %s992_s5 }
  0x69   :  { %721 = vrot.lane.b32.xlu0 %v360_v9, %s992_s5 }
  0x6b   :  { %733 = vrot.lane.b32.xlu1 %v1087_v29, %s993_s6 }
  0x6d   :  { %746 = vrot.lane.b32.xlu0 %v1113_v38, %s993_s6 }
  0x6f   :  { %759 = vrot.lane.b32.xlu1 %v1108_v35, %s993_s6 }
  0x71   :  { %772 = vrot.lane.b32.xlu0 %v1122_v43, %s993_s6 }
  0x73   :  { %785 = vrot.lane.b32.xlu1 %v1129_v46, %s993_s6 }
  0x75   :  { %798 = vrot.lane.b32.xlu0 %v347_v4, %s993_s6 }
  0x77   :  { %811 = vrot.lane.b32.xlu1 %v360_v9, %s993_s6 }
  0x87   :  { %v284_v13 = vpop.permute.xlu0 %283  }
  0x88   :  { %898 = vst.msk [vmem:[%s1591_s1 + $0x1] ss:$8 sm:$0xf] %vm141_vm0, %v284_v13   ;;  %899 = vst.msk [vmem:[%s1591_s1 + $0x1] ss:$8 sm:$0xf0] %vm141_vm0, %v284_v13  }
  0x8b   :  { %v310_v14 = vpop.permute.xlu1 %309  }
  0x8c   :  { %902 = vst.msk [vmem:[%s1591_s1 + $0x81] ss:$8 sm:$0xf] %vm141_vm0, %v310_v14   ;;  %903 = vst.msk [vmem:[%s1591_s1 + $0x81] ss:$8 sm:$0xf0] %vm141_vm0, %v310_v14  }
  0x8d   :  { %v297_v15 = vpop.permute.xlu0 %296  }
  0x8e   :  { %900 = vst.msk [vmem:[%s1591_s1 + $0x41] ss:$8 sm:$0xf] %vm141_vm0, %v297_v15   ;;  %901 = vst.msk [vmem:[%s1591_s1 + $0x41] ss:$8 sm:$0xf0] %vm141_vm0, %v297_v15  }
  0x8f   :  { %v323_v16 = vpop.permute.xlu1 %322  }
  0x90   :  { %904 = vst.msk [vmem:[%s1591_s1 + $0xc1] ss:$8 sm:$0xf] %vm141_vm0, %v323_v16   ;;  %905 = vst.msk [vmem:[%s1591_s1 + $0xc1] ss:$8 sm:$0xf0] %vm141_vm0, %v323_v16  }
  0x91   :  { %v336_v17 = vpop.permute.xlu0 %335  }
  0x92   :  { %906 = vst.msk [vmem:[%s1591_s1 + $0x101] ss:$8 sm:$0xf] %vm141_vm0, %v336_v17   ;;  %907 = vst.msk [vmem:[%s1591_s1 + $0x101] ss:$8 sm:$0xf0] %vm141_vm0, %v336_v17  }
  0xa1   :  { %v349_v18 = vpop.permute.xlu1 %348  }
  0xa2   :  { %908 = vst.msk [vmem:[%s1591_s1 + $0x141] ss:$8 sm:$0xf] %vm141_vm0, %v349_v18   ;;  %909 = vst.msk [vmem:[%s1591_s1 + $0x141] ss:$8 sm:$0xf0] %vm141_vm0, %v349_v18  }
  0xa3   :  { %v362_v19 = vpop.permute.xlu0 %361  }
  0xa4   :  { %910 = vst.msk [vmem:[%s1591_s1 + $0x181] ss:$8 sm:$0xf] %vm141_vm0, %v362_v19   ;;  %911 = vst.msk [vmem:[%s1591_s1 + $0x181] ss:$8 sm:$0xf0] %vm141_vm0, %v362_v19  }
  0xa5   :  { %v374_v20 = vpop.permute.xlu1 %373  }
  0xa6   :  { %912 = vst.msk [vmem:[%s1591_s1 + $0x2] ss:$8 sm:$0xf] %vm141_vm0, %v374_v20   ;;  %913 = vst.msk [vmem:[%s1591_s1 + $0x2] ss:$8 sm:$0xf0] %vm141_vm0, %v374_v20  }
  0xa7   :  { %v387_v21 = vpop.permute.xlu0 %386  }
  0xa8   :  { %914 = vst.msk [vmem:[%s1591_s1 + $0x42] ss:$8 sm:$0xf] %vm141_vm0, %v387_v21   ;;  %915 = vst.msk [vmem:[%s1591_s1 + $0x42] ss:$8 sm:$0xf0] %vm141_vm0, %v387_v21  }
  0xa9   :  { %v400_v22 = vpop.permute.xlu1 %399  }
  0xaa   :  { %916 = vst.msk [vmem:[%s1591_s1 + $0x82] ss:$8 sm:$0xf] %vm141_vm0, %v400_v22   ;;  %917 = vst.msk [vmem:[%s1591_s1 + $0x82] ss:$8 sm:$0xf0] %vm141_vm0, %v400_v22  }
  0xab   :  { %v413_v23 = vpop.permute.xlu0 %412  }
  0xac   :  { %918 = vst.msk [vmem:[%s1591_s1 + $0xc2] ss:$8 sm:$0xf] %vm141_vm0, %v413_v23   ;;  %919 = vst.msk [vmem:[%s1591_s1 + $0xc2] ss:$8 sm:$0xf0] %vm141_vm0, %v413_v23  }
  0xad   :  { %v426_v24 = vpop.permute.xlu1 %425  }
  0xae   :  { %920 = vst.msk [vmem:[%s1591_s1 + $0x102] ss:$8 sm:$0xf] %vm141_vm0, %v426_v24   ;;  %921 = vst.msk [vmem:[%s1591_s1 + $0x102] ss:$8 sm:$0xf0] %vm141_vm0, %v426_v24  }
  0xaf   :  { %v439_v25 = vpop.permute.xlu0 %438  }
  0xb0   :  { %922 = vst.msk [vmem:[%s1591_s1 + $0x142] ss:$8 sm:$0xf] %vm141_vm0, %v439_v25   ;;  %923 = vst.msk [vmem:[%s1591_s1 + $0x142] ss:$8 sm:$0xf0] %vm141_vm0, %v439_v25  }
  0xb1   :  { %v452_v26 = vpop.permute.xlu1 %451  }
  0xb2   :  { %924 = vst.msk [vmem:[%s1591_s1 + $0x182] ss:$8 sm:$0xf] %vm141_vm0, %v452_v26   ;;  %925 = vst.msk [vmem:[%s1591_s1 + $0x182] ss:$8 sm:$0xf0] %vm141_vm0, %v452_v26  }
  0xb3   :  { %v464_v27 = vpop.permute.xlu0 %463  }
  0xb4   :  { %926 = vst.msk [vmem:[%s1591_s1 + $0x3] ss:$8 sm:$0xf] %vm141_vm0, %v464_v27   ;;  %927 = vst.msk [vmem:[%s1591_s1 + $0x3] ss:$8 sm:$0xf0] %vm141_vm0, %v464_v27  }
  0xb5   :  { %v477_v28 = vpop.permute.xlu1 %476  }
  0xb6   :  { %928 = vst.msk [vmem:[%s1591_s1 + $0x43] ss:$8 sm:$0xf] %vm141_vm0, %v477_v28   ;;  %929 = vst.msk [vmem:[%s1591_s1 + $0x43] ss:$8 sm:$0xf0] %vm141_vm0, %v477_v28  }
  0xb7   :  { %v490_v29 = vpop.permute.xlu0 %489  }
  0xb8   :  { %930 = vst.msk [vmem:[%s1591_s1 + $0x83] ss:$8 sm:$0xf] %vm141_vm0, %v490_v29   ;;  %931 = vst.msk [vmem:[%s1591_s1 + $0x83] ss:$8 sm:$0xf0] %vm141_vm0, %v490_v29  }
  0xb9   :  { %v503_v30 = vpop.permute.xlu1 %502  }
  0xba   :  { %932 = vst.msk [vmem:[%s1591_s1 + $0xc3] ss:$8 sm:$0xf] %vm141_vm0, %v503_v30   ;;  %933 = vst.msk [vmem:[%s1591_s1 + $0xc3] ss:$8 sm:$0xf0] %vm141_vm0, %v503_v30  }
  0xbb   :  { %v516_v31 = vpop.permute.xlu0 %515  }
  0xbc   :  { %934 = vst.msk [vmem:[%s1591_s1 + $0x103] ss:$8 sm:$0xf] %vm141_vm0, %v516_v31   ;;  %935 = vst.msk [vmem:[%s1591_s1 + $0x103] ss:$8 sm:$0xf0] %vm141_vm0, %v516_v31  }
  0xbd   :  { %v529_v32 = vpop.permute.xlu1 %528  }
  0xbe   :  { %936 = vst.msk [vmem:[%s1591_s1 + $0x143] ss:$8 sm:$0xf] %vm141_vm0, %v529_v32   ;;  %937 = vst.msk [vmem:[%s1591_s1 + $0x143] ss:$8 sm:$0xf0] %vm141_vm0, %v529_v32  }
  0xbf   :  { %v542_v33 = vpop.permute.xlu0 %541  }
  0xc0   :  { %938 = vst.msk [vmem:[%s1591_s1 + $0x183] ss:$8 sm:$0xf] %vm141_vm0, %v542_v33   ;;  %939 = vst.msk [vmem:[%s1591_s1 + $0x183] ss:$8 sm:$0xf0] %vm141_vm0, %v542_v33  }
  0xc1   :  { %v554_v34 = vpop.permute.xlu1 %553  }
  0xc2   :  { %940 = vst.msk [vmem:[%s1591_s1 + $0x4] ss:$8 sm:$0xf] %vm141_vm0, %v554_v34   ;;  %941 = vst.msk [vmem:[%s1591_s1 + $0x4] ss:$8 sm:$0xf0] %vm141_vm0, %v554_v34  }
  0xc3   :  { %v567_v35 = vpop.permute.xlu0 %566  }
  0xc4   :  { %942 = vst.msk [vmem:[%s1591_s1 + $0x44] ss:$8 sm:$0xf] %vm141_vm0, %v567_v35   ;;  %943 = vst.msk [vmem:[%s1591_s1 + $0x44] ss:$8 sm:$0xf0] %vm141_vm0, %v567_v35  }
  0xc5   :  { %v580_v36 = vpop.permute.xlu1 %579  }
  0xc6   :  { %944 = vst.msk [vmem:[%s1591_s1 + $0x84] ss:$8 sm:$0xf] %vm141_vm0, %v580_v36   ;;  %945 = vst.msk [vmem:[%s1591_s1 + $0x84] ss:$8 sm:$0xf0] %vm141_vm0, %v580_v36  }
  0xc7   :  { %v593_v37 = vpop.permute.xlu0 %592  }
  0xc8   :  { %946 = vst.msk [vmem:[%s1591_s1 + $0xc4] ss:$8 sm:$0xf] %vm141_vm0, %v593_v37   ;;  %947 = vst.msk [vmem:[%s1591_s1 + $0xc4] ss:$8 sm:$0xf0] %vm141_vm0, %v593_v37  }
  0xc9   :  { %v606_v38 = vpop.permute.xlu1 %605  }
  0xca   :  { %948 = vst.msk [vmem:[%s1591_s1 + $0x104] ss:$8 sm:$0xf] %vm141_vm0, %v606_v38   ;;  %949 = vst.msk [vmem:[%s1591_s1 + $0x104] ss:$8 sm:$0xf0] %vm141_vm0, %v606_v38  }
  0xcb   :  { %v619_v39 = vpop.permute.xlu0 %618  }
  0xcc   :  { %950 = vst.msk [vmem:[%s1591_s1 + $0x144] ss:$8 sm:$0xf] %vm141_vm0, %v619_v39   ;;  %951 = vst.msk [vmem:[%s1591_s1 + $0x144] ss:$8 sm:$0xf0] %vm141_vm0, %v619_v39  }
  0xcd   :  { %v632_v40 = vpop.permute.xlu1 %631  }
  0xce   :  { %952 = vst.msk [vmem:[%s1591_s1 + $0x184] ss:$8 sm:$0xf] %vm141_vm0, %v632_v40   ;;  %953 = vst.msk [vmem:[%s1591_s1 + $0x184] ss:$8 sm:$0xf0] %vm141_vm0, %v632_v40  }
  0xcf   :  { %v644_v41 = vpop.permute.xlu0 %643  }
  0xd0   :  { %954 = vst.msk [vmem:[%s1591_s1 + $0x5] ss:$8 sm:$0xf] %vm141_vm0, %v644_v41   ;;  %955 = vst.msk [vmem:[%s1591_s1 + $0x5] ss:$8 sm:$0xf0] %vm141_vm0, %v644_v41  }
  0xd1   :  { %v657_v42 = vpop.permute.xlu1 %656  }
  0xd2   :  { %956 = vst.msk [vmem:[%s1591_s1 + $0x45] ss:$8 sm:$0xf] %vm141_vm0, %v657_v42   ;;  %957 = vst.msk [vmem:[%s1591_s1 + $0x45] ss:$8 sm:$0xf0] %vm141_vm0, %v657_v42  }
  0xd3   :  { %v670_v43 = vpop.permute.xlu0 %669  }
  0xd4   :  { %958 = vst.msk [vmem:[%s1591_s1 + $0x85] ss:$8 sm:$0xf] %vm141_vm0, %v670_v43   ;;  %959 = vst.msk [vmem:[%s1591_s1 + $0x85] ss:$8 sm:$0xf0] %vm141_vm0, %v670_v43  }
  0xd5   :  { %v683_v44 = vpop.permute.xlu1 %682  }
  0xd6   :  { %960 = vst.msk [vmem:[%s1591_s1 + $0xc5] ss:$8 sm:$0xf] %vm141_vm0, %v683_v44   ;;  %961 = vst.msk [vmem:[%s1591_s1 + $0xc5] ss:$8 sm:$0xf0] %vm141_vm0, %v683_v44  }
  0xd7   :  { %v696_v45 = vpop.permute.xlu0 %695  }
  0xd8   :  { %962 = vst.msk [vmem:[%s1591_s1 + $0x105] ss:$8 sm:$0xf] %vm141_vm0, %v696_v45   ;;  %963 = vst.msk [vmem:[%s1591_s1 + $0x105] ss:$8 sm:$0xf0] %vm141_vm0, %v696_v45  }
  0xd9   :  { %v709_v46 = vpop.permute.xlu1 %708  }
  0xda   :  { %964 = vst.msk [vmem:[%s1591_s1 + $0x145] ss:$8 sm:$0xf] %vm141_vm0, %v709_v46   ;;  %965 = vst.msk [vmem:[%s1591_s1 + $0x145] ss:$8 sm:$0xf0] %vm141_vm0, %v709_v46  }
  0xdb   :  { %v722_v47 = vpop.permute.xlu0 %721  }
  0xdc   :  { %966 = vst.msk [vmem:[%s1591_s1 + $0x185] ss:$8 sm:$0xf] %vm141_vm0, %v722_v47   ;;  %967 = vst.msk [vmem:[%s1591_s1 + $0x185] ss:$8 sm:$0xf0] %vm141_vm0, %v722_v47  }
  0xdd   :  { %v734_v48 = vpop.permute.xlu1 %733  }
  0xde   :  { %968 = vst.msk [vmem:[%s1591_s1 + $0x6] ss:$8 sm:$0xf] %vm141_vm0, %v734_v48   ;;  %969 = vst.msk [vmem:[%s1591_s1 + $0x6] ss:$8 sm:$0xf0] %vm141_vm0, %v734_v48  }
  0xdf   :  { %v747_v49 = vpop.permute.xlu0 %746  }
  0xe0   :  { %970 = vst.msk [vmem:[%s1591_s1 + $0x46] ss:$8 sm:$0xf] %vm141_vm0, %v747_v49   ;;  %971 = vst.msk [vmem:[%s1591_s1 + $0x46] ss:$8 sm:$0xf0] %vm141_vm0, %v747_v49  }
  0xe1   :  { %v760_v50 = vpop.permute.xlu1 %759  }
  0xe2   :  { %972 = vst.msk [vmem:[%s1591_s1 + $0x86] ss:$8 sm:$0xf] %vm141_vm0, %v760_v50   ;;  %973 = vst.msk [vmem:[%s1591_s1 + $0x86] ss:$8 sm:$0xf0] %vm141_vm0, %v760_v50  }
  0xe3   :  { %v773_v51 = vpop.permute.xlu0 %772  }
  0xe4   :  { %974 = vst.msk [vmem:[%s1591_s1 + $0xc6] ss:$8 sm:$0xf] %vm141_vm0, %v773_v51   ;;  %975 = vst.msk [vmem:[%s1591_s1 + $0xc6] ss:$8 sm:$0xf0] %vm141_vm0, %v773_v51  }
  0xe5   :  { %v786_v52 = vpop.permute.xlu1 %785  }
  0xe6   :  { %976 = vst.msk [vmem:[%s1591_s1 + $0x106] ss:$8 sm:$0xf] %vm141_vm0, %v786_v52   ;;  %977 = vst.msk [vmem:[%s1591_s1 + $0x106] ss:$8 sm:$0xf0] %vm141_vm0, %v786_v52  }
  0xe7   :  { %v799_v53 = vpop.permute.xlu0 %798  }
  0xe8   :  { %978 = vst.msk [vmem:[%s1591_s1 + $0x146] ss:$8 sm:$0xf] %vm141_vm0, %v799_v53   ;;  %979 = vst.msk [vmem:[%s1591_s1 + $0x146] ss:$8 sm:$0xf0] %vm141_vm0, %v799_v53  }
  0xe9   :  { %v812_v54 = vpop.permute.xlu1 %811  }
  0xea   :  { %980 = vst.msk [vmem:[%s1591_s1 + $0x186] ss:$8 sm:$0xf] %vm141_vm0, %v812_v54   ;;  %981 = vst.msk [vmem:[%s1591_s1 + $0x186] ss:$8 sm:$0xf0] %vm141_vm0, %v812_v54  }

// kernel: net_forward.1
= control target key start
LH: loop header
LB: loop body
LE: loop exit
PB: predicated region body
PF: predicated region fallthrough
CT: control target
= control target key end

     0   :  { %s5330_s9 = smov 127   ;;  %s5331_s16 = smov 121   ;;  %vm47_vm0 = vcmask 1039360   ;;  %vm215_vm1 = vcmask 990208   ;;  %vm227_vm2 = vcmask 982016   ;;  %vm615_vm3 = vcmask 1043456   ;;  %s7768_s0 = inlined_call_operand.vmem [shape: f32[16,256], index: 0, kind: input, shape index: {}]   ;;  %s7769_s2 = inlined_call_operand.vmem [shape: f32[40,1], index: 2, kind: input, shape index: {}]   ;;  %s7770_s1 = inlined_call_operand.vmem [shape: f32[40,36], index: 1, kind: input, shape index: {}]   ;;  %s7771_s3 = inlined_call_operand.vmem [shape: f32[20,1440], index: 3, kind: input, shape index: {}]   ;;  %s7772_s4 = inlined_call_operand.vmem [shape: f32[20,1], index: 4, kind: input, shape index: {}]   ;;  %s7773_s5 = inlined_call_operand.vmem [shape: f32[10,20,49], index: 5, kind: input, shape index: {}]   ;;  %s7774_s6 = inlined_call_operand.vmem [shape: f32[10,1], index: 6, kind: input, shape index: {}]   ;;  %s7775_s7 = inlined_call_operand.vmem [shape: f32[1,10,2], index: 7, kind: output, shape index: {}]  }
   0x1   :  { %v56_v0 = vld [vmem:[%s7768_s0] sm:$0xf]  ;;  %v57_v2 = vld [vmem:[%s7768_s0 + $0x8] sm:$0xf]  ;;  %v72_v8 = vld [vmem:[%s7768_s0 + $0x18] sm:$0x3] }
   0x2   :  { %v37_v1 = vld [vmem:[%s7768_s0] sm:$0x3]  ;;  %v60_v3 = vrot.slane %v56_v0, 6  ;;  %v38_v5 = vld [vmem:[%s7768_s0 + $0x8] sm:$0x3]  ;;  %v61_v6 = vrot.slane %v57_v2, 6 }
   0x3   :  { %v41_v4 = vrot.slane %v37_v1, 4  ;;  %v42_v7 = vrot.slane %v38_v5, 4  ;;  %v71_v9 = vld [vmem:[%s7768_s0 + $0x10] sm:$0x3]  ;;  %v76_v10 = vrot.slane %v72_v8, 4  ;;  %s5332_s23 = smov 120  }
   0x4   :  { %62 = vrot.lane.b32.xlu1 %v60_v3, %s5330_s9  ;;  %v75_v11 = vrot.slane %v71_v9, 4  ;;  %v90_v12 = vld [vmem:[%s7768_s0 + $0x18] sm:$0xf]  ;;  %v89_v13 = vld [vmem:[%s7768_s0 + $0x10] sm:$0xf]  ;;  %vm599_vm4 = vcmask 293888  }
   0x5   :  { %43 = vrot.lane.b32.xlu0 %v41_v4, %s5330_s9  ;;  %v94_v14 = vrot.slane %v90_v12, 6  ;;  %v93_v15 = vrot.slane %v89_v13, 6  ;;  %v109_v16 = vld [vmem:[%s7768_s0 + $0x8] sm:$0x30]  ;;  %v108_v17 = vld [vmem:[%s7768_s0] sm:$0x30] }
   0x6   :  { %v113_v18 = vrot.slane %v109_v16, 2  ;;  %v112_v19 = vrot.slane %v108_v17, 2  ;;  %v124_v20 = vld [vmem:[%s7768_s0 + $0x8] sm:$0xf0]  ;;  %v123_v21 = vld [vmem:[%s7768_s0] sm:$0xf0] }
   0x7   :  { %v128_v22 = vrot.slane %v124_v20, 4  ;;  %v127_v23 = vrot.slane %v123_v21, 4  ;;  %v158_v24 = vld [vmem:[%s7768_s0 + $0x18] sm:$0xf0]  ;;  %v157_v25 = vld [vmem:[%s7768_s0 + $0x10] sm:$0xf0] }
   0x8   :  { %64 = vrot.lane.b32.xlu1 %v61_v6, %s5330_s9  ;;  %v162_v26 = vrot.slane %v158_v24, 4  ;;  %v161_v27 = vrot.slane %v157_v25, 4  ;;  %v232_v28 = vld [vmem:[%s7768_s0 + $0x8] sm:$0xc]  ;;  %v231_v29 = vld [vmem:[%s7768_s0] sm:$0xc] }
   0x9   :  { %45 = vrot.lane.b32.xlu0 %v42_v7, %s5330_s9  ;;  %v236_v30 = vrot.slane %v232_v28, 6  ;;  %v235_v31 = vrot.slane %v231_v29, 6  ;;  %v245_v32 = vld [vmem:[%s7768_s0 + $0x8] sm:$0xf]  ;;  %v244_v33 = vld [vmem:[%s7768_s0] sm:$0xf] }
   0xa   :  { %v249_v34 = vrot.slane %v245_v32, 2  ;;  %v248_v35 = vrot.slane %v244_v33, 2  ;;  %v143_v36 = vld [vmem:[%s7768_s0 + $0x18] sm:$0x30]  ;;  %v142_v37 = vld [vmem:[%s7768_s0 + $0x10] sm:$0x30] }
   0xb   :  { %v206_v38 = vld [vmem:[%s7768_s0 + $0x8] sm:$0xf]  ;;  %v147_v39 = vrot.slane %v143_v36, 2  ;;  %v146_v40 = vrot.slane %v142_v37, 2  ;;  %v205_v41 = vld [vmem:[%s7768_s0] sm:$0xf] }
   0xc   :  { %79 = vrot.lane.b32.xlu1 %v76_v10, %s5330_s9  ;;  %v84_v42 = vld [vmem:[%s7768_s0 + $0x10] sm:$0xc]  ;;  %v155_v44 = vld [vmem:[%s7768_s0 + $0x10] sm:$0xc0]  ;;  %v51_v47 = vld [vmem:[%s7768_s0] sm:$0xc] }
   0xd   :  { %77 = vrot.lane.b32.xlu0 %v75_v11, %s5330_s9  ;;  %v86_v43 = vrot.slane %v84_v42, 2  ;;  %v69_v45 = vld [vmem:[%s7768_s0 + $0x10] sm:$0xf]  ;;  %156 = vst [vmem:[#allocation2 + $0x18] sm:$0xc0] %v155_v44  ;;  %v53_v50 = vrot.slane %v51_v47, 2 }
   0xe   :  { %70 = vst [vmem:[#allocation2 + $0x10] sm:$0xf] %v69_v45  ;;  %v136_v46 = vld [vmem:[%s7768_s0 + $0x10] sm:$0xf0]  ;;  %v121_v48 = vld [vmem:[%s7768_s0] sm:$0xc0] }
   0xf   :  { %88 = vst [vmem:[#allocation2 + $0x18] sm:$0x3] %v86_v43  ;;  %v138_v49 = vrot.slane %v136_v46, 6  ;;  %122 = vst [vmem:[#allocation2 + $0x8] sm:$0xc0] %v121_v48  ;;  %v210_v53 = vrot.slane %v206_v38, 4 }
  0x10   :  { %97 = vrot.lane.b32.xlu1 %v94_v14, %s5330_s9  ;;  %v35_v51 = vld [vmem:[%s7768_s0] sm:$0xf]  ;;  %v102_v52 = vld [vmem:[%s7768_s0] sm:$0xf0]  ;;  %v209_v54 = vrot.slane %v205_v41, 4  ;;  %s5336_s28 = smov 119  }
  0x11   :  { %95 = vrot.lane.b32.xlu0 %v93_v15, %s5330_s9  ;;  %36 = vst [vmem:[#allocation2] sm:$0xf] %v35_v51  ;;  %v104_v55 = vrot.slane %v102_v52, 6  ;;  %v170_v56 = vld [vmem:[%s7768_s0 + $0x10] sm:$0xf]  ;;  %s5337_s29 = smov 114  }
  0x12   :  { %v319_v57 = vld [vmem:[%s7768_s0 + $0x8] sm:$0xc0]  ;;  %v318_v58 = vld [vmem:[%s7768_s0] sm:$0xc0]  ;;  %55 = vst [vmem:[#allocation2 + $0x8] sm:$0x3] %v53_v50 }
  0x13   :  { %140 = vst [vmem:[#allocation2 + $0x30] ss:$-28 sps:$4 sm:$0xc3] %v138_v49   ;;  %v172_v59 = vrot.slane %v170_v56, 4  ;;  %v323_v60 = vrot.slane %v319_v57, 4  ;;  %v322_v61 = vrot.slane %v318_v58, 4 }
  0x14   :  { %116 = vrot.lane.b32.xlu1 %v113_v18, %s5330_s9  ;;  %106 = vst [vmem:[#allocation2 + $0x20] ss:$-28 sps:$4 sm:$0xc3] %v104_v55   ;;  %v332_v62 = vld [vmem:[%s7768_s0 + $0x8] sm:$0xf0]  ;;  %s5339_s11 = smov 112  }
  0x15   :  { %114 = vrot.lane.b32.xlu0 %v112_v19, %s5330_s9  ;;  %174 = vst [vmem:[#allocation2 + $0x20] sm:$0xf0] %v172_v59  ;;  %v331_v63 = vld [vmem:[%s7768_s0] sm:$0xf0]  ;;  %v417_v0 = vld [vmem:[%s7768_s0 + $0x18] sm:$0xc] }
  0x16   :  { %v416_v1 = vld [vmem:[%s7768_s0 + $0x10] sm:$0xc]  ;;  %v421_v2 = vrot.slane %v417_v0, 2  ;;  %v430_v4 = vld [vmem:[%s7768_s0 + $0x18] sm:$0xf]  ;;  %vm1028_vm5 = vcmask 1031168  }
  0x17   :  { %v420_v3 = vrot.slane %v416_v1, 2  ;;  %v429_v5 = vld [vmem:[%s7768_s0 + $0x10] sm:$0xf]  ;;  %v434_v6 = vrot.slane %v430_v4, 6  ;;  %v521_v8 = vld [vmem:[%s7768_s0 + $0x18] sm:$0xc0] }
  0x18   :  { %131 = vrot.lane.b32.xlu1 %v128_v22, %s5330_s9  ;;  %v433_v7 = vrot.slane %v429_v5, 6  ;;  %v520_v9 = vld [vmem:[%s7768_s0 + $0x10] sm:$0xc0]  ;;  %v220_v10 = vld [vmem:[%s7768_s0 + $0x8] sm:$0x3]  ;;  %vm1599_vm6 = vcmask 973824  }
  0x19   :  { %129 = vrot.lane.b32.xlu0 %v127_v23, %s5330_s9  ;;  %v219_v11 = vld [vmem:[%s7768_s0] sm:$0x3]  ;;  %v293_v12 = vld [vmem:[%s7768_s0 + $0x8] sm:$0xf0]  ;;  %v292_v13 = vld [vmem:[%s7768_s0] sm:$0xf0] }
  0x1a   :  { %v297_v14 = vrot.slane %v293_v12, 2  ;;  %v296_v15 = vrot.slane %v292_v13, 2  ;;  %v306_v16 = vld [vmem:[%s7768_s0 + $0x8] sm:$0x30]  ;;  %v305_v17 = vld [vmem:[%s7768_s0] sm:$0x30] }
  0x1b   :  { %v310_v18 = vrot.slane %v306_v16, 6  ;;  %v309_v19 = vrot.slane %v305_v17, 6  ;;  %v393_v20 = vld [vmem:[%s7768_s0 + $0x18] sm:$0xf]  ;;  %v392_v21 = vld [vmem:[%s7768_s0 + $0x10] sm:$0xf] }
  0x1c   :  { %165 = vrot.lane.b32.xlu1 %v162_v26, %s5330_s9  ;;  %v404_v22 = vld [vmem:[%s7768_s0 + $0x18] sm:$0x3]  ;;  %v403_v23 = vld [vmem:[%s7768_s0 + $0x10] sm:$0x3]  ;;  %v186_v24 = vld [vmem:[%s7768_s0 + $0x10] sm:$0xc] }
  0x1d   :  { %163 = vrot.lane.b32.xlu0 %v161_v27, %s5330_s9  ;;  %v188_v25 = vrot.slane %v186_v24, 6  ;;  %v408_v26 = vrot.slane %v404_v22, 4  ;;  %v407_v27 = vrot.slane %v403_v23, 4  ;;  %v494_v28 = vld [vmem:[%s7768_s0 + $0x18] sm:$0xf0]  ;;  %v7776_v12 = vmov 0.0  }
  0x1e   :  { %v493_v29 = vld [vmem:[%s7768_s0 + $0x10] sm:$0xf0]  ;;  %v192_v32 = vld [vmem:[%s7768_s0 + $0x18] sm:$0xf]  ;;  %v191_v33 = vld [vmem:[%s7768_s0 + $0x10] sm:$0xf]  ;;  %787 = vmatprep.mubr.f32.mxu1 %v7776_v12  ;;  %692 = vmatprep.mubr.f32.mxu0 %v7776_v12 }
  0x1f   :  { %190 = vst [vmem:[#allocation2 + $0x28] sm:$0x30] %v188_v25  ;;  %v196_v36 = vrot.slane %v192_v32, 2  ;;  %v195_v37 = vrot.slane %v191_v33, 2  ;;  %v532_v38 = vld [vmem:[%s7768_s0 + $0x18] sm:$0xf0] }
  0x20   :  { %239 = vrot.lane.b32.xlu1 %v236_v30, %s5331_s16  ;;  %v498_v30 = vrot.slane %v494_v28, 6  ;;  %v282_v42 = vld [vmem:[%s7768_s0 + $0x18] sm:$0xf0]  ;;  %v281_v43 = vld [vmem:[%s7768_s0 + $0x10] sm:$0xf0]  ;;  %vm2040_vm7 = vcmask 932864  }
  0x21   :  { %237 = vrot.lane.b32.xlu0 %v235_v31, %s5331_s16  ;;  %v497_v31 = vrot.slane %v493_v29, 6  ;;  %v367_v44 = vld [vmem:[%s7768_s0 + $0x8] sm:$0xc]  ;;  %v366_v45 = vld [vmem:[%s7768_s0] sm:$0xc]  ;;  %vm2262_vm8 = vcmask 916480  }
  0x22   :  { %v371_v46 = vrot.slane %v367_v44, 2  ;;  %v370_v47 = vrot.slane %v366_v45, 2  ;;  %v380_v48 = vld [vmem:[%s7768_s0 + $0x8] sm:$0xf]  ;;  %v379_v49 = vld [vmem:[%s7768_s0] sm:$0xf] }
  0x23   :  { %v384_v50 = vrot.slane %v380_v48, 6  ;;  %v383_v51 = vrot.slane %v379_v49, 6  ;;  %v470_v52 = vld [vmem:[%s7768_s0 + $0x8] sm:$0xc0]  ;;  %v507_v55 = vld [vmem:[%s7768_s0 + $0x10] sm:$0x30] }
  0x24   :  { %252 = vrot.lane.b32.xlu1 %v249_v34, %s5332_s23  ;;  %v276_v34 = vld [vmem:[%s7768_s0 + $0x10] sm:$0xc0]  ;;  %v511_v59 = vrot.slane %v507_v55, 2  ;;  %v481_v25 = vld [vmem:[%s7768_s0 + $0x8] sm:$0xf0]  ;;  %v569_v55 = vld [vmem:[%s7769_s2] sm:$0xff] }
  0x25   :  { %250 = vrot.lane.b32.xlu0 %v248_v35, %s5332_s23  ;;  %v278_v35 = vrot.slane %v276_v34, 4  ;;  %v258_v56 = vld [vmem:[%s7768_s0 + $0x10] sm:$0xf0]  ;;  %v457_v32 = vld [vmem:[%s7768_s0 + $0x8] sm:$0x30]  ;;  %vm2151_vm9 = vcmask 924672  }
  0x26   :  { %v260_v57 = vrot.slane %v258_v56, 2  ;;  %v456_v33 = vld [vmem:[%s7768_s0] sm:$0x30]  ;;  %vm2897_vm10 = vcmask 261120   ;;  %vm3452_vm11 = vcmask 400384   ;;  %vm3459_vm12 = vcmask 396288  }
  0x27   :  { %280 = vst [vmem:[#allocation2 + $0x48] sm:$0xc] %v278_v35  ;;  %vm3585_vm13 = vcmask 130112   ;;  %vm3592_vm14 = vcmask 195712   ;;  %vm3720_vm15 = vcmask 1041409  }
  0x28   :  { %150 = vrot.lane.b32.xlu1 %v147_v39, %s5330_s9  ;;  %v531_v39 = vld [vmem:[%s7768_s0 + $0x10] sm:$0xf0]  ;;  %262 = vst [vmem:[#allocation2 + $0x40] sm:$0x3c] %v260_v57 }
  0x29   :  { %148 = vrot.lane.b32.xlu0 %v146_v40, %s5330_s9  ;;  %v536_v40 = vrot.slane %v532_v38, 4  ;;  %v535_v41 = vrot.slane %v531_v39, 4  ;;  %v460_v38 = vrot.slane %v456_v33, 2 }
  0x2c   :  { %213 = vrot.lane.b32.xlu1 %v210_v53, %s5331_s16  ;;  %v469_v53 = vld [vmem:[%s7768_s0] sm:$0xc0] }
  0x2d   :  { %211 = vrot.lane.b32.xlu0 %v209_v54, %s5331_s16  ;;  %v508_v54 = vld [vmem:[%s7768_s0 + $0x18] sm:$0x30] }
  0x2e   :  { %v512_v58 = vrot.slane %v508_v54, 2  ;;  %v570_v54 = vld [vmem:[%s7769_s2 + $0x8] sm:$0xff] }
  0x30   :  { %326 = vrot.lane.b32.xlu1 %v323_v60, %s5331_s16  ;;  %v176_v60 = vld [vmem:[%s7768_s0 + $0x18] sm:$0x3] }
  0x31   :  { %324 = vrot.lane.b32.xlu0 %v322_v61, %s5331_s16  ;;  %v175_v61 = vld [vmem:[%s7768_s0 + $0x10] sm:$0x3] }
  0x34   :  { %337 = vrot.lane.b32.xlu1 %v332_v62, %s5332_s23  ;;  %v264_v62 = vld [vmem:[%s7768_s0 + $0x18] sm:$0x30] }
  0x35   :  { %335 = vrot.lane.b32.xlu0 %v331_v63, %s5332_s23  ;;  %v263_v63 = vld [vmem:[%s7768_s0 + $0x10] sm:$0x30] }
  0x38   :  { %424 = vrot.lane.b32.xlu1 %v421_v2, %s5331_s16  ;;  %v268_v2 = vrot.slane %v264_v62, 6 }
  0x39   :  { %422 = vrot.lane.b32.xlu0 %v420_v3, %s5331_s16  ;;  %v267_v3 = vrot.slane %v263_v63, 6 }
  0x3c   :  { %437 = vrot.lane.b32.xlu1 %v434_v6, %s5332_s23 }
  0x3d   :  { %435 = vrot.lane.b32.xlu0 %v433_v7, %s5332_s23 }
  0x40   :  { %526 = vrot.lane.b32.xlu1 %v521_v8, %s5331_s16  ;;  %v343_v8 = vld [vmem:[%s7768_s0 + $0x8] sm:$0xf] }
  0x41   :  { %524 = vrot.lane.b32.xlu0 %v520_v9, %s5331_s16  ;;  %v342_v9 = vld [vmem:[%s7768_s0] sm:$0xf] }
  0x44   :  { %225 = vrot.lane.b32.xlu1 %v220_v10, %s5332_s23  ;;  %v354_v10 = vld [vmem:[%s7768_s0 + $0x8] sm:$0x3] }
  0x45   :  { %223 = vrot.lane.b32.xlu0 %v219_v11, %s5332_s23  ;;  %v353_v11 = vld [vmem:[%s7768_s0] sm:$0x3]  ;;  %v358_v16 = vrot.slane %v354_v10, 4 }
  0x46   :  { %v357_v17 = vrot.slane %v353_v11, 4 }
  0x48   :  { %300 = vrot.lane.b32.xlu1 %v297_v14, %s5331_s16 }
  0x49   :  { %298 = vrot.lane.b32.xlu0 %v296_v15, %s5331_s16 }
  0x4c   :  { %313 = vrot.lane.b32.xlu1 %v310_v18, %s5332_s23  ;;  %v443_v18 = vld [vmem:[%s7768_s0 + $0x8] sm:$0xf0] }
  0x4d   :  { %311 = vrot.lane.b32.xlu0 %v309_v19, %s5332_s23  ;;  %v442_v19 = vld [vmem:[%s7768_s0] sm:$0xf0]  ;;  %v447_v23 = vrot.slane %v443_v18, 6 }
  0x4e   :  { %v446_v24 = vrot.slane %v442_v19, 6 }
  0x50   :  { %398 = vrot.lane.b32.xlu1 %v393_v20, %s5331_s16 }
  0x51   :  { %396 = vrot.lane.b32.xlu0 %v392_v21, %s5331_s16 }
  0x54   :  { %411 = vrot.lane.b32.xlu1 %v408_v26, %s5332_s23  ;;  %v480_v26 = vld [vmem:[%s7768_s0] sm:$0xf0]  ;;  %s5338_s0 = smov 113  }
  0x55   :  { %409 = vrot.lane.b32.xlu0 %v407_v27, %s5332_s23 }
  0x58   :  { %501 = vrot.lane.b32.xlu1 %v498_v30, %s5331_s16  ;;  %v485_v30 = vrot.slane %v481_v25, 4 }
  0x59   :  { %499 = vrot.lane.b32.xlu0 %v497_v31, %s5331_s16  ;;  %v484_v31 = vrot.slane %v480_v26, 4 }
  0x5c   :  { %199 = vrot.lane.b32.xlu1 %v196_v36, %s5330_s9 }
  0x5d   :  { %197 = vrot.lane.b32.xlu0 %v195_v37, %s5330_s9  ;;  %v461_v37 = vrot.slane %v457_v32, 2 }
  0x60   :  { %539 = vrot.lane.b32.xlu1 %v536_v40, %s5332_s23 }
  0x61   :  { %537 = vrot.lane.b32.xlu0 %v535_v41, %s5332_s23 }
  0x64   :  { %287 = vrot.lane.b32.xlu1 %v282_v42, %s5330_s9 }
  0x65   :  { %285 = vrot.lane.b32.xlu0 %v281_v43, %s5330_s9 }
  0x68   :  { %374 = vrot.lane.b32.xlu1 %v371_v46, %s5331_s16 }
  0x69   :  { %372 = vrot.lane.b32.xlu0 %v370_v47, %s5331_s16 }
  0x6c   :  { %387 = vrot.lane.b32.xlu1 %v384_v50, %s5332_s23 }
  0x6d   :  { %385 = vrot.lane.b32.xlu0 %v383_v51, %s5332_s23 }
  0x70   :  { %475 = vrot.lane.b32.xlu1 %v470_v52, %s5331_s16 }
  0x71   :  { %473 = vrot.lane.b32.xlu0 %v469_v53, %s5331_s16  ;;  %v5334_v53 = vmov 0  }
  0x72   :  { %4529 = vset.pattern.permute.xlu1 %v5334_v53  ;;  %4528 = vset.pattern.permute.xlu0 %v5334_v53 }
  0x74   :  { %515 = vrot.lane.b32.xlu1 %v512_v58, %s5332_s23 }
  0x75   :  { %513 = vrot.lane.b32.xlu0 %v511_v59, %s5332_s23 }
  0x76   :  { %v63_v0 = vpop.permute.xlu1 %62 }
  0x77   :  { %v44_v1 = vpop.permute.xlu0 %43 }
  0x78   :  { %181 = vrot.lane.b32.xlu1 %v176_v60, %s5330_s9  ;;  %v571_v60 = vld [vmem:[%s7769_s2 + $0x10] sm:$0xff] }
  0x79   :  { %179 = vrot.lane.b32.xlu0 %v175_v61, %s5330_s9  ;;  %v572_v61 = vld [vmem:[%s7769_s2 + $0x18] sm:$0xff] }
  0x7a   :  { %v65_v4 = vpop.permute.xlu1 %64 }
  0x7b   :  { %v46_v5 = vpop.permute.xlu0 %45  ;;  %v66_v6 = vsel %vm47_vm0, %v63_v0, %v65_v4 }
  0x7c   :  { %v48_v7 = vsel %vm47_vm0, %v44_v1, %v46_v5  ;;  %68 = vst [vmem:[#allocation2 + $0x8] sm:$0x3c] %v66_v6  ;;  %271 = vrot.lane.b32.xlu1 %v268_v2, %s5330_s9  ;;  %v573_v1 = vld [vmem:[%s7769_s2 + $0x20] sm:$0xff] }
  0x7d   :  { %50 = vst [vmem:[#allocation2] sm:$0x30] %v48_v7  ;;  %269 = vrot.lane.b32.xlu0 %v267_v3, %s5330_s9 }
  0x7e   :  { %v80_v13 = vpop.permute.xlu1 %79 }
  0x7f   :  { %v78_v14 = vpop.permute.xlu0 %77 }
  0x80   :  { %v81_v15 = vsel %vm47_vm0, %v78_v14, %v80_v13  ;;  %348 = vrot.lane.b32.xlu1 %v343_v8, %s5331_s16 }
  0x81   :  { %83 = vst [vmem:[#allocation2 + $0x10] sm:$0x30] %v81_v15  ;;  %346 = vrot.lane.b32.xlu0 %v342_v9, %s5331_s16 }
  0x82   :  { %v98_v20 = vpop.permute.xlu1 %97 }
  0x83   :  { %v96_v21 = vpop.permute.xlu0 %95 }
  0x84   :  { %v99_v22 = vsel %vm47_vm0, %v96_v21, %v98_v20  ;;  %361 = vrot.lane.b32.xlu1 %v358_v16, %s5332_s23 }
  0x85   :  { %101 = vst [vmem:[#allocation2 + $0x18] sm:$0x3c] %v99_v22  ;;  %359 = vrot.lane.b32.xlu0 %v357_v17, %s5332_s23 }
  0x86   :  { %v117_v27 = vpop.permute.xlu1 %116 }
  0x87   :  { %v115_v28 = vpop.permute.xlu0 %114 }
  0x88   :  { %v118_v29 = vsel %vm47_vm0, %v115_v28, %v117_v27  ;;  %450 = vrot.lane.b32.xlu1 %v447_v23, %s5331_s16  ;;  %v551_v5 = vld [vmem:[#allocation2 + $0x10] sm:$0xff] }
  0x89   :  { %120 = vst [vmem:[#allocation2 + $0x20] sm:$0xc] %v118_v29  ;;  %448 = vrot.lane.b32.xlu0 %v446_v24, %s5331_s16 }
  0x8a   :  { %v132_v34 = vpop.permute.xlu1 %131 }
  0x8b   :  { %v130_v35 = vpop.permute.xlu0 %129 }
  0x8c   :  { %v133_v36 = vsel %vm47_vm0, %v130_v35, %v132_v34  ;;  %488 = vrot.lane.b32.xlu1 %v485_v30, %s5332_s23  ;;  %v552_v57 = vld [vmem:[#allocation2 + $0x18] sm:$0xff] }
  0x8d   :  { %135 = vst [vmem:[#allocation2 + $0x28] sm:$0xf] %v133_v36  ;;  %486 = vrot.lane.b32.xlu0 %v484_v31, %s5332_s23 }
  0x8e   :  { %v166_v39 = vpop.permute.xlu1 %165 }
  0x8f   :  { %v164_v40 = vpop.permute.xlu0 %163 }
  0x90   :  { %v167_v41 = vsel %vm47_vm0, %v164_v40, %v166_v39  ;;  %464 = vrot.lane.b32.xlu1 %v461_v37, %s5332_s23 }
  0x91   :  { %169 = vst [vmem:[#allocation2 + $0x38] sm:$0xf] %v167_v41  ;;  %462 = vrot.lane.b32.xlu0 %v460_v38, %s5332_s23 }
  0x92   :  { %v240_v42 = vpop.permute.xlu1 %239 }
  0x93   :  { %v238_v43 = vpop.permute.xlu0 %237 }
  0x94   :  { %v241_v44 = vsel %vm215_vm1, %v238_v43, %v240_v42  ;;  %581 = vperm.xlu1 %4529, %v570_v54  }
  0x95   :  { %243 = vst [vmem:[#allocation2 + $0x38] sm:$0x30] %v241_v44  ;;  %576 = vperm.xlu0 %4528, %v569_v55   ;;  %v549_v55 = vld [vmem:[#allocation2] sm:$0xff] }
  0x96   :  { %v253_v45 = vpop.permute.xlu1 %252 }
  0x97   :  { %v251_v46 = vpop.permute.xlu0 %250 }
  0x98   :  { %v254_v47 = vsel %vm227_vm2, %v251_v46, %v253_v45  ;;  %586 = vperm.xlu1 %4529, %v571_v60  }
  0x99   :  { %256 = vst [vmem:[#allocation2 + $0x58] ss:$-28 sps:$4 sm:$0xc3] %v254_v47   ;;  %591 = vperm.xlu0 %4528, %v572_v61  }
  0x9a   :  { %v151_v48 = vpop.permute.xlu1 %150 }
  0x9b   :  { %v149_v49 = vpop.permute.xlu0 %148 }
  0x9c   :  { %v152_v50 = vsel %vm47_vm0, %v149_v49, %v151_v48  ;;  %596 = vperm.xlu1 %4529, %v573_v1  }
  0x9d   :  { %154 = vst [vmem:[#allocation2 + $0x30] sm:$0xc] %v152_v50  ;;  %v553_v50 = vld [vmem:[#allocation2 + $0x20] sm:$0xff] }
  0x9e   :  { %v214_v51 = vpop.permute.xlu1 %213 }
  0x9f   :  { %v212_v52 = vpop.permute.xlu0 %211 }
  0xa0   :  { %v216_v56 = vsel %vm215_vm1, %v212_v52, %v214_v51  ;;  %v556_v58 = vld [vmem:[#allocation2 + $0x38] sm:$0xff]  ;;  %v550_v52 = vld [vmem:[#allocation2 + $0x8] sm:$0xff] }
  0xa1   :  { %218 = vst [vmem:[#allocation2 + $0x30] sm:$0xf0] %v216_v56  ;;  %v4317_v59 = vpack.c.bf16 %v556_v58, %v552_v57  ;;  %v4311_v56 = vpack.c.bf16 %v553_v50, %v549_v55 }
  0xa2   :  { %v327_v62 = vpop.permute.xlu1 %326 }
  0xa3   :  { %4318 = vmatprep.subr.bf16.mxu1 %v4317_v59  ;;  %v325_v63 = vpop.permute.xlu0 %324 }
  0xa4   :  { %v328_v0 = vsel %vm215_vm1, %v325_v63, %v327_v62 }
  0xa5   :  { %330 = vst [vmem:[#allocation2 + $0x58] sm:$0xc] %v328_v0 }
  0xa6   :  { %v338_v2 = vpop.permute.xlu1 %337 }
  0xa7   :  { %v336_v3 = vpop.permute.xlu0 %335 }
  0xa8   :  { %v339_v4 = vsel %vm227_vm2, %v336_v3, %v338_v2  ;;  %v555_v6 = vld [vmem:[#allocation2 + $0x30] sm:$0xff] }
  0xa9   :  { %341 = vst [vmem:[#allocation2 + $0x58] sm:$0xf0] %v339_v4  ;;  %v4319_v7 = vpack.c.bf16 %v555_v6, %v551_v5 }
  0xaa   :  { %v425_v8 = vpop.permute.xlu1 %424 }
  0xab   :  { %4320 = vmatpush1.bf16.msra.mxu1 %v4319_v7  ;;  %v423_v9 = vpop.permute.xlu0 %422 }
  0xac   :  { %v426_v10 = vsel %vm215_vm1, %v423_v9, %v425_v8 }
  0xad   :  { %428 = vst [vmem:[#allocation2 + $0x78] sm:$0x3] %v426_v10 }
  0xae   :  { %v438_v11 = vpop.permute.xlu1 %437 }
  0xaf   :  { %v436_v13 = vpop.permute.xlu0 %435 }
  0xb0   :  { %v439_v14 = vsel %vm227_vm2, %v436_v13, %v438_v11  ;;  %v560_v24 = vld [vmem:[#allocation2 + $0x58] sm:$0xff] }
  0xb1   :  { %441 = vst [vmem:[#allocation2 + $0x78] sm:$0x3c] %v439_v14 }
  0xb2   :  { %v527_v15 = vpop.permute.xlu1 %526 }
  0xb3   :  { %v525_v16 = vpop.permute.xlu0 %524 }
  0xb4   :  { %v528_v17 = vsel %vm215_vm1, %v525_v16, %v527_v15  ;;  %v544_v15 = vld [vmem:[%s7770_s1] sm:$0xff] }
  0xb5   :  { %530 = vst [vmem:[#allocation2 + $0x78] sm:$0xc0] %v528_v17 }
  0xb6   :  { %v226_v18 = vpop.permute.xlu1 %225 }
  0xb7   :  { %v224_v19 = vpop.permute.xlu0 %223 }
  0xb8   :  { %v228_v20 = vsel %vm227_vm2, %v224_v19, %v226_v18 }
  0xb9   :  { %230 = vst [vmem:[#allocation2 + $0x50] sm:$0x3] %v228_v20  ;;  %v545_v20 = vld [vmem:[%s7770_s1 + $0x8] sm:$0xff] }
  0xba   :  { %v301_v21 = vpop.permute.xlu1 %300 }
  0xbb   :  { %v299_v22 = vpop.permute.xlu0 %298 }
  0xbc   :  { %v302_v23 = vsel %vm215_vm1, %v299_v22, %v301_v21  ;;  %v564_v25 = vld [vmem:[#allocation2 + $0x78] sm:$0xff] }
  0xbd   :  { %304 = vst [vmem:[#allocation2 + $0x50] sm:$0x3c] %v302_v23  ;;  %v4321_v26 = vpack.c.bf16 %v564_v25, %v560_v24  ;;  %v546_v24 = vld [vmem:[%s7770_s1 + $0x10] sm:$0xff] }
  0xbe   :  { %v314_v27 = vpop.permute.xlu1 %313 }
  0xbf   :  { %4322 = vmatprep.subr.bf16.mxu1 %v4321_v26  ;;  %v312_v28 = vpop.permute.xlu0 %311 }
  0xc0   :  { %v315_v29 = vsel %vm227_vm2, %v312_v28, %v314_v27  ;;  %v547_v28 = vld [vmem:[%s7770_s1 + $0x18] sm:$0xff] }
  0xc1   :  { %317 = vst [vmem:[#allocation2 + $0x50] sm:$0xc0] %v315_v29 }
  0xc2   :  { %v399_v30 = vpop.permute.xlu1 %398 }
  0xc3   :  { %v397_v31 = vpop.permute.xlu0 %396 }
  0xc4   :  { %v400_v32 = vsel %vm215_vm1, %v397_v31, %v399_v30 }
  0xc5   :  { %402 = vst [vmem:[#allocation2 + $0x70] sm:$0xf] %v400_v32  ;;  %v548_v32 = vld [vmem:[%s7770_s1 + $0x20] sm:$0xff]  ;;  %s5335_s1 = smov 126  }
  0xc6   :  { %v412_v33 = vpop.permute.xlu1 %411 }
  0xc7   :  { %v410_v34 = vpop.permute.xlu0 %409 }
  0xc8   :  { %v413_v35 = vsel %vm227_vm2, %v410_v34, %v412_v33  ;;  %v559_v45 = vld [vmem:[#allocation2 + $0x50] sm:$0xff] }
  0xc9   :  { %415 = vst [vmem:[#allocation2 + $0x70] sm:$0x30] %v413_v35 }
  0xca   :  { %v502_v36 = vpop.permute.xlu1 %501 }
  0xcb   :  { %v500_v37 = vpop.permute.xlu0 %499 }
  0xcc   :  { %v503_v38 = vsel %vm215_vm1, %v500_v37, %v502_v36 }
  0xcd   :  { %505 = vst [vmem:[#allocation2 + $0x90] ss:$-28 sps:$4 sm:$0xc3] %v503_v38  }
  0xce   :  { %v200_v39 = vpop.permute.xlu1 %199 }
  0xcf   :  { %v198_v40 = vpop.permute.xlu0 %197 }
  0xd0   :  { %v201_v41 = vsel %vm47_vm0, %v198_v40, %v200_v39 }
  0xd1   :  { %203 = vst [vmem:[#allocation2 + $0x48] ss:$-28 sps:$4 sm:$0xc3] %v201_v41  }
  0xd2   :  { %v540_v42 = vpop.permute.xlu1 %539 }
  0xd3   :  { %v538_v43 = vpop.permute.xlu0 %537 }
  0xd4   :  { %v541_v44 = vsel %vm227_vm2, %v538_v43, %v540_v42  ;;  %v563_v46 = vld [vmem:[#allocation2 + $0x70] sm:$0xff] }
  0xd5   :  { %543 = vst [vmem:[#allocation2 + $0x98] sm:$0xf] %v541_v44  ;;  %v4323_v47 = vpack.c.bf16 %v563_v46, %v559_v45 }
  0xd6   :  { %v288_v48 = vpop.permute.xlu1 %287 }
  0xd7   :  { %4324 = vmatpush1.bf16.msra.mxu1 %v4323_v47  ;;  %v286_v49 = vpop.permute.xlu0 %285 }
  0xd8   :  { %v289_v51 = vsel %vm47_vm0, %v286_v49, %v288_v48  ;;  %v554_v53 = vld [vmem:[#allocation2 + $0x28] sm:$0xff] }
  0xd9   :  { %291 = vst [vmem:[#allocation2 + $0x48] sm:$0xf0] %v289_v51  ;;  %v4309_v54 = vpack.c.bf16 %v554_v53, %v550_v52 }
  0xda   :  { %v375_v57 = vpop.permute.xlu1 %374 }
  0xdb   :  { %4310 = vmatprep.subr.bf16.mxu0 %v4309_v54  ;;  %v373_v58 = vpop.permute.xlu0 %372 }
  0xdc   :  { %v376_v59 = vsel %vm215_vm1, %v373_v58, %v375_v57  ;;  %4312 = vmatpush1.bf16.msra.mxu0 %v4311_v56  ;;  %v568_v60 = vld [vmem:[#allocation2 + $0x98] sm:$0xf] }
  0xdd   :  { %378 = vst [vmem:[#allocation2 + $0x68] sm:$0x3] %v376_v59  ;;  %4094 = vmatprep.subr.msk.mxu1 %vm615_vm3, %v568_v60 }
  0xde   :  { %v388_v61 = vpop.permute.xlu1 %387 }
  0xdf   :  { %v386_v62 = vpop.permute.xlu0 %385 }
  0xe0   :  { %v389_v63 = vsel %vm227_vm2, %v386_v62, %v388_v61  ;;  %v558_v9 = vld [vmem:[#allocation2 + $0x48] sm:$0xff] }
  0xe1   :  { %391 = vst [vmem:[#allocation2 + $0x68] sm:$0x3c] %v389_v63 }
  0xe2   :  { %v476_v0 = vpop.permute.xlu1 %475 }
  0xe3   :  { %v474_v1 = vpop.permute.xlu0 %473 }
  0xe4   :  { %v477_v2 = vsel %vm215_vm1, %v474_v1, %v476_v0 }
  0xe5   :  { %479 = vst [vmem:[#allocation2 + $0x68] sm:$0xc0] %v477_v2 }
  0xe6   :  { %v516_v3 = vpop.permute.xlu1 %515 }
  0xe7   :  { %v514_v4 = vpop.permute.xlu0 %513 }
  0xe8   :  { %v517_v5 = vsel %vm227_vm2, %v514_v4, %v516_v3 }
  0xe9   :  { %519 = vst [vmem:[#allocation2 + $0x90] sm:$0xc] %v517_v5 }
  0xea   :  { %v182_v6 = vpop.permute.xlu1 %181 }
  0xeb   :  { %v180_v7 = vpop.permute.xlu0 %179 }
  0xec   :  { %v183_v8 = vsel %vm47_vm0, %v180_v7, %v182_v6  ;;  %v562_v10 = vld [vmem:[#allocation2 + $0x68] sm:$0xff] }
  0xed   :  { %185 = vst [vmem:[#allocation2 + $0x40] sm:$0x3] %v183_v8  ;;  %v4313_v11 = vpack.c.bf16 %v562_v10, %v558_v9 }
  0xee   :  { %v272_v13 = vpop.permute.xlu1 %271 }
  0xef   :  { %v270_v14 = vpop.permute.xlu0 %269  ;;  %4314 = vmatprep.subr.bf16.mxu0 %v4313_v11 }
  0xf0   :  { %v273_v16 = vsel %vm47_vm0, %v270_v14, %v272_v13  ;;  %v567_v17 = vld [vmem:[#allocation2 + $0x90] sm:$0xf] }
  0xf1   :  { %275 = vst [vmem:[#allocation2 + $0x40] sm:$0xc0] %v273_v16  ;;  %4095 = vmatpush1.msk.msra.mxu1 %vm615_vm3, %v567_v17 }
  0xf2   :  { %4096 = vmatmul.mubr.msk.f32.vlgmr.msra.gmra.mrb[0].mxu1 %vm599_vm4, %v544_v15  ;;  %v349_v18 = vpop.permute.xlu1 %348 }
  0xf3   :  { %v347_v19 = vpop.permute.xlu0 %346  ;;  %793 = vmatprep.mubr.f32.mxu1 %v7776_v12 }
  0xf4   :  { %v350_v21 = vsel %vm215_vm1, %v347_v19, %v349_v18 }
  0xf5   :  { %352 = vst [vmem:[#allocation2 + $0x60] sm:$0xf] %v350_v21 }
  0xf6   :  { %4097 = vmatmul.mubr.msk.f32.gmra.mrb[2].mxu1 %vm599_vm4, %v545_v20  ;;  %v362_v22 = vpop.permute.xlu1 %361 }
  0xf7   :  { %v360_v23 = vpop.permute.xlu0 %359  ;;  %799 = vmatprep.mubr.f32.mxu1 %v7776_v12 }
  0xf8   :  { %v363_v25 = vsel %vm227_vm2, %v360_v23, %v362_v22  ;;  %v557_v37 = vld [vmem:[#allocation2 + $0x40] sm:$0xff] }
  0xf9   :  { %365 = vst [vmem:[#allocation2 + $0x60] sm:$0x30] %v363_v25 }
  0xfa   :  { %4098 = vmatmul.mubr.msk.f32.gmra.mrb[4].mxu1 %vm599_vm4, %v546_v24  ;;  %v451_v26 = vpop.permute.xlu1 %450 }
  0xfb   :  { %v449_v27 = vpop.permute.xlu0 %448  ;;  %805 = vmatprep.mubr.f32.mxu1 %v7776_v12 }
  0xfc   :  { %v452_v29 = vsel %vm215_vm1, %v449_v27, %v451_v26 }
  0xfd   :  { %454 = vst [vmem:[#allocation2 + $0x80] ss:$-28 sps:$4 sm:$0xc3] %v452_v29  }
  0xfe   :  { %4099 = vmatmul.mubr.msk.f32.gmra.mrb[6].mxu1 %vm599_vm4, %v547_v28  ;;  %v489_v30 = vpop.permute.xlu1 %488 }
  0xff   :  { %v487_v31 = vpop.permute.xlu0 %486  ;;  %811 = vmatprep.mubr.f32.mxu1 %v7776_v12 }
 0x100   :  { %v490_v33 = vsel %vm227_vm2, %v487_v31, %v489_v30 }
 0x101   :  { %492 = vst [vmem:[#allocation2 + $0x88] sm:$0xf] %v490_v33 }
 0x102   :  { %4100 = vmatmul.mubr.msk.f32.gmra.mrb[8].mxu1 %vm599_vm4, %v548_v32  ;;  %v465_v34 = vpop.permute.xlu1 %464 }
 0x103   :  { %v463_v35 = vpop.permute.xlu0 %462 }
 0x104   :  { %v466_v36 = vsel %vm227_vm2, %v463_v35, %v465_v34  ;;  %v561_v38 = vld [vmem:[#allocation2 + $0x60] sm:$0xff] }
 0x105   :  { %468 = vst [vmem:[#allocation2 + $0x80] sm:$0xc] %v466_v36  ;;  %v4315_v39 = vpack.c.bf16 %v561_v38, %v557_v37 }
 0x107   :  { %4316 = vmatpush1.bf16.msra.mxu0 %v4315_v39 }
 0x108   :  { %v566_v40 = vld [vmem:[#allocation2 + $0x88] sm:$0xf] }
 0x109   :  { %4087 = vmatprep.subr.msk.mxu0 %vm615_vm3, %v566_v40 }
 0x10c   :  { %v565_v41 = vld [vmem:[#allocation2 + $0x80] sm:$0xf] }
 0x10d   :  { %4088 = vmatpush1.msk.msra.mxu0 %vm615_vm3, %v565_v41  ;;  %vm3728_vm3 = vcmask 1045509  }
 0x10e   :  { %4089 = vmatmul.mubr.msk.f32.vlgmr.msra.gmra.mrb[0].mxu0 %vm599_vm4, %v544_v15 }
 0x10f   :  { %698 = vmatprep.mubr.f32.mxu0 %v7776_v12 }
 0x112   :  { %4090 = vmatmul.mubr.msk.f32.gmra.mrb[2].mxu0 %vm599_vm4, %v545_v20 }
 0x113   :  { %704 = vmatprep.mubr.f32.mxu0 %v7776_v12  ;;  %v582_v46 = vpop.permute.xlu1 %581 }
 0x114   :  { %v577_v43 = vpop.permute.xlu0 %576 }
 0x116   :  { %4091 = vmatmul.mubr.msk.f32.gmra.mrb[4].mxu0 %vm599_vm4, %v546_v24 }
 0x117   :  { %710 = vmatprep.mubr.f32.mxu0 %v7776_v12  ;;  %v587_v58 = vpop.permute.xlu1 %586 }
 0x118   :  { %v592_v62 = vpop.permute.xlu0 %591 }
 0x11a   :  { %4092 = vmatmul.mubr.msk.f32.gmra.mrb[6].mxu0 %vm599_vm4, %v547_v28 }
 0x11b   :  { %716 = vmatprep.mubr.f32.mxu0 %v7776_v12  ;;  %v597_v5 = vpop.permute.xlu1 %596 }
 0x11e   :  { %4093 = vmatmul.mubr.msk.f32.gmra.mrb[8].mxu0 %vm599_vm4, %v548_v32  ;;  %vm3730_vm4 = vcmask 1046534  }
 0x1c5   :  { %v789_v42 = vpop.f32.mrb[0].mxu1 }
 0x1c6   :  { %v791_v44 = vpop.f32.mrb[1].mxu1  ;;  %v790_v45 = vadd.f32 %v789_v42, %v577_v43 }
 0x1c7   :  { %v792_v47 = vadd.f32 %v791_v44, %v577_v43 }
 0x1c8   :  { %v5797_v48 = vmax.f32 %v790_v45, 0.0 }
 0x1c9   :  { %v795_v49 = vpop.f32.mrb[2].mxu1  ;;  %v5799_v50 = vmax.f32 %v792_v47, 0.0 }
 0x1ca   :  { %7859 = vst [vmem:[#allocation5_spill] sm:$0xff] %v5797_v48  ;;  %v796_v51 = vadd.f32 %v795_v49, %v582_v46  ;;  %v797_v52 = vpop.f32.mrb[3].mxu1 }
 0x1cb   :  { %7860 = vst [vmem:[#allocation6_spill] sm:$0xff] %v5799_v50  ;;  %v798_v53 = vadd.f32 %v797_v52, %v582_v46  ;;  %v5803_v54 = vpack.i.bf16 %v5799_v50, %v5797_v48  ;;  %v5849_v33 = vpack.i.bf16 %v7776_v12, %v5799_v50 }
 0x1cc   :  { %v5805_v55 = vmax.f32 %v796_v51, 0.0 }
 0x1cd   :  { %v5807_v56 = vmax.f32 %v798_v53, 0.0  ;;  %v801_v57 = vpop.f32.mrb[4].mxu1 }
 0x1ce   :  { %7861 = vst [vmem:[#allocation7_spill] sm:$0xff] %v5805_v55  ;;  %v802_v59 = vadd.f32 %v801_v57, %v587_v58  ;;  %v803_v60 = vpop.f32.mrb[5].mxu1 }
 0x1cf   :  { %7862 = vst [vmem:[#allocation8_spill] sm:$0xff] %v5807_v56  ;;  %v804_v61 = vadd.f32 %v803_v60, %v587_v58  ;;  %v5811_v63 = vpack.i.bf16 %v5807_v56, %v5805_v55 }
 0x1d0   :  { %v5813_v0 = vmax.f32 %v802_v59, 0.0 }
 0x1d1   :  { %v5815_v1 = vmax.f32 %v804_v61, 0.0  ;;  %v807_v2 = vpop.f32.mrb[6].mxu1 }
 0x1d2   :  { %7863 = vst [vmem:[#allocation9_spill] sm:$0xff] %v5813_v0  ;;  %v809_v3 = vpop.f32.mrb[7].mxu1  ;;  %v808_v4 = vadd.f32 %v807_v2, %v592_v62 }
 0x1d3   :  { %7864 = vst [vmem:[#allocation10_spill] sm:$0xff] %v5815_v1  ;;  %v810_v6 = vadd.f32 %v809_v3, %v592_v62  ;;  %v5819_v7 = vpack.i.bf16 %v5815_v1, %v5813_v0 }
 0x1d4   :  { %v5821_v8 = vmax.f32 %v808_v4, 0.0 }
 0x1d5   :  { %v813_v9 = vpop.f32.mrb[8].mxu1  ;;  %v5823_v10 = vmax.f32 %v810_v6, 0.0 }
 0x1d6   :  { %7865 = vst [vmem:[#allocation11_spill] sm:$0xff] %v5821_v8  ;;  %v814_v11 = vadd.f32 %v813_v9, %v597_v5  ;;  %v815_v13 = vpop.f32.mrb[9].mxu1 }
 0x1d7   :  { %7866 = vst [vmem:[#allocation12_spill] sm:$0xff] %v5823_v10  ;;  %v816_v14 = vadd.f32 %v815_v13, %v597_v5  ;;  %v5827_v15 = vpack.i.bf16 %v5823_v10, %v5821_v8 }
 0x1d8   :  { %v5829_v16 = vmax.f32 %v814_v11, 0.0 }
 0x1d9   :  { %v5831_v17 = vmax.f32 %v816_v14, 0.0 }
 0x1da   :  { %7867 = vst [vmem:[#allocation13_spill] sm:$0xff] %v5829_v16 }
 0x1db   :  { %7868 = vst [vmem:[#allocation14_spill] sm:$0xff] %v5831_v17  ;;  %v5835_v18 = vpack.i.bf16 %v5831_v17, %v5829_v16 }
 0x1e1   :  { %v694_v19 = vpop.f32.mrb[0].mxu0 }
 0x1e2   :  { %v695_v21 = vadd.f32 %v694_v19, %v577_v43  ;;  %v696_v22 = vpop.f32.mrb[1].mxu0 }
 0x1e3   :  { %v697_v24 = vadd.f32 %v696_v22, %v577_v43 }
 0x1e4   :  { %v818_v26 = vmax.f32 %v695_v21, 0.0 }
 0x1e5   :  { %v819_v29 = vmax.f32 %v697_v24, 0.0  ;;  %v700_v30 = vpop.f32.mrb[2].mxu0  ;;  %v5960_v24 = vpack.i.bf16 %v7776_v12, %v5807_v56 }
 0x1e6   :  { %v701_v31 = vadd.f32 %v700_v30, %v582_v46  ;;  %v702_v32 = vpop.f32.mrb[3].mxu0 }
 0x1e7   :  { %v5852_v34 = vpack.i.bf16 %v5797_v48, %v819_v29  ;;  %v5854_v35 = vpack.i.bf16 %v819_v29, %v818_v26  ;;  %v703_v36 = vadd.f32 %v702_v32, %v582_v46 }
 0x1e8   :  { %v822_v37 = vmax.f32 %v701_v31, 0.0 }
 0x1e9   :  { %4536 = vrot.lane.b32.xlu1 %v5852_v34, %s5330_s9  ;;  %4531 = vrot.lane.b32.xlu0 %v5854_v35, %s5330_s9  ;;  %v5860_v38 = vmax.f32 %v703_v36, 0.0  ;;  %v706_v39 = vpop.f32.mrb[4].mxu0 }
 0x1ea   :  { %v707_v40 = vadd.f32 %v706_v39, %v587_v58  ;;  %v708_v41 = vpop.f32.mrb[5].mxu0  ;;  %v5901_v11 = vpack.c.bf16 %v822_v37, %v818_v26  ;;  %v6012_v26 = vpack.i.bf16 %v7776_v12, %v5815_v1 }
 0x1eb   :  { %7869 = vst [vmem:[#allocation15_spill] sm:$0xff] %v5860_v38  ;;  %v709_v42 = vadd.f32 %v708_v41, %v587_v58  ;;  %v5863_v43 = vpack.i.bf16 %v5860_v38, %v822_v37  ;;  %v5867_v44 = vpack.i.bf16 %v5805_v55, %v5860_v38 }
 0x1ec   :  { %v826_v45 = vmax.f32 %v707_v40, 0.0 }
 0x1ed   :  { %v5869_v46 = vmax.f32 %v709_v42, 0.0  ;;  %v712_v47 = vpop.f32.mrb[6].mxu0  ;;  %4546 = vrot.lane.b32.xlu1 %v5852_v34, %s5335_s1  ;;  %4541 = vrot.lane.b32.xlu0 %v5854_v35, %s5335_s1 }
 0x1ee   :  { %v713_v49 = vadd.f32 %v712_v47, %v592_v62  ;;  %v714_v51 = vpop.f32.mrb[7].mxu0 }
 0x1ef   :  { %7870 = vst [vmem:[#allocation16_spill] sm:$0xff] %v5869_v46  ;;  %v715_v52 = vadd.f32 %v714_v51, %v592_v62  ;;  %v5876_v53 = vpack.i.bf16 %v5869_v46, %v826_v45  ;;  %v5880_v57 = vpack.i.bf16 %v5813_v0, %v5869_v46 }
 0x1f0   :  { %v830_v58 = vmax.f32 %v713_v49, 0.0 }
 0x1f1   :  { %7871 = vst [vmem:[#allocation17_spill] sm:$0xff] %v5876_v53  ;;  %v5882_v59 = vmax.f32 %v715_v52, 0.0  ;;  %v718_v60 = vpop.f32.mrb[8].mxu0  ;;  %4556 = vrot.lane.b32.xlu1 %v5849_v33, %s5330_s9  ;;  %4551 = vrot.lane.b32.xlu0 %v5803_v54, %s5330_s9  ;;  %v6080_v52 = vpack.i.bf16 %v7776_v12, %v5823_v10 }
 0x1f2   :  { %v719_v61 = vadd.f32 %v718_v60, %v597_v5  ;;  %v720_v2 = vpop.f32.mrb[9].mxu0  ;;  %v5918_v14 = vpack.c.bf16 %v830_v58, %v826_v45 }
 0x1f3   :  { %7872 = vst [vmem:[#allocation18_spill] sm:$0xff] %v5882_v59  ;;  %v721_v62 = vadd.f32 %v720_v2, %v597_v5  ;;  %v5890_v3 = vpack.i.bf16 %v5821_v8, %v5882_v59  ;;  %v5893_v4 = vpack.i.bf16 %v5882_v59, %v830_v58  ;;  %7877 = vst [vmem:[#allocation23_spill] sm:$0xff] %v6080_v52  ;;  %v7884_v8 = vmov 0.0  }
 0x1f4   :  { %v834_v6 = vmax.f32 %v719_v61, 0.0  ;;  %7875 = vst [vmem:[#allocation21_spill] sm:$0xff] %v5918_v14  ;;  %v6178_v38 = vpack.i.bf16 %v7884_v8, %v5831_v17 }
 0x1f5   :  { %7873 = vst [vmem:[#allocation19_spill] sm:$0xff] %v5893_v4  ;;  %v5895_v9 = vmax.f32 %v721_v62, 0.0  ;;  %4566 = vrot.lane.b32.xlu1 %v5849_v33, %s5335_s1  ;;  %4561 = vrot.lane.b32.xlu0 %v5803_v54, %s5335_s1 }
 0x1f6   :  { %v5920_v19 = vpack.c.bf16 %v819_v29, %v834_v6  ;;  %7885 = vst [vmem:[#allocation30_spill] sm:$0xff] %v6178_v38 }
 0x1f7   :  { %7874 = vst [vmem:[#allocation20_spill] sm:$0xff] %v5895_v9  ;;  %v5904_v5 = vpack.i.bf16 %v5895_v9, %v834_v6  ;;  %v5908_v13 = vpack.i.bf16 %v5829_v16, %v5895_v9 }
 0x1f8   :  { %7876 = vst [vmem:[#allocation22_spill] sm:$0xff] %v5920_v19 }
 0x1f9   :  { %4576 = vrot.lane.b32.xlu1 %v5852_v34, %s5331_s16  ;;  %4571 = vrot.lane.b32.xlu0 %v5854_v35, %s5331_s16 }
 0x1fd   :  { %4586 = vrot.lane.b32.xlu1 %v5854_v35, %s5336_s28  ;;  %4581 = vrot.lane.b32.xlu0 %v5854_v35, %s5332_s23 }
 0x201   :  { %4596 = vrot.lane.b32.xlu1 %v5803_v54, %s5332_s23  ;;  %4591 = vrot.lane.b32.xlu0 %v5849_v33, %s5336_s28 }
 0x205   :  { %4611 = vrot.lane.b32.xlu1 %v5849_v33, %s5332_s23  ;;  %4601 = vrot.lane.b32.xlu0 %v5852_v34, %s5336_s28 }
 0x209   :  { %4621 = vrot.lane.b32.xlu1 %v5852_v34, %s5332_s23  ;;  %4606 = vrot.lane.b32.xlu0 %v5854_v35, %s5337_s29 }
 0x20d   :  { %4626 = vrot.lane.b32.xlu1 %v5852_v34, %s5337_s29  ;;  %4616 = vrot.lane.b32.xlu0 %v5803_v54, %s5331_s16 }
 0x211   :  { %4636 = vrot.lane.b32.xlu1 %v5849_v33, %s5331_s16  ;;  %4631 = vrot.lane.b32.xlu0 %v5803_v54, %s5336_s28 }
 0x215   :  { %4646 = vrot.lane.b32.xlu1 %v5863_v43, %s5330_s9  ;;  %4641 = vrot.lane.b32.xlu0 %v5803_v54, %s5338_s0 }
 0x219   :  { %4656 = vrot.lane.b32.xlu1 %v5863_v43, %s5335_s1  ;;  %4651 = vrot.lane.b32.xlu0 %v5867_v44, %s5330_s9 }
 0x21d   :  { %4666 = vrot.lane.b32.xlu1 %v5811_v63, %s5330_s9  ;;  %4661 = vrot.lane.b32.xlu0 %v5867_v44, %s5335_s1 }
 0x221   :  { %4676 = vrot.lane.b32.xlu1 %v5811_v63, %s5335_s1  ;;  %4671 = vrot.lane.b32.xlu0 %v5960_v24, %s5330_s9 }
 0x225   :  { %4686 = vrot.lane.b32.xlu1 %v5863_v43, %s5331_s16  ;;  %4681 = vrot.lane.b32.xlu0 %v5960_v24, %s5335_s1 }
 0x229   :  { %4696 = vrot.lane.b32.xlu1 %v5960_v24, %s5331_s16  ;;  %4691 = vrot.lane.b32.xlu0 %v5867_v44, %s5331_s16 }
 0x22d   :  { %4706 = vrot.lane.b32.xlu1 %v5960_v24, %s5336_s28  ;;  %4701 = vrot.lane.b32.xlu0 %v5863_v43, %s5336_s28 }
 0x231   :  { %4716 = vrot.lane.b32.xlu1 %v5867_v44, %s5336_s28  ;;  %4711 = vrot.lane.b32.xlu0 %v5811_v63, %s5332_s23 }
 0x235   :  { %4721 = vrot.lane.b32.xlu1 %v5863_v43, %s5332_s23  ;;  %4731 = vrot.lane.b32.xlu0 %v5960_v24, %s5332_s23 }
 0x239   :  { %4726 = vrot.lane.b32.xlu1 %v5863_v43, %s5337_s29  ;;  %4741 = vrot.lane.b32.xlu0 %v5867_v44, %s5332_s23 }
 0x23d   :  { %4736 = vrot.lane.b32.xlu1 %v5811_v63, %s5331_s16  ;;  %4746 = vrot.lane.b32.xlu0 %v5867_v44, %s5337_s29 }
 0x241   :  { %4751 = vrot.lane.b32.xlu1 %v5811_v63, %s5336_s28  ;;  %4761 = vrot.lane.b32.xlu0 %v5876_v53, %s5330_s9 }
 0x245   :  { %4756 = vrot.lane.b32.xlu1 %v5811_v63, %s5338_s0  ;;  %4771 = vrot.lane.b32.xlu0 %v5876_v53, %s5335_s1 }
 0x249   :  { %4766 = vrot.lane.b32.xlu1 %v5880_v57, %s5330_s9  ;;  %4781 = vrot.lane.b32.xlu0 %v5819_v7, %s5330_s9 }
 0x24d   :  { %4776 = vrot.lane.b32.xlu1 %v5880_v57, %s5335_s1  ;;  %4791 = vrot.lane.b32.xlu0 %v5819_v7, %s5335_s1 }
 0x251   :  { %4786 = vrot.lane.b32.xlu1 %v6012_v26, %s5330_s9  ;;  %4801 = vrot.lane.b32.xlu0 %v5876_v53, %s5331_s16 }
 0x255   :  { %4796 = vrot.lane.b32.xlu1 %v6012_v26, %s5335_s1  ;;  %4816 = vrot.lane.b32.xlu0 %v6012_v26, %s5331_s16 }
 0x259   :  { %4806 = vrot.lane.b32.xlu1 %v5880_v57, %s5331_s16  ;;  %4826 = vrot.lane.b32.xlu0 %v6012_v26, %s5336_s28 }
 0x25b   :  { %v6026_v29 = vpop.permute.xlu1 %4536  ;;  %v6028_v30 = vpop.permute.xlu0 %4531 }
 0x25d   :  { %4811 = vrot.lane.b32.xlu1 %v5819_v7, %s5336_s28  ;;  %4836 = vrot.lane.b32.xlu0 %v5880_v57, %s5336_s28 }
 0x25f   :  { %v6034_v31 = vpop.permute.xlu1 %4546  ;;  %v6036_v32 = vpop.permute.xlu0 %4541 }
 0x261   :  { %4821 = vrot.lane.b32.xlu1 %v5876_v53, %s5336_s28  ;;  %4841 = vrot.lane.b32.xlu0 %v5876_v53, %s5332_s23 }
 0x263   :  { %v6042_v36 = vpop.permute.xlu1 %4556  ;;  %v6044_v37 = vpop.permute.xlu0 %4551 }
 0x265   :  { %4831 = vrot.lane.b32.xlu1 %v5819_v7, %s5332_s23  ;;  %4846 = vrot.lane.b32.xlu0 %v5876_v53, %s5337_s29 }
 0x267   :  { %v6050_v39 = vpop.permute.xlu1 %4566  ;;  %v6052_v40 = vpop.permute.xlu0 %4561 }
 0x269   :  { %4851 = vrot.lane.b32.xlu1 %v6012_v26, %s5332_s23  ;;  %4856 = vrot.lane.b32.xlu0 %v5819_v7, %s5331_s16 }
 0x26b   :  { %v6058_v41 = vpop.permute.xlu1 %4576  ;;  %v6060_v42 = vpop.permute.xlu0 %4571 }
 0x26d   :  { %4861 = vrot.lane.b32.xlu1 %v5880_v57, %s5332_s23  ;;  %4876 = vrot.lane.b32.xlu0 %v5890_v3, %s5330_s9 }
 0x26f   :  { %v6066_v45 = vpop.permute.xlu1 %4586  ;;  %v6068_v47 = vpop.permute.xlu0 %4581 }
 0x271   :  { %4866 = vrot.lane.b32.xlu1 %v5880_v57, %s5337_s29  ;;  %4886 = vrot.lane.b32.xlu0 %v5890_v3, %s5335_s1 }
 0x273   :  { %v6074_v49 = vpop.permute.xlu1 %4596  ;;  %v6076_v51 = vpop.permute.xlu0 %4591 }
 0x275   :  { %4871 = vrot.lane.b32.xlu1 %v5893_v4, %s5330_s9  ;;  %4896 = vrot.lane.b32.xlu0 %v6080_v52, %s5330_s9 }
 0x277   :  { %v6086_v58 = vpop.permute.xlu1 %4611  ;;  %v6088_v60 = vpop.permute.xlu0 %4601 }
 0x279   :  { %4881 = vrot.lane.b32.xlu1 %v5893_v4, %s5335_s1  ;;  %4906 = vrot.lane.b32.xlu0 %v6080_v52, %s5335_s1 }
 0x27b   :  { %v6094_v61 = vpop.permute.xlu1 %4621  ;;  %v6096_v2 = vpop.permute.xlu0 %4606 }
 0x27d   :  { %4891 = vrot.lane.b32.xlu1 %v5827_v15, %s5330_s9  ;;  %4916 = vrot.lane.b32.xlu0 %v5890_v3, %s5331_s16 }
 0x27f   :  { %v6102_v62 = vpop.permute.xlu1 %4626  ;;  %v6104_v6 = vpop.permute.xlu0 %4616 }
 0x281   :  { %4901 = vrot.lane.b32.xlu1 %v5827_v15, %s5335_s1  ;;  %4921 = vrot.lane.b32.xlu0 %v5827_v15, %s5336_s28 }
 0x283   :  { %v6110_v28 = vpop.permute.xlu1 %4636  ;;  %v6112_v27 = vpop.permute.xlu0 %4631 }
 0x284   :  { %7878 = vst [vmem:[#allocation24_spill] sm:$0xff] %v6112_v27 }
 0x285   :  { %4911 = vrot.lane.b32.xlu1 %v5893_v4, %s5331_s16  ;;  %4931 = vrot.lane.b32.xlu0 %v5893_v4, %s5336_s28 }
 0x287   :  { %v6118_v25 = vpop.permute.xlu1 %4646  ;;  %v6120_v23 = vpop.permute.xlu0 %4641 }
 0x288   :  { %7879 = vst [vmem:[#allocation25_spill] sm:$0xff] %v6120_v23 }
 0x289   :  { %4926 = vrot.lane.b32.xlu1 %v6080_v52, %s5331_s16  ;;  %4941 = vrot.lane.b32.xlu0 %v5827_v15, %s5332_s23 }
 0x28b   :  { %v6126_v22 = vpop.permute.xlu1 %4656  ;;  %v4652_v20 = vpop.permute.xlu0 %4651 }
 0x28d   :  { %4936 = vrot.lane.b32.xlu1 %v6080_v52, %s5336_s28  ;;  %4946 = vrot.lane.b32.xlu0 %v5890_v3, %s5336_s28 }
 0x28f   :  { %v6132_v21 = vpop.permute.xlu1 %4666  ;;  %v6134_v12 = vpop.permute.xlu0 %4661 }
 0x291   :  { %4951 = vrot.lane.b32.xlu1 %v5893_v4, %s5332_s23  ;;  %4961 = vrot.lane.b32.xlu0 %v6080_v52, %s5332_s23 }
 0x293   :  { %v6140_v48 = vpop.permute.xlu1 %4676  ;;  %v6142_v55 = vpop.permute.xlu0 %4671 }
 0x295   :  { %4956 = vrot.lane.b32.xlu1 %v5893_v4, %s5337_s29  ;;  %4971 = vrot.lane.b32.xlu0 %v5890_v3, %s5332_s23 }
 0x297   :  { %v6148_v10 = vpop.permute.xlu1 %4686  ;;  %v6150_v56 = vpop.permute.xlu0 %4681 }
 0x299   :  { %4966 = vrot.lane.b32.xlu1 %v5827_v15, %s5331_s16  ;;  %4976 = vrot.lane.b32.xlu0 %v5904_v5, %s5330_s9 }
 0x29b   :  { %v6156_v1 = vpop.permute.xlu1 %4696  ;;  %v6158_v16 = vpop.permute.xlu0 %4691 }
 0x29c   :  { %7880 = vst [vmem:[#allocation26_spill] sm:$0xff] %v6158_v16  ;;  %v2666_v16 = vld [vmem:[%s7771_s3 + $0x18] sm:$0xff] }
 0x29d   :  { %4981 = vrot.lane.b32.xlu1 %v5908_v13, %s5330_s9  ;;  %4986 = vrot.lane.b32.xlu0 %v5904_v5, %s5335_s1 }
 0x29e   :  { %3051 = vmatprep.mubr.f32.mxu1 %v2666_v16 }
 0x29f   :  { %v6164_v50 = vpop.permute.xlu1 %4706  ;;  %v6166_v59 = vpop.permute.xlu0 %4701 }
 0x2a0   :  { %7881 = vst [vmem:[#allocation27_spill] sm:$0xff] %v6164_v50 }
 0x2a1   :  { %4991 = vrot.lane.b32.xlu1 %v5908_v13, %s5335_s1  ;;  %4996 = vrot.lane.b32.xlu0 %v5835_v18, %s5330_s9 }
 0x2a3   :  { %v6172_v9 = vpop.permute.xlu1 %4716  ;;  %v6174_v0 = vpop.permute.xlu0 %4711 }
 0x2a4   :  { %7882 = vst [vmem:[#allocation28_spill] sm:$0xff] %v6172_v9  ;;  %7883 = vst [vmem:[#allocation29_spill] sm:$0xff] %v6174_v0 }
 0x2a5   :  { %5001 = vrot.lane.b32.xlu1 %v6178_v38, %s5330_s9  ;;  %5006 = vrot.lane.b32.xlu0 %v5835_v18, %s5335_s1 }
 0x2a7   :  { %v6184_v46 = vpop.permute.xlu1 %4721  ;;  %v6186_v23 = vpop.permute.xlu0 %4731 }
 0x2a8   :  { %7886 = vst [vmem:[#allocation31_spill] sm:$0xff] %v6184_v46  ;;  %7887 = vst [vmem:[#allocation32_spill] sm:$0xff] %v6186_v23 }
 0x2a9   :  { %5011 = vrot.lane.b32.xlu1 %v6178_v38, %s5335_s1  ;;  %5016 = vrot.lane.b32.xlu0 %v5904_v5, %s5331_s16 }
 0x2ab   :  { %v6192_v19 = vpop.permute.xlu1 %4726  ;;  %v6194_v8 = vpop.permute.xlu0 %4741 }
 0x2ac   :  { %7888 = vst [vmem:[#allocation33_spill] sm:$0xff] %v6192_v19  ;;  %7889 = vst [vmem:[#allocation34_spill] sm:$0xff] %v6194_v8  ;;  %v2664_v8 = vld [vmem:[%s7771_s3 + $0x8] sm:$0xff] }
 0x2ad   :  { %5021 = vrot.lane.b32.xlu1 %v5908_v13, %s5331_s16  ;;  %5031 = vrot.lane.b32.xlu0 %v6178_v38, %s5331_s16 }
 0x2ae   :  { %2971 = vmatprep.mubr.f32.mxu0 %v2664_v8 }
 0x2af   :  { %v6200_v17 = vpop.permute.xlu1 %4736  ;;  %v6202_v14 = vpop.permute.xlu0 %4746 }
 0x2b0   :  { %7890 = vst [vmem:[#allocation35_spill] sm:$0xff] %v6200_v17  ;;  %7891 = vst [vmem:[#allocation36_spill] sm:$0xff] %v6202_v14 }
 0x2b1   :  { %5026 = vrot.lane.b32.xlu1 %v5835_v18, %s5336_s28  ;;  %5041 = vrot.lane.b32.xlu0 %v6178_v38, %s5336_s28 }
 0x2b3   :  { %v6208_v23 = vpop.permute.xlu1 %4751  ;;  %v6210_v19 = vpop.permute.xlu0 %4761 }
 0x2b4   :  { %7892 = vst [vmem:[#allocation37_spill] sm:$0xff] %v6208_v23  ;;  %7893 = vst [vmem:[#allocation38_spill] sm:$0xff] %v6210_v19  ;;  %v4654_v19 = vunpack.i.h.bf16 %v4652_v20  ;;  %v4653_v23 = vunpack.i.l.bf16 %v4652_v20 }
 0x2b5   :  { %5036 = vrot.lane.b32.xlu1 %v5904_v5, %s5336_s28  ;;  %5046 = vrot.lane.b32.xlu0 %v5835_v18, %s5332_s23 }
 0x2b7   :  { %v6219_v14 = vpop.permute.xlu1 %4756  ;;  %v6221_v17 = vpop.permute.xlu0 %4771 }
 0x2b8   :  { %7894 = vst [vmem:[#allocation39_spill] sm:$0xff] %v6219_v14  ;;  %7895 = vst [vmem:[#allocation40_spill] sm:$0xff] %v6221_v17  ;;  %v974_v14 = vsel %vm47_vm0, %v4653_v23, %v4654_v19 }
 0x2b9   :  { %5051 = vrot.lane.b32.xlu1 %v5908_v13, %s5336_s28  ;;  %5056 = vrot.lane.b32.xlu0 %v5904_v5, %s5332_s23 }
 0x2bb   :  { %v4767_v9 = vpop.permute.xlu1 %4766  ;;  %v6227_v8 = vpop.permute.xlu0 %4781 }
 0x2bc   :  { %7896 = vst [vmem:[#allocation41_spill] sm:$0xff] %v6227_v8  ;;  %v4769_v50 = vunpack.i.h.bf16 %v4767_v9  ;;  %v4768_v46 = vunpack.i.l.bf16 %v4767_v9 }
 0x2bd   :  { %5066 = vrot.lane.b32.xlu1 %v6178_v38, %s5332_s23  ;;  %5061 = vrot.lane.b32.xlu0 %v5904_v5, %s5337_s29 }
 0x2be   :  { %v975_v17 = vsel %vm47_vm0, %v4768_v46, %v4769_v50 }
 0x2bf   :  { %v6238_v20 = vpop.permute.xlu1 %4776  ;;  %v6240_v0 = vpop.permute.xlu0 %4791  ;;  %v4325_v8 = vpack.c.bf16 %v975_v17, %v974_v14 }
 0x2c0   :  { %7897 = vst [vmem:[#allocation42_spill] sm:$0xff] %v6238_v20  ;;  %7898 = vst [vmem:[#allocation43_spill] sm:$0xff] %v6240_v0  ;;  %v4554_v0 = vunpack.i.h.bf16 %v6044_v37 }
 0x2c1   :  { %5076 = vrot.lane.b32.xlu1 %v5908_v13, %s5332_s23  ;;  %5071 = vrot.lane.b32.xlu0 %v5835_v18, %s5331_s16  ;;  %s5342_s16 = smov 1  }
 0x2c2   :  { %4326 = vmatprep.subr.bf16.mxu0 %v4325_v8 }
 0x2c3   :  { %4328 = vmatpush3.bf16.msra.mxu0 %v5901_v11  ;;  %v6247_v50 = vpop.permute.xlu1 %4786  ;;  %v6249_v23 = vpop.permute.xlu0 %4801 }
 0x2c4   :  { %7899 = vst [vmem:[#allocation44_spill] sm:$0xff] %v6247_v50  ;;  %7900 = vst [vmem:[#allocation45_spill] sm:$0xff] %v6249_v23  ;;  %v4543_v23 = vunpack.i.l.bf16 %v6036_v32  ;;  %v4559_v50 = vunpack.i.h.bf16 %v6042_v36 }
 0x2c5   :  { %5086 = vrot.lane.b32.xlu1 %v5852_v34, %s5339_s11  ;;  %5081 = vrot.lane.b32.xlu0 %v5904_v5, %s5339_s11 }
 0x2c7   :  { %v6255_v16 = vpop.permute.xlu1 %4796  ;;  %v6257_v17 = vpop.permute.xlu0 %4816 }
 0x2c8   :  { %7901 = vst [vmem:[#allocation46_spill] sm:$0xff] %v6255_v16  ;;  %7902 = vst [vmem:[#allocation47_spill] sm:$0xff] %v6257_v17  ;;  %v4544_v17 = vunpack.i.h.bf16 %v6036_v32  ;;  %v4568_v32 = vunpack.i.l.bf16 %v6050_v39 }
 0x2c9   :  { %5096 = vrot.lane.b32.xlu1 %v5908_v13, %s5337_s29  ;;  %5091 = vrot.lane.b32.xlu0 %v5890_v3, %s5337_s29 }
 0x2cb   :  { %v6263_v46 = vpop.permute.xlu1 %4806  ;;  %v6265_v9 = vpop.permute.xlu0 %4826 }
 0x2cc   :  { %7903 = vst [vmem:[#allocation48_spill] sm:$0xff] %v6263_v46  ;;  %7904 = vst [vmem:[#allocation49_spill] sm:$0xff] %v6265_v9 }
 0x2cd   :  { %5106 = vrot.lane.b32.xlu1 %v5827_v15, %s5338_s0  ;;  %5101 = vrot.lane.b32.xlu0 %v5819_v7, %s5338_s0 }
 0x2cf   :  { %v6271_v11 = vpop.permute.xlu1 %4811  ;;  %v6273_v14 = vpop.permute.xlu0 %4836 }
 0x2d0   :  { %7905 = vst [vmem:[#allocation50_spill] sm:$0xff] %v6271_v11  ;;  %7906 = vst [vmem:[#allocation51_spill] sm:$0xff] %v6273_v14 }
 0x2d1   :  { %5116 = vrot.lane.b32.xlu1 %v5880_v57, %s5339_s11  ;;  %5111 = vrot.lane.b32.xlu0 %v5867_v44, %s5339_s11 }
 0x2d3   :  { %v6279_v19 = vpop.permute.xlu1 %4821  ;;  %v6281_v8 = vpop.permute.xlu0 %4841 }
 0x2d4   :  { %7907 = vst [vmem:[#allocation52_spill] sm:$0xff] %v6279_v19  ;;  %7908 = vst [vmem:[#allocation53_spill] sm:$0xff] %v6281_v8 }
 0x2d5   :  { %5126 = vrot.lane.b32.xlu1 %v5863_v43, %s5338_s0  ;;  %5121 = vrot.lane.b32.xlu0 %v5854_v35, %s5338_s0 }
 0x2d7   :  { %v6287_v9 = vpop.permute.xlu1 %4831  ;;  %v6289_v11 = vpop.permute.xlu0 %4846 }
 0x2d8   :  { %7909 = vst [vmem:[#allocation54_spill] sm:$0xff] %v6287_v9  ;;  %7910 = vst [vmem:[#allocation55_spill] sm:$0xff] %v6289_v11 }
 0x2d9   :  { %5136 = vrot.lane.b32.xlu1 %v5849_v33, %s5338_s0  ;;  %5131 = vrot.lane.b32.xlu0 %v5835_v18, %s5338_s0 }
 0x2db   :  { %v6295_v14 = vpop.permute.xlu1 %4851  ;;  %v6297_v19 = vpop.permute.xlu0 %4856 }
 0x2dc   :  { %7911 = vst [vmem:[#allocation56_spill] sm:$0xff] %v6295_v14  ;;  %7912 = vst [vmem:[#allocation57_spill] sm:$0xff] %v6297_v19 }
 0x2dd   :  { %5146 = vrot.lane.b32.xlu1 %v5908_v13, %s5339_s11  ;;  %5141 = vrot.lane.b32.xlu0 %v5890_v3, %s5339_s11 }
 0x2df   :  { %v6303_v8 = vpop.permute.xlu1 %4861  ;;  %v6305_v9 = vpop.permute.xlu0 %4876 }
 0x2e0   :  { %7913 = vst [vmem:[#allocation58_spill] sm:$0xff] %v6303_v8 }
 0x2e1   :  { %5156 = vrot.lane.b32.xlu1 %v5893_v4, %s5338_s0  ;;  %5151 = vrot.lane.b32.xlu0 %v5876_v53, %s5338_s0  ;;  %v4534_v53 = vunpack.i.h.bf16 %v6028_v30  ;;  %v4533_v4 = vunpack.i.l.bf16 %v6028_v30  ;;  %v4553_v30 = vunpack.i.l.bf16 %v6044_v37 }
 0x2e3   :  { %v6311_v11 = vpop.permute.xlu1 %4866  ;;  %v6313_v14 = vpop.permute.xlu0 %4886  ;;  %v6365_v20 = vsel %vm47_vm0, %v4533_v4, %v4534_v53  ;;  %v4589_v53 = vunpack.i.h.bf16 %v6066_v45  ;;  %v4588_v4 = vunpack.i.l.bf16 %v6066_v45 }
 0x2e4   :  { %7914 = vst [vmem:[#allocation59_spill] sm:$0xff] %v6311_v11  ;;  %7915 = vst [vmem:[#allocation60_spill] sm:$0xff] %v6313_v14  ;;  %v4538_v14 = vunpack.i.l.bf16 %v6026_v29 }
 0x2e5   :  { %5166 = vrot.lane.b32.xlu1 %v6012_v26, %s5338_s0  ;;  %5161 = vrot.lane.b32.xlu0 %v5960_v24, %s5338_s0 }
 0x2e7   :  { %v6319_v19 = vpop.permute.xlu1 %4871  ;;  %v6321_v8 = vpop.permute.xlu0 %4896 }
 0x2e8   :  { %7916 = vst [vmem:[#allocation61_spill] sm:$0xff] %v6319_v19  ;;  %7917 = vst [vmem:[#allocation62_spill] sm:$0xff] %v6321_v8  ;;  %v4539_v19 = vunpack.i.h.bf16 %v6026_v29  ;;  %v4558_v29 = vunpack.i.l.bf16 %v6042_v36  ;;  %v4569_v8 = vunpack.i.h.bf16 %v6050_v39  ;;  %v4579_v36 = vunpack.i.h.bf16 %v6058_v41 }
 0x2e9   :  { %5176 = vrot.lane.b32.xlu1 %v5811_v63, %s5337_s29  ;;  %5171 = vrot.lane.b32.xlu0 %v5803_v54, %s5337_s29 }
 0x2ea   :  { %v6362_v37 = vsel %vm47_vm0, %v4538_v14, %v4539_v19  ;;  %v4584_v19 = vunpack.i.h.bf16 %v6068_v47  ;;  %v6400_v45 = vsel %vm1028_vm5, %v4568_v32, %v4569_v8  ;;  %v4603_v8 = vunpack.i.l.bf16 %v6088_v60 }
 0x2eb   :  { %v6327_v46 = vpop.permute.xlu1 %4881  ;;  %v6329_v11 = vpop.permute.xlu0 %4906 }
 0x2ec   :  { %7918 = vst [vmem:[#allocation63_spill] sm:$0xff] %v6327_v46  ;;  %7919 = vst [vmem:[#allocation64_spill] sm:$0xff] %v6329_v11  ;;  %v4574_v46 = vunpack.i.h.bf16 %v6060_v42 }
 0x2ed   :  { %5186 = vrot.lane.b32.xlu1 %v5852_v34, %s5338_s0  ;;  %5181 = vrot.lane.b32.xlu0 %v5904_v5, %s5338_s0  ;;  %v4549_v34 = vunpack.i.h.bf16 %v6034_v31  ;;  %v4548_v5 = vunpack.i.l.bf16 %v6034_v31  ;;  %v4564_v31 = vunpack.i.h.bf16 %v6052_v40 }
 0x2ef   :  { %v6341_v11 = vpop.permute.xlu1 %4891  ;;  %v6343_v16 = vpop.permute.xlu0 %4916  ;;  %v6380_v14 = vsel %vm1028_vm5, %v4548_v5, %v4549_v34  ;;  %v4594_v34 = vunpack.i.h.bf16 %v6076_v51  ;;  %v4593_v5 = vunpack.i.l.bf16 %v6076_v51 }
 0x2f0   :  { %7920 = vst [vmem:[#allocation65_spill] sm:$0xff] %v6341_v11  ;;  %7921 = vst [vmem:[#allocation66_spill] sm:$0xff] %v6343_v16  ;;  %v4563_v16 = vunpack.i.l.bf16 %v6052_v40  ;;  %v4578_v11 = vunpack.i.l.bf16 %v6058_v41  ;;  %v6375_v40 = vsel %vm47_vm0, %v4558_v29, %v4559_v50  ;;  %v4573_v41 = vunpack.i.l.bf16 %v6060_v42 }
 0x2f1   :  { %5196 = vrot.lane.b32.xlu1 %v6178_v38, %s5338_s0  ;;  %5191 = vrot.lane.b32.xlu0 %v6080_v52, %s5338_s0  ;;  %v6372_v52 = vsel %vm1028_vm5, %v4543_v23, %v4544_v17  ;;  %v6391_v50 = vsel %vm47_vm0, %v4553_v30, %v4554_v0  ;;  %v4598_v17 = vunpack.i.l.bf16 %v6074_v49  ;;  %v4604_v30 = vunpack.i.h.bf16 %v6088_v60 }
 0x2f2   :  { %v6394_v42 = vsel %vm215_vm1, %v4578_v11, %v4579_v36  ;;  %v6397_v23 = vsel %vm1028_vm5, %v4563_v16, %v4564_v31  ;;  %v4614_v11 = vunpack.i.h.bf16 %v6086_v58  ;;  %v4613_v16 = vunpack.i.l.bf16 %v6086_v58 }
 0x2f3   :  { %v6367_v39 = vpop.permute.xlu1 %4901  ;;  %v6369_v38 = vpop.permute.xlu0 %4921  ;;  %v6425_v51 = vsel %vm215_vm1, %v4573_v41, %v4574_v46  ;;  %v4624_v58 = vunpack.i.h.bf16 %v6094_v61  ;;  %v4623_v60 = vunpack.i.l.bf16 %v6094_v61  ;;  %v4608_v31 = vunpack.i.l.bf16 %v6096_v2 }
 0x2f4   :  { %7922 = vst [vmem:[#allocation67_spill] sm:$0xff] %v6369_v38  ;;  %v4583_v38 = vunpack.i.l.bf16 %v6068_v47  ;;  %v4599_v47 = vunpack.i.h.bf16 %v6074_v49  ;;  %v6422_v49 = vsel %vm1599_vm6, %v4588_v4, %v4589_v53  ;;  %v4648_v36 = vunpack.i.l.bf16 %v6118_v25 }
 0x2f5   :  { %5206 = vrot.lane.b32.xlu1 %v5827_v15, %s5337_s29  ;;  %5201 = vrot.lane.b32.xlu0 %v5819_v7, %s5337_s29  ;;  %v4658_v53 = vunpack.i.l.bf16 %v6126_v22  ;;  %v6443_v61 = vsel %vm227_vm2, %v4613_v16, %v4614_v11 }
 0x2f6   :  { %v6415_v32 = vsel %vm227_vm2, %v4583_v38, %v4584_v19  ;;  %v4609_v38 = vunpack.i.h.bf16 %v6096_v2  ;;  %v6440_v41 = vsel %vm227_vm2, %v4598_v17, %v4599_v47  ;;  %7927 = vst [vmem:[#allocation72_spill] sm:$0xff] %v6443_v61  ;;  %v6446_v2 = vsel %vm1599_vm6, %v4603_v8, %v4604_v30  ;;  %v7943_v61 = vld [vmem:[#allocation27_spill] sm:$0xff] }
 0x2f7   :  { %v6406_v29 = vpop.permute.xlu1 %4911  ;;  %v6408_v0 = vpop.permute.xlu0 %4931  ;;  %7923 = vst [vmem:[#allocation68_spill] sm:$0xff] %v6415_v32  ;;  %7926 = vst [vmem:[#allocation71_spill] sm:$0xff] %v6440_v41  ;;  %v6449_v19 = vsel %vm1599_vm6, %v4593_v5, %v4594_v34  ;;  %v4639_v47 = vunpack.i.h.bf16 %v6110_v28  ;;  %v4638_v17 = vunpack.i.l.bf16 %v6110_v28  ;;  %v4669_v34 = vunpack.i.h.bf16 %v6132_v21  ;;  %v7958_v41 = vld [vmem:[#allocation38_spill] sm:$0xff] }
 0x2f8   :  { %7928 = vst [vmem:[#allocation73_spill] sm:$0xff] %v6449_v19  ;;  %v4668_v5 = vunpack.i.l.bf16 %v6132_v21  ;;  %v6477_v16 = vsel %vm2040_vm7, %v4608_v31, %v4609_v38  ;;  %v4679_v28 = vunpack.i.h.bf16 %v6140_v48  ;;  %v4678_v21 = vunpack.i.l.bf16 %v6140_v48 }
 0x2f9   :  { %5216 = vrot.lane.b32.xlu1 %v5880_v57, %s5338_s0  ;;  %5211 = vrot.lane.b32.xlu0 %v5867_v44, %s5338_s0  ;;  %v4649_v57 = vunpack.i.h.bf16 %v6118_v25  ;;  %v4659_v44 = vunpack.i.h.bf16 %v6126_v22  ;;  %v4629_v25 = vunpack.i.h.bf16 %v6102_v62  ;;  %v4628_v22 = vunpack.i.l.bf16 %v6102_v62  ;;  %7932 = vst [vmem:[#allocation77_spill] sm:$0xff] %v6477_v16 }
 0x2fa   :  { %v6464_v62 = vsel %vm227_vm2, %v4623_v60, %v4624_v58  ;;  %v4689_v30 = vunpack.i.h.bf16 %v6148_v10  ;;  %v4688_v8 = vunpack.i.l.bf16 %v6148_v10  ;;  %v4664_v58 = vunpack.i.h.bf16 %v6134_v12 }
 0x2fb   :  { %v6435_v4 = vpop.permute.xlu1 %4926  ;;  %v6437_v46 = vpop.permute.xlu0 %4941  ;;  %7929 = vst [vmem:[#allocation74_spill] sm:$0xff] %v6464_v62  ;;  %v6467_v11 = vsel %vm47_vm0, %v4648_v36, %v4649_v57  ;;  %v4663_v60 = vunpack.i.l.bf16 %v6134_v12  ;;  %v4674_v57 = vunpack.i.h.bf16 %v6142_v55  ;;  %v4673_v36 = vunpack.i.l.bf16 %v6142_v55 }
 0x2fc   :  { %7924 = vst [vmem:[#allocation69_spill] sm:$0xff] %v6435_v4  ;;  %7925 = vst [vmem:[#allocation70_spill] sm:$0xff] %v6437_v46  ;;  %v4619_v4 = vunpack.i.h.bf16 %v6104_v6  ;;  %v4618_v46 = vunpack.i.l.bf16 %v6104_v6  ;;  %v6492_v48 = vsel %vm47_vm0, %v4668_v5, %v4669_v34  ;;  %v6498_v10 = vsel %vm215_vm1, %v4638_v17, %v4639_v47 }
 0x2fd   :  { %5226 = vrot.lane.b32.xlu1 %v5811_v63, %s5339_s11  ;;  %5221 = vrot.lane.b32.xlu0 %v5803_v54, %s5339_s11  ;;  %v6474_v54 = vsel %vm1028_vm5, %v4658_v53, %v4659_v44  ;;  %7934 = vst [vmem:[#allocation79_spill] sm:$0xff] %v6498_v10  ;;  %v6501_v12 = vsel %vm2040_vm7, %v4628_v22, %v4629_v25  ;;  %v4684_v55 = vunpack.i.h.bf16 %v6150_v56  ;;  %v4683_v31 = vunpack.i.l.bf16 %v6150_v56 }
 0x2fe   :  { %v6495_v38 = vsel %vm215_vm1, %v4618_v46, %v4619_v4  ;;  %7935 = vst [vmem:[#allocation80_spill] sm:$0xff] %v6501_v12  ;;  %v4699_v46 = vunpack.i.h.bf16 %v6156_v1  ;;  %v4698_v47 = vunpack.i.l.bf16 %v6156_v1  ;;  %v6516_v25 = vsel %vm1028_vm5, %v4678_v21, %v4679_v28  ;;  %v7942_v1 = vld [vmem:[#allocation31_spill] sm:$0xff] }
 0x2ff   :  { %v6469_v6 = vpop.permute.xlu1 %4936  ;;  %v6471_v63 = vpop.permute.xlu0 %4946  ;;  %7933 = vst [vmem:[#allocation78_spill] sm:$0xff] %v6495_v38  ;;  %v6519_v22 = vsel %vm215_vm1, %v4688_v8, %v4689_v30  ;;  %v6523_v17 = vsel %vm47_vm0, %v4673_v36, %v4674_v57  ;;  %v6530_v5 = vsel %vm1028_vm5, %v4663_v60, %v4664_v58  ;;  %v4704_v28 = vunpack.i.h.bf16 %v6166_v59  ;;  %v7938_v30 = vld [vmem:[#allocation29_spill] sm:$0xff]  ;;  %v7939_v36 = vld [vmem:[#allocation26_spill] sm:$0xff] }
 0x300   :  { %7930 = vst [vmem:[#allocation75_spill] sm:$0xff] %v6469_v6  ;;  %7931 = vst [vmem:[#allocation76_spill] sm:$0xff] %v6471_v63  ;;  %v4703_v21 = vunpack.i.l.bf16 %v6166_v59  ;;  %v4714_v8 = vunpack.i.h.bf16 %v7938_v30  ;;  %v4713_v57 = vunpack.i.l.bf16 %v7938_v30  ;;  %v4694_v56 = vunpack.i.h.bf16 %v7939_v36  ;;  %v7971_v38 = vld [vmem:[#allocation30_spill] sm:$0xff] }
 0x301   :  { %5236 = vrot.lane.b32.xlu1 %v5849_v33, %s5337_s29  ;;  %5231 = vrot.lane.b32.xlu0 %v5835_v18, %s5337_s29  ;;  %v6546_v58 = vsel %vm1028_vm5, %v4683_v31, %v4684_v55  ;;  %v6551_v59 = vsel %vm215_vm1, %v4698_v47, %v4699_v46  ;;  %v4693_v30 = vunpack.i.l.bf16 %v7939_v36  ;;  %v4724_v34 = vunpack.i.h.bf16 %v7942_v1  ;;  %v7946_v46 = vld [vmem:[#allocation32_spill] sm:$0xff] }
 0x302   :  { %v4723_v12 = vunpack.i.l.bf16 %v7942_v1  ;;  %v4709_v10 = vunpack.i.h.bf16 %v7943_v61  ;;  %v6565_v31 = vsel %vm227_vm2, %v4713_v57, %v4714_v8  ;;  %v4734_v47 = vunpack.i.h.bf16 %v7946_v46 }
 0x303   :  { %v6505_v44 = vpop.permute.xlu1 %4951  ;;  %v6507_v53 = vpop.permute.xlu0 %4961  ;;  %7945 = vst [vmem:[#allocation31_spill] sm:$0xff] %v6565_v31  ;;  %v4733_v1 = vunpack.i.l.bf16 %v7946_v46  ;;  %v6570_v36 = vsel %vm1599_vm6, %v4703_v21, %v4704_v28  ;;  %v6581_v8 = vsel %vm215_vm1, %v4693_v30, %v4694_v56  ;;  %v7951_v28 = vld [vmem:[#allocation35_spill] sm:$0xff]  ;;  %v4879_v30 = vunpack.i.h.bf16 %v6305_v9 }
 0x304   :  { %7936 = vst [vmem:[#allocation81_spill] sm:$0xff] %v6505_v44  ;;  %7937 = vst [vmem:[#allocation82_spill] sm:$0xff] %v6507_v53  ;;  %v4708_v53 = vunpack.i.l.bf16 %v7943_v61  ;;  %v7947_v61 = vld [vmem:[#allocation33_spill] sm:$0xff]  ;;  %v6584_v57 = vsel %vm227_vm2, %v4723_v12, %v4724_v34  ;;  %v4739_v21 = vunpack.i.h.bf16 %v7951_v28  ;;  %v4738_v46 = vunpack.i.l.bf16 %v7951_v28 }
 0x305   :  { %5246 = vrot.lane.b32.xlu1 %v5908_v13, %s5338_s0  ;;  %5241 = vrot.lane.b32.xlu0 %v5890_v3, %s5338_s0  ;;  %v7944_v3 = vld [vmem:[#allocation28_spill] sm:$0xff]  ;;  %v4729_v60 = vunpack.i.h.bf16 %v7947_v61  ;;  %v6602_v34 = vsel %vm227_vm2, %v4733_v1, %v4734_v47  ;;  %v4878_v28 = vunpack.i.l.bf16 %v6305_v9  ;;  %v4764_v31 = vunpack.i.h.bf16 %v7958_v41 }
 0x306   :  { %v4719_v62 = vunpack.i.h.bf16 %v7944_v3  ;;  %v4718_v55 = vunpack.i.l.bf16 %v7944_v3  ;;  %v4728_v3 = vunpack.i.l.bf16 %v7947_v61  ;;  %7950 = vst [vmem:[#allocation28_spill] sm:$0xff] %v6584_v57  ;;  %v6599_v12 = vsel %vm1599_vm6, %v4708_v53, %v4709_v10  ;;  %7952 = vst [vmem:[#allocation32_spill] sm:$0xff] %v6602_v34  ;;  %v7961_v57 = vld [vmem:[#allocation42_spill] sm:$0xff] }
 0x307   :  { %v6539_v13 = vpop.permute.xlu1 %4956  ;;  %v6541_v4 = vpop.permute.xlu0 %4971  ;;  %v6621_v61 = vsel %vm215_vm1, %v4738_v46, %v4739_v21  ;;  %v976_v21 = vsel %vm47_vm0, %v4878_v28, %v4879_v30  ;;  %v4779_v6 = vunpack.i.h.bf16 %v7961_v57  ;;  %v7967_v30 = vld [vmem:[#allocation21_spill] sm:$0xff] }
 0x308   :  { %7940 = vst [vmem:[#allocation29_spill] sm:$0xff] %v6539_v13  ;;  %7941 = vst [vmem:[#allocation26_spill] sm:$0xff] %v6541_v4  ;;  %v7948_v4 = vld [vmem:[#allocation34_spill] sm:$0xff]  ;;  %v6596_v56 = vsel %vm1599_vm6, %v4718_v55, %v4719_v62  ;;  %v6617_v53 = vsel %vm2040_vm7, %v4728_v3, %v4729_v60  ;;  %v7959_v60 = vld [vmem:[#allocation40_spill] sm:$0xff] }
 0x309   :  { %5256 = vrot.lane.b32.xlu1 %v5827_v15, %s5339_s11  ;;  %5251 = vrot.lane.b32.xlu0 %v5819_v7, %s5339_s11  ;;  %v4744_v13 = vunpack.i.h.bf16 %v7948_v4  ;;  %v4743_v15 = vunpack.i.l.bf16 %v7948_v4  ;;  %v7954_v4 = vld [vmem:[#allocation36_spill] sm:$0xff]  ;;  %7955 = vst [vmem:[#allocation34_spill] sm:$0xff] %v6617_v53  ;;  %7956 = vst [vmem:[#allocation35_spill] sm:$0xff] %v6621_v61  ;;  %v4774_v3 = vunpack.i.h.bf16 %v7959_v60 }
 0x30a   :  { %v4748_v47 = vunpack.i.l.bf16 %v7954_v4 }
 0x30b   :  { %v6576_v19 = vpop.permute.xlu1 %4966  ;;  %v6578_v7 = vpop.permute.xlu0 %4976  ;;  %v6609_v27 = vsel %vm227_vm2, %v4743_v15, %v4744_v13  ;;  %v7957_v13 = vld [vmem:[#allocation37_spill] sm:$0xff] }
 0x30c   :  { %7949 = vst [vmem:[#allocation27_spill] sm:$0xff] %v6576_v19  ;;  %7953 = vst [vmem:[#allocation33_spill] sm:$0xff] %v6609_v27  ;;  %v4749_v19 = vunpack.i.h.bf16 %v7954_v4  ;;  %v4754_v15 = vunpack.i.h.bf16 %v7957_v13  ;;  %v4753_v34 = vunpack.i.l.bf16 %v7957_v13  ;;  %v4763_v27 = vunpack.i.l.bf16 %v7958_v41 }
 0x30d   :  { %5266 = vrot.lane.b32.xlu1 %v6012_v26, %s5337_s29  ;;  %5261 = vrot.lane.b32.xlu0 %v5960_v24, %s5337_s29  ;;  %v4773_v4 = vunpack.i.l.bf16 %v7959_v60  ;;  %v4778_v60 = vunpack.i.l.bf16 %v7961_v57  ;;  %v7965_v57 = vld [vmem:[#allocation41_spill] sm:$0xff] }
 0x30e   :  { %v6648_v28 = vsel %vm2040_vm7, %v4748_v47, %v4749_v19  ;;  %v4783_v19 = vunpack.i.l.bf16 %v7965_v57  ;;  %v7966_v47 = vld [vmem:[#allocation43_spill] sm:$0xff] }
 0x30f   :  { %v4982_v62 = vpop.permute.xlu1 %4981  ;;  %v6612_v55 = vpop.permute.xlu0 %4986  ;;  %7962 = vst [vmem:[#allocation36_spill] sm:$0xff] %v6648_v28  ;;  %v7968_v28 = vld [vmem:[#allocation44_spill] sm:$0xff] }
 0x310   :  { %v4984_v9 = vunpack.i.h.bf16 %v4982_v62  ;;  %v4983_v1 = vunpack.i.l.bf16 %v4982_v62  ;;  %v7960_v62 = vld [vmem:[#allocation63_spill] sm:$0xff] }
 0x311   :  { %5276 = vrot.lane.b32.xlu1 %v5863_v43, %s5339_s11  ;;  %5271 = vrot.lane.b32.xlu0 %v5854_v35, %s5339_s11  ;;  %v4884_v13 = vunpack.i.h.bf16 %v7960_v62  ;;  %v4883_v10 = vunpack.i.l.bf16 %v7960_v62  ;;  %v4784_v35 = vunpack.i.h.bf16 %v7965_v57  ;;  %v4789_v57 = vunpack.i.h.bf16 %v7968_v28 }
 0x312   :  { %v977_v46 = vsel %vm47_vm0, %v4983_v1, %v4984_v9  ;;  %v6651_v9 = vsel %vm1599_vm6, %v4753_v34, %v4754_v15  ;;  %v6654_v1 = vsel %vm47_vm0, %v4763_v27, %v4764_v31  ;;  %v4794_v34 = vunpack.i.h.bf16 %v7966_v47 }
 0x313   :  { %v6637_v32 = vpop.permute.xlu1 %4991  ;;  %v6639_v41 = vpop.permute.xlu0 %4996  ;;  %v4329_v43 = vpack.c.bf16 %v977_v46, %v976_v21  ;;  %7963 = vst [vmem:[#allocation37_spill] sm:$0xff] %v6651_v9  ;;  %v7964_v21 = vld [vmem:[#allocation62_spill] sm:$0xff]  ;;  %v1031_v27 = vsel %vm1028_vm5, %v4773_v4, %v4774_v3  ;;  %v4793_v31 = vunpack.i.l.bf16 %v7966_v47  ;;  %v4989_v15 = vunpack.i.h.bf16 %v6612_v55 }
 0x314   :  { %v4899_v46 = vunpack.i.h.bf16 %v7964_v21  ;;  %v4898_v62 = vunpack.i.l.bf16 %v7964_v21  ;;  %v4988_v21 = vunpack.i.l.bf16 %v6612_v55  ;;  %v7969_v3 = vpack.c.bf16 %v6474_v54, %v6372_v52 }
 0x315   :  { %5286 = vrot.lane.b32.xlu1 %v5849_v33, %s5339_s11  ;;  %5281 = vrot.lane.b32.xlu0 %v5835_v18, %s5339_s11  ;;  %v1032_v18 = vsel %vm1028_vm5, %v4883_v10, %v4884_v13  ;;  %v6678_v4 = vsel %vm1028_vm5, %v4778_v60, %v4779_v6  ;;  %v4788_v55 = vunpack.i.l.bf16 %v7968_v28  ;;  %v7972_v10 = vld [vmem:[#allocation23_spill] sm:$0xff]  ;;  %v4904_v52 = vunpack.i.h.bf16 %v6367_v39 }
 0x316   :  { %4330 = vmatprep.subr.bf16.mxu0 %v4329_v43  ;;  %v7970_v43 = vld [vmem:[#allocation46_spill] sm:$0xff]  ;;  %v1217_v13 = vsel %vm47_vm0, %v4898_v62, %v4899_v46  ;;  %v4903_v54 = vunpack.i.l.bf16 %v6367_v39  ;;  %v4337_v6 = vpack.c.bf16 %v1032_v18, %v1031_v27  ;;  %v6692_v28 = vsel %vm47_vm0, %v4783_v19, %v4784_v35  ;;  %v7974_v62 = vld [vmem:[#allocation45_spill] sm:$0xff]  ;;  %v7975_v27 = vld [vmem:[#allocation47_spill] sm:$0xff] }
 0x317   :  { %4332 = vmatpush3.bf16.msra.mxu0 %v7967_v30  ;;  %v5002_v33 = vpop.permute.xlu1 %5001  ;;  %v6670_v9 = vpop.permute.xlu0 %5006  ;;  %v4799_v30 = vunpack.i.h.bf16 %v7970_v43  ;;  %v4798_v47 = vunpack.i.l.bf16 %v7970_v43  ;;  %v1033_v44 = vsel %vm1028_vm5, %v4988_v21, %v4989_v15  ;;  %v1271_v46 = vsel %vm1028_vm5, %v4793_v31, %v4794_v34  ;;  %v7976_v35 = vld [vmem:[#allocation25_spill] sm:$0xff]  ;;  %v7979_v21 = vld [vmem:[#allocation48_spill] sm:$0xff] }
 0x318   :  { %v5004_v16 = vunpack.i.h.bf16 %v5002_v33  ;;  %v5003_v53 = vunpack.i.l.bf16 %v5002_v33  ;;  %4334 = vmatprep.subr.bf16.mxu0 %v7969_v3  ;;  %v7973_v33 = vld [vmem:[#allocation22_spill] sm:$0xff]  ;;  %v4804_v63 = vunpack.i.h.bf16 %v7974_v62  ;;  %v4803_v39 = vunpack.i.l.bf16 %v7974_v62  ;;  %v7978_v15 = vld [vmem:[#allocation17_spill] sm:$0xff] }
 0x319   :  { %5296 = vrot.lane.b32.xlu1 %v7971_v38, %s5337_s29  ;;  %5291 = vrot.lane.b32.xlu0 %v7972_v10, %s5337_s29  ;;  %v6707_v18 = vsel %vm47_vm0, %v4788_v55, %v4789_v57  ;;  %v4345_v34 = vpack.c.bf16 %v6678_v4, %v6530_v5  ;;  %v6716_v31 = vsel %vm1028_vm5, %v4798_v47, %v4799_v30  ;;  %v4993_v62 = vunpack.i.l.bf16 %v6637_v32  ;;  %v7980_v4 = vld [vmem:[#allocation16_spill] sm:$0xff]  ;;  %v7981_v30 = vld [vmem:[#allocation15_spill] sm:$0xff] }
 0x31a   :  { %v1218_v60 = vsel %vm47_vm0, %v5003_v53, %v5004_v16  ;;  %v4819_v16 = vunpack.i.h.bf16 %v7975_v27  ;;  %v4818_v53 = vunpack.i.l.bf16 %v7975_v27  ;;  %v4341_v57 = vpack.c.bf16 %v6380_v14, %v1033_v44 }
 0x31b   :  { %4336 = vmatpush3.bf16.msra.mxu0 %v7973_v33  ;;  %v6695_v3 = vpop.permute.xlu1 %5011  ;;  %v6697_v43 = vpop.permute.xlu0 %5016  ;;  %v4357_v61 = vpack.c.bf16 %v1218_v60, %v1217_v13  ;;  %v7977_v13 = vld [vmem:[#allocation19_spill] sm:$0xff]  ;;  %v4809_v60 = vunpack.i.h.bf16 %v7979_v21  ;;  %v1272_v55 = vsel %vm1028_vm5, %v4903_v54, %v4904_v52  ;;  %v4994_v33 = vunpack.i.h.bf16 %v6637_v32  ;;  %v7986_v32 = vld [vmem:[#allocation49_spill] sm:$0xff] }
 0x31c   :  { %4338 = vmatprep.subr.bf16.mxu0 %v4337_v6  ;;  %v4808_v6 = vunpack.i.l.bf16 %v7979_v21  ;;  %v5009_v27 = vunpack.i.h.bf16 %v6670_v9  ;;  %v5008_v5 = vunpack.i.l.bf16 %v6670_v9  ;;  %v7982_v47 = vpack.c.bf16 %v7980_v4, %v7981_v30  ;;  %v7988_v30 = vld [vmem:[#allocation60_spill] sm:$0xff] }
 0x31d   :  { %5306 = vrot.lane.b32.xlu1 %v7977_v13, %s5339_s11  ;;  %5301 = vrot.lane.b32.xlu0 %v7978_v15, %s5339_s11  ;;  %v7983_v13 = vld [vmem:[#allocation11_spill] sm:$0xff]  ;;  %v7984_v15 = vld [vmem:[#allocation9_spill] sm:$0xff]  ;;  %v6737_v44 = vsel %vm215_vm1, %v4818_v53, %v4819_v16  ;;  %v4829_v52 = vunpack.i.h.bf16 %v7986_v32  ;;  %v4828_v54 = vunpack.i.l.bf16 %v7986_v32  ;;  %v7987_v9 = vpack.c.bf16 %v6516_v25, %v6397_v23 }
 0x31e   :  { %4358 = vmatprep.subr.bf16.mxu1 %v4357_v61  ;;  %v7985_v21 = vpack.c.bf16 %v7983_v13, %v7984_v15  ;;  %v6745_v4 = vsel %vm215_vm1, %v4803_v39, %v4804_v63  ;;  %v4888_v13 = vunpack.i.l.bf16 %v7988_v30  ;;  %v7989_v15 = vld [vmem:[#allocation61_spill] sm:$0xff]  ;;  %v6756_v23 = vsel %vm215_vm1, %v4808_v6, %v4809_v60  ;;  %v7990_v53 = vld [vmem:[#allocation51_spill] sm:$0xff]  ;;  %v7997_v39 = vld [vmem:[#allocation50_spill] sm:$0xff] }
 0x31f   :  { %4340 = vmatpush3.bf16.msra.mxu0 %v7982_v47  ;;  %v6732_v61 = vpop.permute.xlu1 %5021  ;;  %v6734_v14 = vpop.permute.xlu0 %5031  ;;  %v4889_v47 = vunpack.i.h.bf16 %v7988_v30  ;;  %v4873_v16 = vunpack.i.l.bf16 %v7989_v15  ;;  %v4365_v25 = vpack.c.bf16 %v1272_v55, %v1271_v46  ;;  %v4838_v32 = vunpack.i.l.bf16 %v7990_v53  ;;  %v7992_v30 = vld [vmem:[#allocation18_spill] sm:$0xff] }
 0x320   :  { %4360 = vmatpush3.bf16.msra.mxu1 %v7985_v21  ;;  %4342 = vmatprep.subr.bf16.mxu0 %v4341_v57  ;;  %v4874_v21 = vunpack.i.h.bf16 %v7989_v15  ;;  %v4839_v57 = vunpack.i.h.bf16 %v7990_v53  ;;  %v7994_v15 = vld [vmem:[#allocation6_spill] sm:$0xff]  ;;  %v1088_v6 = vsel %vm1028_vm5, %v4993_v62, %v4994_v33  ;;  %v1273_v55 = vsel %vm1028_vm5, %v5008_v5, %v5009_v27 }
 0x321   :  { %4362 = vmatprep.subr.bf16.mxu1 %v7987_v9  ;;  %5316 = vrot.lane.b32.xlu1 %v6012_v26, %s5339_s11  ;;  %v7991_v9 = vld [vmem:[#allocation20_spill] sm:$0xff]  ;;  %v4814_v63 = vunpack.i.h.bf16 %v7997_v39  ;;  %v4813_v53 = vunpack.i.l.bf16 %v7997_v39  ;;  %v1087_v33 = vsel %vm1028_vm5, %v4888_v13, %v4889_v47  ;;  %v4979_v62 = vunpack.i.h.bf16 %v6578_v7 }
 0x322   :  { %5311 = vrot.lane.b32.xlu0 %v5960_v24, %s5339_s11  ;;  %v7993_v26 = vpack.c.bf16 %v7991_v9, %v7992_v30  ;;  %v7995_v24 = vld [vmem:[#allocation13_spill] sm:$0xff]  ;;  %v6781_v30 = vsel %vm1599_vm6, %v4828_v54, %v4829_v52  ;;  %v4978_v27 = vunpack.i.l.bf16 %v6578_v7  ;;  %v4349_v5 = vpack.c.bf16 %v1088_v6, %v1087_v33  ;;  %v2880_v54 = vld [vmem:[%s7772_s4 + $0x8] sm:$0xff] }
 0x323   :  { %v7996_v19 = vpack.c.bf16 %v7994_v15, %v7995_v24  ;;  %v6770_v60 = vpop.permute.xlu1 %5026  ;;  %v6772_v46 = vpop.permute.xlu0 %5041  ;;  %v4369_v52 = vpack.c.bf16 %v6400_v45, %v1273_v55  ;;  %v5013_v47 = vunpack.i.l.bf16 %v6695_v3  ;;  %v7998_v13 = vpack.c.bf16 %v6467_v11, %v6365_v20  ;;  %v7999_v7 = vld [vmem:[#allocation10_spill] sm:$0xff]  ;;  %v8002_v24 = vld [vmem:[#allocation53_spill] sm:$0xff]  ;;  %v8003_v55 = vld [vmem:[#allocation64_spill] sm:$0xff] }
 0x324   :  { %4344 = vmatpush3.bf16.msra.mxu0 %v7993_v26  ;;  %v921_v26 = vsel %vm47_vm0, %v4873_v16, %v4874_v21  ;;  %v8000_v21 = vld [vmem:[#allocation8_spill] sm:$0xff]  ;;  %v6814_v39 = vsel %vm1599_vm6, %v4838_v32, %v4839_v57  ;;  %v4843_v6 = vunpack.i.l.bf16 %v8002_v24  ;;  %v6822_v11 = vsel %vm1599_vm6, %v4813_v53, %v4814_v63  ;;  %v8004_v57 = vld [vmem:[#allocation65_spill] sm:$0xff]  ;;  %v8009_v15 = vld [vmem:[#allocation54_spill] sm:$0xff] }
 0x325   :  { %4364 = vmatpush3.bf16.msra.mxu1 %v7996_v19  ;;  %4346 = vmatprep.subr.bf16.mxu0 %v4345_v34  ;;  %v8001_v16 = vpack.c.bf16 %v7999_v7, %v8000_v21  ;;  %v4351_v20 = vpack.c.bf16 %v921_v26, %v6654_v1  ;;  %v4909_v33 = vunpack.i.h.bf16 %v8003_v55  ;;  %v4894_v32 = vunpack.i.h.bf16 %v8004_v57  ;;  %v2881_v1 = vld [vmem:[%s7772_s4 + $0x10] sm:$0xf]  ;;  %v8005_v53 = vld [vmem:[#allocation52_spill] sm:$0xff]  ;;  %v8011_v63 = vld [vmem:[#allocation5_spill] sm:$0xff] }
 0x326   :  { %4366 = vmatprep.subr.bf16.mxu1 %v4365_v25  ;;  %5326 = vrot.lane.b32.xlu1 %v7971_v38, %s5339_s11  ;;  %v2879_v38 = vld [vmem:[%s7772_s4] sm:$0xff]  ;;  %v4893_v7 = vunpack.i.l.bf16 %v8004_v57  ;;  %v922_v21 = vsel %vm47_vm0, %v4978_v27, %v4979_v62  ;;  %v4824_v26 = vunpack.i.h.bf16 %v8005_v53  ;;  %v8007_v62 = vld [vmem:[#allocation12_spill] sm:$0xff]  ;;  %v4823_v57 = vunpack.i.l.bf16 %v8005_v53 }
 0x327   :  { %5321 = vrot.lane.b32.xlu0 %v7972_v10, %s5339_s11  ;;  %v5014_v10 = vunpack.i.h.bf16 %v6695_v3  ;;  %v6809_v45 = vpop.permute.xlu1 %5036  ;;  %v6811_v25 = vpop.permute.xlu0 %5046  ;;  %v4844_v3 = vunpack.i.h.bf16 %v8002_v24  ;;  %v4834_v9 = vunpack.i.h.bf16 %v8009_v15  ;;  %v4913_v53 = vunpack.i.l.bf16 %v6406_v29 }
 0x328   :  { %4348 = vmatpush3.bf16.msra.mxu0 %v7998_v13  ;;  %v4908_v13 = vunpack.i.l.bf16 %v8003_v55 }
 0x329   :  { %4368 = vmatpush3.bf16.msra.mxu1 %v8001_v16  ;;  %4350 = vmatprep.subr.bf16.mxu0 %v4349_v5  ;;  %v5019_v5 = vunpack.i.h.bf16 %v6697_v43  ;;  %v4934_v16 = vunpack.i.h.bf16 %v6408_v0  ;;  %v1328_v55 = vsel %vm1028_vm5, %v5013_v47, %v5014_v10  ;;  %v6849_v19 = vsel %vm227_vm2, %v4843_v6, %v4844_v3 }
 0x32a   :  { %4370 = vmatprep.subr.bf16.mxu1 %v4369_v52  ;;  %2889 = vperm.xlu1 %4529, %v2880_v54   ;;  %v5018_v52 = vunpack.i.l.bf16 %v6697_v43  ;;  %v4933_v54 = vunpack.i.l.bf16 %v6408_v0  ;;  %v4833_v0 = vunpack.i.l.bf16 %v8009_v15  ;;  %v4914_v10 = vunpack.i.h.bf16 %v6406_v29  ;;  %v8015_v29 = vld [vmem:[#allocation55_spill] sm:$0xff] }
 0x32b   :  { %2884 = vperm.xlu0 %4528, %v2879_v38   ;;  %v8006_v38 = vld [vmem:[#allocation14_spill] sm:$0xff]  ;;  %v6842_v24 = vpop.permute.xlu1 %5051  ;;  %v6844_v43 = vpop.permute.xlu0 %5056  ;;  %v4355_v47 = vpack.c.bf16 %v6362_v37, %v922_v21  ;;  %v1327_v3 = vsel %vm1028_vm5, %v4908_v13, %v4909_v33  ;;  %v4999_v6 = vunpack.i.h.bf16 %v6639_v41  ;;  %v4998_v15 = vunpack.i.l.bf16 %v6639_v41  ;;  %v2663_v41 = vld [vmem:[%s7771_s3] sm:$0xff] }
 0x32c   :  { %4352 = vmatpush3.bf16.msra.mxu0 %v4351_v20  ;;  %v8008_v27 = vpack.c.bf16 %v8006_v38, %v8007_v62  ;;  %v8010_v20 = vld [vmem:[#allocation7_spill] sm:$0xff]  ;;  %v8013_v38 = vpack.c.bf16 %v6716_v31, %v6546_v58  ;;  %v1162_v62 = vsel %vm47_vm0, %v4893_v7, %v4894_v32  ;;  %v5039_v58 = vunpack.i.h.bf16 %v6809_v45  ;;  %v8016_v21 = vld [vmem:[#allocation66_spill] sm:$0xff] }
 0x32d   :  { %v8012_v34 = vpack.c.bf16 %v8010_v20, %v8011_v63  ;;  %v1383_v63 = vsel %vm215_vm1, %v5018_v52, %v5019_v5  ;;  %v5038_v31 = vunpack.i.l.bf16 %v6809_v45  ;;  %v8014_v32 = vpack.c.bf16 %v6492_v48, %v6391_v50  ;;  %v8018_v52 = vld [vmem:[#allocation67_spill] sm:$0xff] }
 0x32e   :  { %4372 = vmatpush3.bf16.msra.mxu1 %v8008_v27  ;;  %v1603_v13 = vsel %vm1599_vm6, %v4933_v54, %v4934_v16  ;;  %v4849_v7 = vunpack.i.h.bf16 %v8015_v29  ;;  %v4919_v5 = vunpack.i.h.bf16 %v8016_v21  ;;  %v4918_v45 = vunpack.i.l.bf16 %v8016_v21 }
 0x32f   :  { %4354 = vmatprep.subr.bf16.mxu0 %v8012_v34  ;;  %4374 = vmatprep.subr.bf16.mxu1 %v8013_v38  ;;  %v4377_v34 = vpack.c.bf16 %v1328_v55, %v1327_v3  ;;  %v6872_v37 = vpop.permute.xlu1 %5066  ;;  %v6874_v33 = vpop.permute.xlu0 %5061  ;;  %v8017_v50 = vpack.c.bf16 %v6570_v36, %v6422_v49  ;;  %v1602_v48 = vsel %vm1599_vm6, %v4823_v57, %v4824_v26  ;;  %v4923_v27 = vunpack.i.l.bf16 %v8018_v52  ;;  %v2676_v49 = vld [vmem:[%s7771_s3 + $0x68] sm:$0xff]  ;;  %v8019_v3 = vld [vmem:[#allocation56_spill] sm:$0xff] }
 0x330   :  { %2894 = vperm.xlu0 %4528, %v2881_v1   ;;  %4356 = vmatpush3.bf16.msra.mxu0 %v4355_v47  ;;  %v4924_v1 = vunpack.i.h.bf16 %v8018_v52  ;;  %v4379_v55 = vpack.c.bf16 %v1162_v62, %v6692_v28  ;;  %v4391_v16 = vpack.c.bf16 %v6394_v42, %v1383_v63  ;;  %v1163_v54 = vsel %vm47_vm0, %v4998_v15, %v4999_v6  ;;  %v2687_v52 = vld [vmem:[%s7771_s3 + $0xc0] sm:$0xf] }
 0x331   :  { %4390 = vmatprep.subr.bf16.mxu0 %v8017_v50  ;;  %v5024_v20 = vunpack.i.h.bf16 %v6732_v61  ;;  %v5023_v38 = vunpack.i.l.bf16 %v6732_v61  ;;  %v4393_v47 = vpack.c.bf16 %v1603_v13, %v1602_v48  ;;  %v6898_v36 = vsel %vm227_vm2, %v4833_v0, %v4834_v9  ;;  %v2675_v61 = vld [vmem:[%s7771_s3 + $0x60] sm:$0xff] }
 0x332   :  { %4376 = vmatpush3.bf16.msra.mxu1 %v8014_v32  ;;  %v4848_v26 = vunpack.i.l.bf16 %v8015_v29  ;;  %v1382_v57 = vsel %vm215_vm1, %v4913_v53, %v4914_v10  ;;  %v1604_v62 = vsel %vm1599_vm6, %v5038_v31, %v5039_v58  ;;  %v4854_v6 = vunpack.i.h.bf16 %v8019_v3  ;;  %v8020_v0 = vld [vmem:[#allocation57_spill] sm:$0xff]  ;;  %v8022_v32 = vld [vmem:[#allocation58_spill] sm:$0xff] }
 0x333   :  { %4378 = vmatprep.subr.bf16.mxu1 %v4377_v34  ;;  %2972 = vmatmul.mubr.f32.vlgmr.msra.gmra.mrb[10].mxu0 %v2663_v41  ;;  %v6901_v42 = vpop.permute.xlu1 %5076  ;;  %v6903_v28 = vpop.permute.xlu0 %5071  ;;  %v4853_v9 = vunpack.i.l.bf16 %v8019_v3  ;;  %v4859_v15 = vunpack.i.h.bf16 %v8020_v0  ;;  %v4858_v63 = vunpack.i.l.bf16 %v8020_v0  ;;  %v8021_v34 = vpack.c.bf16 %v6519_v22, %v6425_v51  ;;  %v2688_v51 = vld [vmem:[%s7771_s3 + $0xc8] sm:$0xf] }
 0x334   :  { %4392 = vmatpush3.bf16.msra.mxu0 %v4391_v16  ;;  %v4864_v41 = vunpack.i.h.bf16 %v8022_v32  ;;  %v4863_v13 = vunpack.i.l.bf16 %v8022_v32  ;;  %v1437_v10 = vsel %vm215_vm1, %v4918_v45, %v4919_v5  ;;  %2976 = vmatprep.mubr.f32.mxu0 %v2676_v49  ;;  %v4383_v53 = vpack.c.bf16 %v6375_v40, %v1163_v54 }
 0x335   :  { %4394 = vmatprep.subr.bf16.mxu0 %v4393_v47  ;;  %v1438_v58 = vsel %vm215_vm1, %v5023_v38, %v5024_v20  ;;  %v4385_v31 = vpack.c.bf16 %v1382_v57, %v6745_v4  ;;  %v4397_v21 = vpack.c.bf16 %v6446_v2, %v1604_v62  ;;  %v1933_v22 = vsel %vm1599_vm6, %v4923_v27, %v4924_v1  ;;  %v8024_v1 = vld [vmem:[#allocation76_spill] sm:$0xff]  ;;  %v8026_v38 = vld [vmem:[#allocation69_spill] sm:$0xff] }
 0x336   :  { %4380 = vmatpush3.bf16.msra.mxu1 %v4379_v55  ;;  %v5029_v50 = vunpack.i.h.bf16 %v6770_v60  ;;  %v5028_v5 = vunpack.i.l.bf16 %v6770_v60  ;;  %v5054_v45 = vunpack.i.h.bf16 %v6842_v24  ;;  %v5053_v40 = vunpack.i.l.bf16 %v6842_v24  ;;  %v8025_v55 = vld [vmem:[#allocation81_spill] sm:$0xff] }
 0x337   :  { %4382 = vmatprep.subr.bf16.mxu1 %v8021_v34  ;;  %2977 = vmatmul.mubr.f32.gmra.mrb[12].mxu0 %v2675_v61  ;;  %v8023_v4 = vpack.c.bf16 %v6756_v23, %v6581_v8  ;;  %v6935_v2 = vpop.permute.xlu1 %5086  ;;  %v6937_v48 = vpop.permute.xlu0 %5081  ;;  %v4949_v27 = vunpack.i.h.bf16 %v8024_v1  ;;  %v4948_v60 = vunpack.i.l.bf16 %v8024_v1  ;;  %v4954_v16 = vunpack.i.h.bf16 %v8025_v55  ;;  %v8027_v61 = vld [vmem:[#allocation70_spill] sm:$0xff] }
 0x338   :  { %v4953_v24 = vunpack.i.l.bf16 %v8025_v55  ;;  %v6947_v8 = vsel %vm227_vm2, %v4863_v13, %v4864_v41  ;;  %v5034_v23 = vunpack.i.h.bf16 %v6734_v14  ;;  %v5033_v54 = vunpack.i.l.bf16 %v6734_v14  ;;  %2981 = vmatprep.mubr.f32.mxu0 %v2688_v51  ;;  %v2668_v34 = vld [vmem:[%s7771_s3 + $0x28] sm:$0xff]  ;;  %v8028_v41 = vld [vmem:[#allocation75_spill] sm:$0xff] }
 0x339   :  { %4396 = vmatpush3.bf16.msra.mxu0 %v8023_v4  ;;  %v4399_v20 = vpack.c.bf16 %v1438_v58, %v1437_v10  ;;  %v4929_v47 = vunpack.i.h.bf16 %v8026_v38  ;;  %v4928_v49 = vunpack.i.l.bf16 %v8026_v38  ;;  %v4944_v57 = vunpack.i.h.bf16 %v8027_v61 }
 0x33a   :  { %4384 = vmatpush3.bf16.msra.mxu1 %v4383_v53  ;;  %4398 = vmatprep.subr.bf16.mxu0 %v4397_v21  ;;  %v4421_v62 = vpack.c.bf16 %v1933_v22, %v6822_v11  ;;  %v4943_v32 = vunpack.i.l.bf16 %v8027_v61  ;;  %v4939_v13 = vunpack.i.h.bf16 %v8028_v41  ;;  %v8029_v14 = vpack.c.bf16 %v6707_v18, %v6523_v17  ;;  %v2665_v11 = vld [vmem:[%s7771_s3 + $0x10] sm:$0xff]  ;;  %v8038_v61 = vld [vmem:[#allocation33_spill] sm:$0xff] }
 0x33b   :  { %4386 = vmatprep.subr.bf16.mxu1 %v4385_v31  ;;  %2982 = vmatmul.mubr.f32.gmra.mrb[14].mxu0 %v2687_v52  ;;  %v6963_v10 = vpop.permute.xlu1 %5096  ;;  %v6965_v53 = vpop.permute.xlu0 %5091  ;;  %v1659_v58 = vsel %vm1599_vm6, %v5053_v40, %v5054_v45  ;;  %v1934_v31 = vsel %vm1599_vm6, %v5028_v5, %v5029_v50  ;;  %v4938_v21 = vunpack.i.l.bf16 %v8028_v41  ;;  %v1492_v51 = vsel %vm227_vm2, %v4953_v24, %v4954_v16  ;;  %v8030_v22 = vld [vmem:[#allocation27_spill] sm:$0xff]  ;;  %v8034_v16 = vld [vmem:[#allocation68_spill] sm:$0xff] }
 0x33c   :  { %v4969_v17 = vunpack.i.h.bf16 %v8030_v22  ;;  %v8031_v18 = vpack.c.bf16 %v6814_v39, %v6596_v56  ;;  %v1658_v4 = vsel %vm1599_vm6, %v4948_v60, %v4949_v27  ;;  %v4968_v52 = vunpack.i.l.bf16 %v8030_v22  ;;  %3131 = vmatprep.mubr.f32.mxu0 %v2668_v34  ;;  %v8032_v56 = vld [vmem:[#allocation73_spill] sm:$0xff]  ;;  %v2678_v27 = vld [vmem:[%s7771_s3 + $0x78] sm:$0xff] }
 0x33d   :  { %4400 = vmatpush3.bf16.msra.mxu0 %v4399_v20  ;;  %v1769_v1 = vsel %vm215_vm1, %v5033_v54, %v5034_v23  ;;  %v5044_v45 = vunpack.i.h.bf16 %v6772_v46  ;;  %v5043_v50 = vunpack.i.l.bf16 %v6772_v46  ;;  %v5059_v5 = vunpack.i.h.bf16 %v6844_v43  ;;  %v8033_v46 = vld [vmem:[#allocation28_spill] sm:$0xff]  ;;  %v2677_v20 = vld [vmem:[%s7771_s3 + $0x70] sm:$0xff] }
 0x33e   :  { %4388 = vmatpush3.bf16.msra.mxu1 %v8029_v14  ;;  %4402 = vmatprep.subr.bf16.mxu0 %v8031_v18  ;;  %v5058_v40 = vunpack.i.l.bf16 %v6844_v43  ;;  %v4405_v55 = vpack.c.bf16 %v1659_v58, %v1658_v4  ;;  %v4425_v39 = vpack.c.bf16 %v8032_v56, %v1934_v31  ;;  %v6994_v60 = vsel %vm227_vm2, %v4853_v9, %v4854_v6  ;;  %v8042_v18 = vld [vmem:[#allocation78_spill] sm:$0xff] }
 0x33f   :  { %4422 = vmatprep.subr.bf16.mxu1 %v4421_v62  ;;  %v8035_v24 = vpack.c.bf16 %v8033_v46, %v8034_v16  ;;  %v8036_v43 = vpack.c.bf16 %v6737_v44, %v6551_v59  ;;  %v7002_v23 = vpop.permute.xlu1 %5106  ;;  %v7004_v54 = vpop.permute.xlu0 %5101  ;;  %v1712_v3 = vsel %vm215_vm1, %v4858_v63, %v4859_v15  ;;  %v7019_v59 = vsel %vm2040_vm7, %v4848_v26, %v4849_v7  ;;  %v8037_v44 = vld [vmem:[#allocation59_spill] sm:$0xff]  ;;  %v8039_v63 = vld [vmem:[#allocation29_spill] sm:$0xff] }
 0x340   :  { %v4869_v6 = vunpack.i.h.bf16 %v8037_v44  ;;  %v4868_v9 = vunpack.i.l.bf16 %v8037_v44  ;;  %v1768_v38 = vsel %vm215_vm1, %v4928_v49, %v4929_v47  ;;  %v4415_v0 = vpack.c.bf16 %v6947_v8, %v8038_v61  ;;  %v2690_v47 = vld [vmem:[%s7771_s3 + $0xd8] sm:$0xf]  ;;  %v8047_v46 = vld [vmem:[#allocation31_spill] sm:$0xff] }
 0x341   :  { %3052 = vmatmul.mubr.f32.vlgmr.msra.gmra.mrb[10].mxu1 %v2665_v11  ;;  %4404 = vmatpush3.bf16.msra.mxu0 %v8035_v24  ;;  %v7027_v15 = vsel %vm227_vm2, %v4943_v32, %v4944_v57  ;;  %v4407_v29 = vpack.c.bf16 %v1492_v51, %v6849_v19  ;;  %v4427_v7 = vpack.c.bf16 %v1769_v1, %v1768_v38  ;;  %v4959_v62 = vunpack.i.h.bf16 %v8039_v63  ;;  %v8040_v32 = vld [vmem:[#allocation26_spill] sm:$0xff]  ;;  %v8048_v16 = vld [vmem:[#allocation71_spill] sm:$0xff] }
 0x342   :  { %4424 = vmatpush3.bf16.msra.mxu1 %v8036_v43  ;;  %4406 = vmatprep.subr.bf16.mxu0 %v4405_v55  ;;  %v1713_v26 = vsel %vm215_vm1, %v4968_v52, %v4969_v17  ;;  %v1493_v34 = vsel %vm227_vm2, %v5058_v40, %v5059_v5  ;;  %v1988_v49 = vsel %vm1599_vm6, %v4938_v21, %v4939_v13  ;;  %v4974_v41 = vunpack.i.h.bf16 %v8040_v32  ;;  %v2689_v13 = vld [vmem:[%s7771_s3 + $0xd0] sm:$0xf] }
 0x343   :  { %4426 = vmatprep.subr.bf16.mxu1 %v4425_v39  ;;  %3056 = vmatprep.mubr.f32.mxu1 %v2678_v27  ;;  %v1989_v57 = vsel %vm1599_vm6, %v5043_v50, %v5044_v45  ;;  %v4973_v19 = vunpack.i.l.bf16 %v8040_v32  ;;  %v5074_v14 = vunpack.i.h.bf16 %v6903_v28  ;;  %v5073_v11 = vunpack.i.l.bf16 %v6903_v28  ;;  %v7042_v58 = vpop.permute.xlu1 %5116  ;;  %v7044_v31 = vpop.permute.xlu0 %5111  ;;  %v8041_v17 = vld [vmem:[#allocation35_spill] sm:$0xff]  ;;  %v8045_v50 = vld [vmem:[#allocation74_spill] sm:$0xff] }
 0x344   :  { %v4958_v21 = vunpack.i.l.bf16 %v8039_v63  ;;  %v5049_v51 = vunpack.i.h.bf16 %v6811_v25  ;;  %v5048_v22 = vunpack.i.l.bf16 %v6811_v25  ;;  %v8043_v4 = vpack.c.bf16 %v8041_v17, %v8042_v18 }
 0x345   :  { %3057 = vmatmul.mubr.f32.gmra.mrb[12].mxu1 %v2677_v20  ;;  %4408 = vmatpush3.bf16.msra.mxu0 %v4407_v29  ;;  %v8044_v28 = vpack.c.bf16 %v6781_v30, %v6599_v12  ;;  %v4413_v52 = vpack.c.bf16 %v1713_v26, %v1712_v3  ;;  %v5079_v1 = vunpack.i.h.bf16 %v6901_v42  ;;  %v5078_v45 = vunpack.i.l.bf16 %v6901_v42  ;;  %v2670_v12 = vld [vmem:[%s7771_s3 + $0x38] sm:$0xff]  ;;  %v8046_v30 = vld [vmem:[#allocation82_spill] sm:$0xff] }
 0x346   :  { %4428 = vmatpush3.bf16.msra.mxu1 %v4427_v7  ;;  %4410 = vmatprep.subr.bf16.mxu0 %v8043_v4  ;;  %v4411_v5 = vpack.c.bf16 %v8045_v50, %v1493_v34  ;;  %v4433_v40 = vpack.c.bf16 %v1989_v57, %v1988_v49  ;;  %v5089_v55 = vunpack.i.h.bf16 %v6935_v2  ;;  %v5088_v25 = vunpack.i.l.bf16 %v6935_v2 }
 0x347   :  { %4430 = vmatprep.subr.bf16.mxu1 %v8044_v28  ;;  %3061 = vmatprep.mubr.f32.mxu1 %v2690_v47  ;;  %v5084_v56 = vunpack.i.h.bf16 %v6937_v48  ;;  %v5083_v39 = vunpack.i.l.bf16 %v6937_v48  ;;  %v4964_v27 = vunpack.i.h.bf16 %v8046_v30  ;;  %v1547_v42 = vsel %vm227_vm2, %v4973_v19, %v4974_v41  ;;  %v7073_v43 = vpop.permute.xlu1 %5126  ;;  %v7075_v2 = vpop.permute.xlu0 %5121  ;;  %v8050_v47 = vld [vmem:[#allocation79_spill] sm:$0xff] }
 0x348   :  { %v8049_v24 = vpack.c.bf16 %v8047_v46, %v8048_v16  ;;  %v4435_v48 = vpack.c.bf16 %v7027_v15, %v6898_v36  ;;  %v1714_v20 = vsel %vm215_vm1, %v5073_v11, %v5074_v14  ;;  %v1824_v3 = vsel %vm227_vm2, %v5048_v22, %v5049_v51  ;;  %v8054_v51 = vld [vmem:[#allocation72_spill] sm:$0xff] }
 0x349   :  { %3062 = vmatmul.mubr.f32.gmra.mrb[14].mxu1 %v2689_v13  ;;  %4412 = vmatpush3.bf16.msra.mxu0 %v4411_v5  ;;  %v5064_v38 = vunpack.i.h.bf16 %v6874_v33  ;;  %v5063_v29 = vunpack.i.l.bf16 %v6874_v33  ;;  %v2044_v7 = vsel %vm2040_vm7, %v4958_v21, %v4959_v62  ;;  %v5099_v26 = vunpack.i.h.bf16 %v6963_v10  ;;  %v8051_v13 = vld [vmem:[#allocation34_spill] sm:$0xff] }
 0x34a   :  { %4432 = vmatpush3.bf16.msra.mxu1 %v8049_v24  ;;  %4414 = vmatprep.subr.bf16.mxu0 %v4413_v52  ;;  %v5098_v63 = vunpack.i.l.bf16 %v6963_v10  ;;  %v5094_v34 = vunpack.i.h.bf16 %v6965_v53  ;;  %v5093_v36 = vunpack.i.l.bf16 %v6965_v53  ;;  %v1548_v15 = vsel %vm227_vm2, %v5078_v45, %v5079_v1  ;;  %v2667_v45 = vld [vmem:[%s7771_s3 + $0x20] sm:$0xff] }
 0x34b   :  { %4434 = vmatprep.subr.bf16.mxu1 %v4433_v40  ;;  %3211 = vmatprep.mubr.f32.mxu1 %v2670_v12  ;;  %v4417_v49 = vpack.c.bf16 %v8050_v47, %v1714_v20  ;;  %v2267_v33 = vsel %vm2262_vm8, %v5083_v39, %v5084_v56  ;;  %v2318_v57 = vsel %vm2262_vm8, %v5088_v25, %v5089_v55  ;;  %v5119_v62 = vunpack.i.h.bf16 %v7042_v58  ;;  %v7099_v53 = vpop.permute.xlu1 %5136  ;;  %v7101_v19 = vpop.permute.xlu0 %5131 }
 0x34c   :  { %v5118_v32 = vunpack.i.l.bf16 %v7042_v58  ;;  %v5114_v41 = vunpack.i.h.bf16 %v7044_v31  ;;  %v5113_v10 = vunpack.i.l.bf16 %v7044_v31  ;;  %v5069_v14 = vunpack.i.h.bf16 %v6872_v37  ;;  %v8052_v58 = vld [vmem:[#allocation77_spill] sm:$0xff] }
 0x34d   :  { %4416 = vmatpush3.bf16.msra.mxu0 %v4415_v0  ;;  %v5068_v11 = vunpack.i.l.bf16 %v6872_v37  ;;  %v8053_v21 = vpack.c.bf16 %v8051_v13, %v8052_v58  ;;  %v4439_v31 = vpack.c.bf16 %v8054_v51, %v1824_v3  ;;  %v4441_v22 = vpack.c.bf16 %v2044_v7, %v7019_v59  ;;  %v2679_v7 = vld [vmem:[%s7771_s3 + $0x80] sm:$0xff] }
 0x34e   :  { %4436 = vmatpush3.bf16.msra.mxu1 %v4435_v48  ;;  %4418 = vmatprep.subr.bf16.mxu0 %v4417_v49  ;;  %v2100_v8 = vsel %vm2040_vm7, %v5098_v63, %v5099_v26  ;;  %v2099_v61 = vsel %vm2040_vm7, %v5093_v36, %v5094_v34  ;;  %v4419_v0 = vpack.c.bf16 %v1548_v15, %v1547_v42  ;;  %v5129_v18 = vunpack.i.h.bf16 %v7073_v43  ;;  %v8055_v42 = vld [vmem:[#allocation32_spill] sm:$0xff] }
 0x34f   :  { %4438 = vmatprep.subr.bf16.mxu1 %v8053_v21  ;;  %v4453_v17 = vpack.c.bf16 %v2318_v57, %v2267_v33  ;;  %v5128_v4 = vunpack.i.l.bf16 %v7073_v43  ;;  %v5124_v37 = vunpack.i.h.bf16 %v7075_v2  ;;  %v5123_v28 = vunpack.i.l.bf16 %v7075_v2  ;;  %v5147_v1 = vpop.permute.xlu1 %5146  ;;  %v5142_v59 = vpop.permute.xlu0 %5141  ;;  %v8056_v48 = vld [vmem:[#allocation80_spill] sm:$0xff] }
 0x350   :  { %v4963_v52 = vunpack.i.l.bf16 %v8046_v30  ;;  %v2045_v50 = vsel %vm2040_vm7, %v5063_v29, %v5064_v38  ;;  %v2319_v5 = vsel %vm2262_vm8, %v5113_v10, %v5114_v41  ;;  %v2320_v40 = vsel %vm2262_vm8, %v5118_v32, %v5119_v62  ;;  %v2680_v38 = vld [vmem:[%s7771_s3 + $0x88] sm:$0xff]  ;;  %v8058_v33 = vld [vmem:[#allocation36_spill] sm:$0xff] }
 0x351   :  { %4420 = vmatpush3.bf16.msra.mxu0 %v4419_v0  ;;  %v5149_v55 = vunpack.i.h.bf16 %v5147_v1  ;;  %v5148_v25 = vunpack.i.l.bf16 %v5147_v1  ;;  %v5144_v56 = vunpack.i.h.bf16 %v5142_v59  ;;  %v5143_v39 = vunpack.i.l.bf16 %v5142_v59 }
 0x352   :  { %4440 = vmatpush3.bf16.msra.mxu1 %v4439_v31  ;;  %4454 = vmatprep.subr.bf16.mxu0 %v4453_v17  ;;  %v1879_v12 = vsel %vm227_vm2, %v5068_v11, %v5069_v14  ;;  %v4443_v46 = vpack.c.bf16 %v6994_v60, %v8055_v42  ;;  %v4455_v16 = vpack.c.bf16 %v2100_v8, %v2099_v61  ;;  %v8057_v60 = vld [vmem:[#allocation39_spill] sm:$0xff]  ;;  %v5109_v62 = vunpack.i.h.bf16 %v7002_v23  ;;  %v2692_v14 = vld [vmem:[%s7771_s3 + $0xe8] sm:$0xf]  ;;  %v2691_v31 = vld [vmem:[%s7771_s3 + $0xe0] sm:$0xf] }
 0x353   :  { %4442 = vmatprep.subr.bf16.mxu1 %v4441_v22  ;;  %v2098_v24 = vsel %vm2040_vm7, %v4868_v9, %v4869_v6  ;;  %v2153_v43 = vsel %vm2151_vm9, %v5128_v4, %v5129_v18  ;;  %v2152_v2 = vsel %vm2151_vm9, %v5123_v28, %v5124_v37  ;;  %v4445_v20 = vpack.c.bf16 %v8056_v48, %v2045_v50  ;;  %v5157_v6 = vpop.permute.xlu1 %5156  ;;  %v5152_v9 = vpop.permute.xlu0 %5151  ;;  %v8059_v8 = vld [vmem:[#allocation24_spill] sm:$0xff]  ;;  %v2672_v18 = vld [vmem:[%s7771_s3 + $0x48] sm:$0xff] }
 0x354   :  { %3132 = vmatmul.mubr.f32.vlgmr.msra.gmra.mrb[16].mxu0 %v2667_v45  ;;  %v4457_v3 = vpack.c.bf16 %v2320_v40, %v2319_v5  ;;  %v4759_v29 = vunpack.i.h.bf16 %v8057_v60  ;;  %v1878_v44 = vsel %vm227_vm2, %v4963_v52, %v4964_v27  ;;  %v2321_v26 = vsel %vm2262_vm8, %v5143_v39, %v5144_v56  ;;  %v2669_v5 = vld [vmem:[%s7771_s3 + $0x30] sm:$0xff] }
 0x355   :  { %4456 = vmatpush3.bf16.msra.mxu0 %v4455_v16  ;;  %v2322_v63 = vsel %vm2262_vm8, %v5148_v25, %v5149_v55  ;;  %v5159_v34 = vunpack.i.h.bf16 %v5157_v6  ;;  %v5158_v36 = vunpack.i.l.bf16 %v5157_v6  ;;  %v5154_v15 = vunpack.i.h.bf16 %v5152_v9  ;;  %3136 = vmatprep.mubr.f32.mxu0 %v2680_v38 }
 0x356   :  { %4444 = vmatpush3.bf16.msra.mxu1 %v4443_v46  ;;  %v5153_v47 = vunpack.i.l.bf16 %v5152_v9  ;;  %4458 = vmatprep.subr.bf16.mxu0 %v4457_v3  ;;  %v4758_v30 = vunpack.i.l.bf16 %v8057_v60  ;;  %v4447_v27 = vpack.c.bf16 %v1879_v12, %v1878_v44  ;;  %v4459_v49 = vpack.c.bf16 %v2153_v43, %v2152_v2  ;;  %v2681_v3 = vld [vmem:[%s7771_s3 + $0x90] sm:$0xff] }
 0x357   :  { %4446 = vmatprep.subr.bf16.mxu1 %v4445_v20  ;;  %v4449_v57 = vpack.c.bf16 %v2098_v24, %v8058_v33  ;;  %v2155_v32 = vsel %vm2151_vm9, %v5158_v36, %v5159_v34  ;;  %v4461_v10 = vpack.c.bf16 %v2322_v63, %v2321_v26  ;;  %v5108_v11 = vunpack.i.l.bf16 %v7002_v23  ;;  %v7157_v21 = vpop.permute.xlu1 %5166  ;;  %v7159_v51 = vpop.permute.xlu0 %5161 }
 0x358   :  { %v2154_v41 = vsel %vm2151_vm9, %v5153_v47, %v5154_v15  ;;  %3137 = vmatmul.mubr.f32.gmra.mrb[18].mxu0 %v2679_v7  ;;  %v5104_v13 = vunpack.i.h.bf16 %v7004_v54  ;;  %v5103_v58 = vunpack.i.l.bf16 %v7004_v54  ;;  %v8060_v61 = vunpack.i.h.bf16 %v8059_v8  ;;  %v8062_v54 = vld [vmem:[#allocation37_spill] sm:$0xff] }
 0x359   :  { %4460 = vmatpush3.bf16.msra.mxu0 %v4459_v49  ;;  %v4463_v22 = vpack.c.bf16 %v2155_v32, %v2154_v41  ;;  %v8061_v0 = vunpack.i.l.bf16 %v8059_v8  ;;  %3141 = vmatprep.mubr.f32.mxu0 %v2692_v14  ;;  %v2484_v4 = vsel %vm2151_vm9, %v4758_v30, %v4759_v29  ;;  %v8063_v37 = vunpack.i.h.bf16 %v7976_v35  ;;  %v2693_v49 = vld [vmem:[%s7771_s3 + $0xf0] sm:$0xf] }
 0x35a   :  { %4448 = vmatpush3.bf16.msra.mxu1 %v4447_v27  ;;  %4462 = vmatprep.subr.bf16.mxu0 %v4461_v10  ;;  %v8064_v28 = vunpack.i.l.bf16 %v7976_v35  ;;  %v2486_v1 = vsel %vm2151_vm9, %v5108_v11, %v5109_v62  ;;  %v2485_v59 = vsel %vm2151_vm9, %v5103_v58, %v5104_v13  ;;  %v5340_v39 = vmov 0.0|0.0   ;;  %v2682_v35 = vld [vmem:[%s7771_s3 + $0x98] sm:$0xff] }
 0x35b   :  { %v1930_v23 = vsel %vm1599_vm6, %v8061_v0, %v8060_v61  ;;  %4450 = vmatprep.subr.bf16.mxu1 %v4449_v57  ;;  %v5177_v45 = vpop.permute.xlu1 %5176  ;;  %v5172_v50 = vpop.permute.xlu0 %5171  ;;  %v5139_v12 = vunpack.i.h.bf16 %v7099_v53  ;;  %v5138_v42 = vunpack.i.l.bf16 %v7099_v53  ;;  %v5134_v16 = vunpack.i.h.bf16 %v7101_v19  ;;  %v2674_v57 = vld [vmem:[%s7771_s3 + $0x58] sm:$0xff] }
 0x35c   :  { %v4451_v17 = vpack.c.bf16 %v8062_v54, %v1930_v23  ;;  %3142 = vmatmul.mubr.f32.gmra.mrb[20].mxu0 %v2691_v31  ;;  %v2483_v52 = vsel %vm2151_vm9, %v8064_v28, %v8063_v37  ;;  %v5179_v40 = vunpack.i.h.bf16 %v5177_v45  ;;  %v5178_v55 = vunpack.i.l.bf16 %v5177_v45 }
 0x35d   :  { %4464 = vmatpush3.bf16.msra.mxu0 %v4463_v22  ;;  %v5174_v25 = vunpack.i.h.bf16 %v5172_v50  ;;  %v5173_v56 = vunpack.i.l.bf16 %v5172_v50  ;;  %3291 = vmatprep.mubr.f32.mxu0 %v2672_v18  ;;  %v4486_v46 = vpack.c.bf16 %v2484_v4, %v2483_v52  ;;  %v5133_v24 = vunpack.i.l.bf16 %v7101_v19  ;;  %v2694_v19 = vld [vmem:[%s7771_s3 + $0xf8] sm:$0xf] }
 0x35e   :  { %4452 = vmatpush3.bf16.msra.mxu1 %v4451_v17  ;;  %v2374_v2 = vsel %vm2040_vm7, %v5178_v55, %v5179_v40  ;;  %v4489_v53 = vpack.c.bf16 %v2486_v1, %v2485_v59  ;;  %v5169_v9 = vunpack.i.h.bf16 %v7157_v21  ;;  %v5168_v7 = vunpack.i.l.bf16 %v7157_v21 }
 0x35f   :  { %4485 = vmatprep.subr.bf16.mxu1 %v5340_v39  ;;  %v2373_v43 = vsel %vm2040_vm7, %v5173_v56, %v5174_v25  ;;  %v5187_v48 = vpop.permute.xlu1 %5186  ;;  %v5182_v20 = vpop.permute.xlu0 %5181  ;;  %v5164_v26 = vunpack.i.h.bf16 %v7159_v51  ;;  %v5163_v63 = vunpack.i.l.bf16 %v7159_v51  ;;  %v2538_v34 = vsel %vm2151_vm9, %v5138_v42, %v5139_v12 }
 0x360   :  { %v4465_v38 = vpack.c.bf16 %v2374_v2, %v2373_v43  ;;  %v5189_v60 = vunpack.i.h.bf16 %v5187_v48  ;;  %v5188_v29 = vunpack.i.l.bf16 %v5187_v48  ;;  %v5184_v44 = vunpack.i.h.bf16 %v5182_v20 }
 0x361   :  { %3212 = vmatmul.mubr.f32.vlgmr.msra.gmra.mrb[16].mxu1 %v2669_v5  ;;  %v5183_v6 = vunpack.i.l.bf16 %v5182_v20  ;;  %v2487_v36 = vsel %vm2151_vm9, %v5133_v24, %v5134_v16  ;;  %v2540_v62 = vsel %vm2151_vm9, %v5168_v7, %v5169_v9  ;;  %v2539_v32 = vsel %vm2151_vm9, %v5163_v63, %v5164_v26 }
 0x362   :  { %4487 = vmatpush1.bf16.msra.mxu1 %v4486_v46  ;;  %3216 = vmatprep.mubr.f32.mxu1 %v2682_v35  ;;  %v2207_v15 = vsel %vm2151_vm9, %v5188_v29, %v5189_v60  ;;  %v4492_v41 = vpack.c.bf16 %v2538_v34, %v2487_v36  ;;  %v4495_v61 = vpack.c.bf16 %v2540_v62, %v2539_v32  ;;  %vm3722_vm0 = vcmask 1042434  }
 0x363   :  { %4488 = vmatprep.subr.bf16.mxu1 %v5340_v39  ;;  %4466 = vmatprep.subr.bf16.mxu0 %v4465_v38  ;;  %v2156_v47 = vsel %vm2151_vm9, %v5183_v6, %v5184_v44  ;;  %v5197_v30 = vpop.permute.xlu1 %5196  ;;  %v5192_v27 = vpop.permute.xlu0 %5191  ;;  %vm3724_vm1 = vcmask 1043459   ;;  %vm3726_vm2 = vcmask 1044484   ;;  %vm3732_vm5 = vcmask 1047559  }
 0x364   :  { %v4467_v33 = vpack.c.bf16 %v2207_v15, %v2156_v47  ;;  %v5199_v10 = vunpack.i.h.bf16 %v5197_v30  ;;  %v5198_v14 = vunpack.i.l.bf16 %v5197_v30  ;;  %v5194_v11 = vunpack.i.h.bf16 %v5192_v27 }
 0x365   :  { %3217 = vmatmul.mubr.f32.gmra.mrb[18].mxu1 %v2681_v3  ;;  %v5193_v13 = vunpack.i.l.bf16 %v5192_v27  ;;  %vm3737_vm6 = vcmask 162816  }
 0x366   :  { %4490 = vmatpush1.bf16.msra.mxu1 %v4489_v53  ;;  %3221 = vmatprep.mubr.f32.mxu1 %v2694_v19  ;;  %v2542_v0 = vsel %vm2151_vm9, %v5198_v14, %v5199_v10 }
 0x367   :  { %4491 = vmatprep.subr.bf16.mxu1 %v5340_v39  ;;  %4468 = vmatpush3.bf16.msra.mxu0 %v4467_v33  ;;  %v5207_v58 = vpop.permute.xlu1 %5206  ;;  %v5202_v21 = vpop.permute.xlu0 %5201  ;;  %v2541_v23 = vsel %vm2151_vm9, %v5193_v13, %v5194_v11 }
 0x368   :  { %v5209_v51 = vunpack.i.h.bf16 %v5207_v58  ;;  %v5208_v31 = vunpack.i.l.bf16 %v5207_v58  ;;  %v5204_v22 = vunpack.i.h.bf16 %v5202_v21  ;;  %v5203_v8 = vunpack.i.l.bf16 %v5202_v21 }
 0x369   :  { %3222 = vmatmul.mubr.f32.gmra.mrb[20].mxu1 %v2693_v49  ;;  %v4498_v45 = vpack.c.bf16 %v2542_v0, %v2541_v23 }
 0x36a   :  { %4493 = vmatpush1.bf16.msra.mxu1 %v4492_v41  ;;  %4101 = vmatprep.mubr.msk.f32.mxu1 %vm2897_vm10, %v2674_v57  ;;  %v2375_v54 = vsel %vm2040_vm7, %v5203_v8, %v5204_v22  ;;  %v2376_v17 = vsel %vm2040_vm7, %v5208_v31, %v5209_v51 }
 0x36b   :  { %4494 = vmatprep.subr.bf16.mxu1 %v5340_v39  ;;  %v5217_v18 = vpop.permute.xlu1 %5216  ;;  %v5212_v4 = vpop.permute.xlu0 %5211  ;;  %v4469_v37 = vpack.c.bf16 %v2376_v17, %v2375_v54 }
 0x36c   :  { %v5219_v28 = vunpack.i.h.bf16 %v5217_v18  ;;  %v5218_v52 = vunpack.i.l.bf16 %v5217_v18  ;;  %v5214_v1 = vunpack.i.h.bf16 %v5212_v4  ;;  %v5213_v59 = vunpack.i.l.bf16 %v5212_v4 }
 0x36d   :  { %4470 = vmatprep.subr.bf16.mxu0 %v4469_v37 }
 0x36e   :  { %4496 = vmatpush1.bf16.msra.mxu1 %v4495_v61  ;;  %v2209_v50 = vsel %vm2151_vm9, %v5218_v52, %v5219_v28  ;;  %v2208_v5 = vsel %vm2151_vm9, %v5213_v59, %v5214_v1 }
 0x36f   :  { %4497 = vmatprep.subr.bf16.mxu1 %v5340_v39  ;;  %v4471_v40 = vpack.c.bf16 %v2209_v50, %v2208_v5  ;;  %v5227_v55 = vpop.permute.xlu1 %5226  ;;  %v5222_v25 = vpop.permute.xlu0 %5221 }
 0x370   :  { %v5229_v56 = vunpack.i.h.bf16 %v5227_v55  ;;  %v5228_v35 = vunpack.i.l.bf16 %v5227_v55  ;;  %v5224_v12 = vunpack.i.h.bf16 %v5222_v25  ;;  %v5223_v42 = vunpack.i.l.bf16 %v5222_v25 }
 0x371   :  { %4472 = vmatpush3.bf16.msra.mxu0 %v4471_v40 }
 0x372   :  { %4499 = vmatpush1.bf16.msra.mxu1 %v4498_v45  ;;  %v2594_v46 = vsel %vm2262_vm8, %v5228_v35, %v5229_v56  ;;  %v2593_v16 = vsel %vm2262_vm8, %v5223_v42, %v5224_v12 }
 0x373   :  { %4500 = vmatprep.subr.bf16.mxu1 %v5340_v39  ;;  %v4501_v24 = vpack.c.bf16 %v2594_v46, %v2593_v16  ;;  %v5237_v43 = vpop.permute.xlu1 %5236  ;;  %v5232_v2 = vpop.permute.xlu0 %5231 }
 0x374   :  { %v5239_v48 = vunpack.i.h.bf16 %v5237_v43  ;;  %v5238_v20 = vunpack.i.l.bf16 %v5237_v43  ;;  %v5234_v3 = vunpack.i.h.bf16 %v5232_v2  ;;  %v5233_v38 = vunpack.i.l.bf16 %v5232_v2 }
 0x376   :  { %4502 = vmatpush1.bf16.msra.mxu1 %v4501_v24  ;;  %v2377_v53 = vsel %vm2040_vm7, %v5233_v38, %v5234_v3  ;;  %v2428_v60 = vsel %vm2040_vm7, %v5238_v20, %v5239_v48 }
 0x377   :  { %4503 = vmatprep.subr.bf16.mxu1 %v5340_v39  ;;  %v5247_v29 = vpop.permute.xlu1 %5246  ;;  %v5242_v44 = vpop.permute.xlu0 %5241  ;;  %v4473_v6 = vpack.c.bf16 %v2428_v60, %v2377_v53 }
 0x378   :  { %v5249_v19 = vunpack.i.h.bf16 %v5247_v29  ;;  %v5248_v9 = vunpack.i.l.bf16 %v5247_v29  ;;  %v5244_v7 = vunpack.i.h.bf16 %v5242_v44  ;;  %v5243_v26 = vunpack.i.l.bf16 %v5242_v44 }
 0x379   :  { %4474 = vmatprep.subr.bf16.mxu0 %v4473_v6 }
 0x37a   :  { %v2211_v63 = vsel %vm2151_vm9, %v5248_v9, %v5249_v19  ;;  %v2210_v34 = vsel %vm2151_vm9, %v5243_v26, %v5244_v7  ;;  %vm3749_vm9 = vcmask 1024  }
 0x37b   :  { %v4475_v36 = vpack.c.bf16 %v2211_v63, %v2210_v34  ;;  %v5257_v15 = vpop.permute.xlu1 %5256  ;;  %v5252_v47 = vpop.permute.xlu0 %5251  ;;  %v2671_v63 = vld [vmem:[%s7771_s3 + $0x40] sm:$0xff] }
 0x37c   :  { %v5259_v30 = vunpack.i.h.bf16 %v5257_v15  ;;  %v5258_v27 = vunpack.i.l.bf16 %v5257_v15  ;;  %v5254_v49 = vunpack.i.h.bf16 %v5252_v47  ;;  %v5253_v33 = vunpack.i.l.bf16 %v5252_v47  ;;  %v2684_v15 = vld [vmem:[%s7771_s3 + $0xa8] sm:$0xff] }
 0x37d   :  { %4476 = vmatpush3.bf16.msra.mxu0 %v4475_v36 }
 0x37e   :  { %v2596_v57 = vsel %vm2262_vm8, %v5258_v27, %v5259_v30  ;;  %v2595_v62 = vsel %vm2262_vm8, %v5253_v33, %v5254_v49 }
 0x37f   :  { %v4504_v32 = vpack.c.bf16 %v2596_v57, %v2595_v62  ;;  %v5267_v41 = vpop.permute.xlu1 %5266  ;;  %v5262_v10 = vpop.permute.xlu0 %5261 }
 0x380   :  { %v5269_v14 = vunpack.i.h.bf16 %v5267_v41  ;;  %v5268_v11 = vunpack.i.l.bf16 %v5267_v41  ;;  %v5264_v13 = vunpack.i.h.bf16 %v5262_v10  ;;  %v5263_v58 = vunpack.i.l.bf16 %v5262_v10 }
 0x381   :  { %4505 = vmatpush1.bf16.msra.mxu1 %v4504_v32  ;;  %v2683_v32 = vld [vmem:[%s7771_s3 + $0xa0] sm:$0xff] }
 0x382   :  { %v2429_v21 = vsel %vm2040_vm7, %v5263_v58, %v5264_v13  ;;  %v2430_v51 = vsel %vm2040_vm7, %v5268_v11, %v5269_v14  ;;  %4506 = vmatprep.subr.bf16.mxu1 %v5340_v39  ;;  %v2696_v14 = vld [vmem:[%s7771_s3 + $0x108] sm:$0xf]  ;;  %v2695_v13 = vld [vmem:[%s7771_s3 + $0x100] sm:$0xf]  ;;  %v2673_v58 = vld [vmem:[%s7771_s3 + $0x50] sm:$0xff] }
 0x383   :  { %v5277_v31 = vpop.permute.xlu1 %5276  ;;  %v5272_v22 = vpop.permute.xlu0 %5271  ;;  %v4477_v8 = vpack.c.bf16 %v2430_v51, %v2429_v21  ;;  %v2685_v21 = vld [vmem:[%s7771_s3 + $0xb0] sm:$0xff]  ;;  %v2698_v51 = vld [vmem:[%s7771_s3 + $0x118] sm:$0xf] }
 0x384   :  { %v5279_v61 = vunpack.i.h.bf16 %v5277_v31  ;;  %v5278_v0 = vunpack.i.l.bf16 %v5277_v31  ;;  %v5274_v23 = vunpack.i.h.bf16 %v5272_v22  ;;  %v5273_v54 = vunpack.i.l.bf16 %v5272_v22  ;;  %v2697_v31 = vld [vmem:[%s7771_s3 + $0x110] sm:$0xf] }
 0x385   :  { %4478 = vmatprep.subr.bf16.mxu0 %v4477_v8 }
 0x386   :  { %v2264_v17 = vsel %vm2262_vm8, %v5278_v0, %v5279_v61  ;;  %v2263_v18 = vsel %vm2262_vm8, %v5273_v54, %v5274_v23 }
 0x387   :  { %v4479_v4 = vpack.c.bf16 %v2264_v17, %v2263_v18  ;;  %v5287_v37 = vpop.permute.xlu1 %5286  ;;  %v5282_v28 = vpop.permute.xlu0 %5281 }
 0x388   :  { %v5289_v52 = vunpack.i.h.bf16 %v5287_v37  ;;  %v5288_v1 = vunpack.i.l.bf16 %v5287_v37  ;;  %v5284_v59 = vunpack.i.h.bf16 %v5282_v28  ;;  %v5283_v45 = vunpack.i.l.bf16 %v5282_v28 }
 0x389   :  { %4480 = vmatpush3.bf16.msra.mxu0 %v4479_v4 }
 0x38a   :  { %v2648_v50 = vsel %vm2262_vm8, %v5288_v1, %v5289_v52  ;;  %v2597_v5 = vsel %vm2262_vm8, %v5283_v45, %v5284_v59 }
 0x38b   :  { %v4507_v40 = vpack.c.bf16 %v2648_v50, %v2597_v5  ;;  %v5297_v55 = vpop.permute.xlu1 %5296  ;;  %v5292_v25 = vpop.permute.xlu0 %5291 }
 0x38c   :  { %v5299_v56 = vunpack.i.h.bf16 %v5297_v55  ;;  %v5298_v35 = vunpack.i.l.bf16 %v5297_v55  ;;  %v5294_v12 = vunpack.i.h.bf16 %v5292_v25  ;;  %v5293_v42 = vunpack.i.l.bf16 %v5292_v25 }
 0x38d   :  { %4508 = vmatpush1.bf16.msra.mxu1 %v4507_v40 }
 0x38e   :  { %v2431_v46 = vsel %vm2040_vm7, %v5293_v42, %v5294_v12  ;;  %v2432_v16 = vsel %vm2040_vm7, %v5298_v35, %v5299_v56  ;;  %4509 = vmatprep.subr.bf16.mxu1 %v5340_v39  ;;  %vm3741_vm7 = vcmask 156672  }
 0x38f   :  { %v5307_v24 = vpop.permute.xlu1 %5306  ;;  %v5302_v43 = vpop.permute.xlu0 %5301  ;;  %v4481_v2 = vpack.c.bf16 %v2432_v16, %v2431_v46 }
 0x390   :  { %v5309_v48 = vunpack.i.h.bf16 %v5307_v24  ;;  %v5308_v20 = vunpack.i.l.bf16 %v5307_v24  ;;  %v5304_v3 = vunpack.i.h.bf16 %v5302_v43  ;;  %v5303_v38 = vunpack.i.l.bf16 %v5302_v43 }
 0x391   :  { %4482 = vmatprep.subr.bf16.mxu0 %v4481_v2 }
 0x392   :  { %v2266_v53 = vsel %vm2262_vm8, %v5308_v20, %v5309_v48  ;;  %v2265_v60 = vsel %vm2262_vm8, %v5303_v38, %v5304_v3 }
 0x393   :  { %v4483_v29 = vpack.c.bf16 %v2266_v53, %v2265_v60  ;;  %v5317_v44 = vpop.permute.xlu1 %5316 }
 0x394   :  { %v5312_v6 = vpop.permute.xlu0 %5311  ;;  %v5319_v19 = vunpack.i.h.bf16 %v5317_v44  ;;  %v5318_v9 = vunpack.i.l.bf16 %v5317_v44 }
 0x395   :  { %v5314_v7 = vunpack.i.h.bf16 %v5312_v6  ;;  %v5313_v26 = vunpack.i.l.bf16 %v5312_v6  ;;  %4484 = vmatpush3.bf16.msra.mxu0 %v4483_v29 }
 0x396   :  { %v2650_v34 = vsel %vm2262_vm8, %v5318_v9, %v5319_v19 }
 0x397   :  { %v2649_v36 = vsel %vm2262_vm8, %v5313_v26, %v5314_v7 }
 0x398   :  { %v4510_v47 = vpack.c.bf16 %v2650_v34, %v2649_v36  ;;  %v5327_v30 = vpop.permute.xlu1 %5326  ;;  %3292 = vmatmul.mubr.f32.vlgmr.msra.gmra.mrb[22].mxu0 %v2671_v63 }
 0x399   :  { %v5322_v27 = vpop.permute.xlu0 %5321  ;;  %v5329_v49 = vunpack.i.h.bf16 %v5327_v30  ;;  %v5328_v33 = vunpack.i.l.bf16 %v5327_v30  ;;  %3296 = vmatprep.mubr.f32.mxu0 %v2684_v15 }
 0x39a   :  { %v5324_v57 = vunpack.i.h.bf16 %v5322_v27  ;;  %v5323_v62 = vunpack.i.l.bf16 %v5322_v27  ;;  %4511 = vmatpush1.bf16.msra.mxu1 %v4510_v47 }
 0x39b   :  { %v2652_v41 = vsel %vm2262_vm8, %v5328_v33, %v5329_v49  ;;  %4512 = vmatprep.subr.bf16.mxu1 %v5340_v39  ;;  %v2686_v39 = vld [vmem:[%s7771_s3 + $0xb8] sm:$0xff]  ;;  %s5341_s3 = smov 79  }
 0x39c   :  { %v2651_v10 = vsel %vm2262_vm8, %v5323_v62, %v5324_v57  ;;  %3297 = vmatmul.mubr.f32.gmra.mrb[24].mxu0 %v2683_v32  ;;  %vm3747_vm8 = vcmask 7168  }
 0x39d   :  { %v4513_v11 = vpack.c.bf16 %v2652_v41, %v2651_v10  ;;  %3301 = vmatprep.mubr.f32.mxu0 %v2696_v14 }
 0x39f   :  { %4514 = vmatpush1.bf16.msra.mxu1 %v4513_v11 }
 0x3a0   :  { %3302 = vmatmul.mubr.f32.gmra.mrb[26].mxu0 %v2695_v13 }
 0x3a2   :  { %3372 = vmatmul.mubr.f32.vlgmr.msra.gmra.mrb[22].mxu1 %v2673_v58 }
 0x3a3   :  { %4102 = vmatprep.mubr.msk.f32.mxu1 %vm2897_vm10, %v2686_v39 }
 0x3a6   :  { %3377 = vmatmul.mubr.f32.gmra.mrb[24].mxu1 %v2685_v21 }
 0x3a7   :  { %4103 = vmatprep.mubr.msk.f32.mxu1 %vm2897_vm10, %v2698_v51  ;;  %vm4079_vm10 = vcmask 15368  }
 0x3a9   :  { %v2890_v5 = vpop.permute.xlu1 %2889 }
 0x3aa   :  { %3382 = vmatmul.mubr.f32.gmra.mrb[26].mxu1 %v2697_v31  ;;  %v2885_v28 = vpop.permute.xlu0 %2884 }
 0x3af   :  { %v2895_v12 = vpop.permute.xlu0 %2894 }
 0x406   :  { %v4136_v22 = vpop.f32.mrb[10].mxu0 }
 0x407   :  { %v4137_v8 = vpop.f32.mrb[11].mxu0 }
 0x408   :  { %v4138_v61 = vadd.f32 %v4137_v8, %v4136_v22 }
 0x40a   :  { %v4139_v0 = vpop.f32.mrb[12].mxu0  ;;  %v2974_v1 = vadd.f32 %v4138_v61, %v2885_v28 }
 0x40b   :  { %v4140_v23 = vpop.f32.mrb[13].mxu0 }
 0x40c   :  { %v4141_v54 = vadd.f32 %v4140_v23, %v4139_v0 }
 0x40e   :  { %v4142_v17 = vpop.f32.mrb[14].mxu0  ;;  %v2979_v55 = vadd.f32 %v4141_v54, %v2890_v5  ;;  %v7310_v5 = vld [vmem:[%s7773_s5 + $0x60] sm:$0xff] }
 0x40f   :  { %v4143_v18 = vpop.f32.mrb[15].mxu0 }
 0x410   :  { %v4144_v4 = vadd.f32 %v4143_v18, %v4142_v17 }
 0x412   :  { %v2984_v46 = vadd.f32 %v4144_v4, %v2895_v12  ;;  %v7324_v12 = vld [vmem:[%s7773_s5 + $0x90] sm:$0xff] }
 0x414   :  { %v4177_v37 = vpop.f32.mrb[10].mxu1 }
 0x415   :  { %v4178_v52 = vpop.f32.mrb[11].mxu1 }
 0x416   :  { %v4179_v59 = vadd.f32 %v4178_v52, %v4177_v37 }
 0x418   :  { %v3054_v45 = vadd.f32 %v4179_v59, %v2974_v1  ;;  %v4180_v50 = vpop.f32.mrb[12].mxu1  ;;  %v7298_v1 = vld [vmem:[%s7773_s5 + $0x30] sm:$0xff]  ;;  %v7303_v59 = vld [vmem:[%s7773_s5] sm:$0xff] }
 0x419   :  { %v4181_v40 = vpop.f32.mrb[13].mxu1 }
 0x41a   :  { %v4182_v25 = vadd.f32 %v4181_v40, %v4180_v50  ;;  %v7315_v40 = vld [vmem:[%s7773_s5 + $0x18] sm:$0xff] }
 0x41c   :  { %v3059_v56 = vadd.f32 %v4182_v25, %v2979_v55  ;;  %v4183_v35 = vpop.f32.mrb[14].mxu1 }
 0x41d   :  { %v4184_v42 = vpop.f32.mrb[15].mxu1 }
 0x41e   :  { %v4185_v16 = vadd.f32 %v4184_v42, %v4183_v35  ;;  %v7329_v42 = vld [vmem:[%s7773_s5 + $0x48] sm:$0xff] }
 0x420   :  { %v3064_v24 = vadd.f32 %v4185_v16, %v2984_v46 }
 0x427   :  { %v4218_v43 = vpop.f32.mrb[16].mxu0 }
 0x428   :  { %v4219_v2 = vpop.f32.mrb[17].mxu0 }
 0x429   :  { %v4220_v48 = vadd.f32 %v4219_v2, %v4218_v43 }
 0x42b   :  { %v3134_v20 = vadd.f32 %v4220_v48, %v3054_v45  ;;  %v4221_v3 = vpop.f32.mrb[18].mxu0  ;;  %v7340_v48 = vld [vmem:[%s7773_s5 + $0x8] sm:$0xff] }
 0x42c   :  { %v4222_v38 = vpop.f32.mrb[19].mxu0 }
 0x42d   :  { %v4223_v53 = vadd.f32 %v4222_v38, %v4221_v3 }
 0x42f   :  { %v3139_v60 = vadd.f32 %v4223_v53, %v3059_v56  ;;  %v4224_v29 = vpop.f32.mrb[20].mxu0 }
 0x430   :  { %v4225_v44 = vpop.f32.mrb[21].mxu0 }
 0x431   :  { %v4226_v6 = vadd.f32 %v4225_v44, %v4224_v29  ;;  %v7355_v29 = vld [vmem:[%s7773_s5 + $0x50] sm:$0xff]  ;;  %v7360_v44 = vld [vmem:[%s7773_s5 + $0xa8] sm:$0xff] }
 0x433   :  { %v3144_v19 = vadd.f32 %v4226_v6, %v3064_v24 }
 0x434   :  { %v4259_v9 = vpop.f32.mrb[16].mxu1 }
 0x435   :  { %v4260_v7 = vpop.f32.mrb[17].mxu1 }
 0x436   :  { %v4261_v26 = vadd.f32 %v4260_v7, %v4259_v9 }
 0x438   :  { %v3214_v63 = vadd.f32 %v4261_v26, %v3134_v20  ;;  %v4262_v34 = vpop.f32.mrb[18].mxu1  ;;  %v7345_v20 = vld [vmem:[%s7773_s5 + $0x78] sm:$0xff]  ;;  %v7370_v26 = vld [vmem:[%s7773_s5 + $0x80] sm:$0xff] }
 0x439   :  { %v4263_v36 = vpop.f32.mrb[19].mxu1 }
 0x43a   :  { %v4264_v15 = vadd.f32 %v4263_v36, %v4262_v34 }
 0x43c   :  { %v3219_v47 = vadd.f32 %v4264_v15, %v3139_v60  ;;  %v4265_v30 = vpop.f32.mrb[20].mxu1 }
 0x43d   :  { %v4266_v27 = vpop.f32.mrb[21].mxu1 }
 0x43e   :  { %v4267_v49 = vadd.f32 %v4266_v27, %v4265_v30  ;;  %v7385_v30 = vld [vmem:[%s7773_s5 + $0xb0] sm:$0xff]  ;;  %v7390_v27 = vld [vmem:[%s7773_s5 + $0xd8] sm:$0xff] }
 0x440   :  { %v3224_v33 = vadd.f32 %v4267_v49, %v3144_v19 }
 0x46b   :  { %v4300_v57 = vpop.f32.mrb[22].mxu0 }
 0x46c   :  { %v4301_v62 = vpop.f32.mrb[23].mxu0 }
 0x46d   :  { %v4302_v32 = vadd.f32 %v4301_v62, %v4300_v57 }
 0x46f   :  { %v4303_v41 = vpop.f32.mrb[24].mxu0  ;;  %v3294_v10 = vadd.f32 %v4302_v32, %v3214_v63  ;;  %v7375_v63 = vld [vmem:[%s7773_s5 + $0xc0] sm:$0xff]  ;;  %v7400_v32 = vld [vmem:[%s7773_s5 + $0xc8] sm:$0xff] }
 0x470   :  { %v4304_v14 = vpop.f32.mrb[25].mxu0 }
 0x471   :  { %v4305_v11 = vadd.f32 %v4304_v14, %v4303_v41  ;;  %v7405_v41 = vld [vmem:[%s7773_s5 + $0x20] sm:$0xff] }
 0x473   :  { %v4306_v13 = vpop.f32.mrb[26].mxu0  ;;  %v3299_v39 = vadd.f32 %v4305_v11, %v3219_v47 }
 0x474   :  { %v4307_v51 = vpop.f32.mrb[27].mxu0 }
 0x475   :  { %v3373_v58 = vpop.f32.mrb[22].mxu1  ;;  %v4308_v22 = vadd.f32 %v4307_v51, %v4306_v13 }
 0x476   :  { %v3374_v21 = vadd.f32 %v3373_v58, %v3294_v10  ;;  %v3375_v31 = vpop.f32.mrb[23].mxu1  ;;  %v7416_v58 = vld [vmem:[%s7773_s5 + $0xe0] sm:$0xff] }
 0x477   :  { %v3304_v0 = vadd.f32 %v4308_v22, %v3224_v33 }
 0x478   :  { %v7286_v8 = vmax.f32 %v3374_v21, 0.0 }
 0x479   :  { %v3378_v61 = vpop.f32.mrb[24].mxu1 }
 0x47a   :  { %v3379_v23 = vadd.f32 %v3378_v61, %v3299_v39  ;;  %3754 = vrot.lane.b32.xlu1 %v7286_v8, %s5341_s3  ;;  %v3380_v54 = vpop.f32.mrb[25].mxu1  ;;  %v7421_v39 = vld [vmem:[%s7773_s5 + $0x38] sm:$0xff] }
 0x47c   :  { %v7289_v17 = vmax.f32 %v3379_v23, 0.0  ;;  %v3392_v23 = vld [vmem:[%s7773_s5 + $0x10] sm:$0xf] }
 0x47d   :  { %v3383_v18 = vpop.f32.mrb[26].mxu1 }
 0x47e   :  { %v3384_v4 = vadd.f32 %v3383_v18, %v3304_v0  ;;  %3756 = vrot.lane.b32.xlu0 %v7289_v17, %s5341_s3  ;;  %v3385_v37 = vpop.f32.mrb[27].mxu1  ;;  %v7432_v0 = vld [vmem:[%s7773_s5 + $0x68] sm:$0xff] }
 0x480   :  { %v7292_v28 = vmax.f32 %v3384_v4, 0.0 }
 0x482   :  { %3758 = vrot.lane.b32.xlu1 %v7292_v28, %s5341_s3 }
 0x4ec   :  { %v3755_v52 = vpop.permute.xlu1 %3754 }
 0x4ed   :  { %v3769_v45 = vmul.f32 %v3755_v52, %v7298_v1  ;;  %v3763_v50 = vmul.f32 %v3755_v52, %v7303_v59  ;;  %v3775_v56 = vmul.f32 %v3755_v52, %v7310_v5  ;;  %v3766_v35 = vmul.f32 %v3755_v52, %v7315_v40 }
 0x4ee   :  { %v3781_v24 = vmul.f32 %v3755_v52, %v7324_v12  ;;  %v3772_v43 = vmul.f32 %v3755_v52, %v7329_v42  ;;  %v3778_v60 = vmul.f32 %v3755_v52, %v7345_v20  ;;  %v3784_v7 = vmul.f32 %v3755_v52, %v7360_v44 }
 0x4ef   :  { %v3811_v55 = vsel %vm3452_vm11, %v3769_v45, 0.0  ;;  %v3793_v25 = vsel %vm3452_vm11, %v3763_v50, 0.0  ;;  %v3829_v46 = vsel %vm3452_vm11, %v3775_v56, 0.0  ;;  %v3802_v16 = vsel %vm3452_vm11, %v3766_v35, 0.0  ;;  %v3398_v45 = vld [vmem:[%s7773_s5 + $0x40] sm:$0xf] }
 0x4f0   :  { %3812 = vadd.xlane.f32.xlu1 %v3811_v55  ;;  %3794 = vadd.xlane.f32.xlu0 %v3793_v25  ;;  %v7335_v2 = vpop.permute.xlu0 %3756  ;;  %v3847_v3 = vsel %vm3452_vm11, %v3781_v24, 0.0  ;;  %v3820_v38 = vsel %vm3452_vm11, %v3772_v43, 0.0  ;;  %v3838_v19 = vsel %vm3452_vm11, %v3778_v60, 0.0  ;;  %v3856_v36 = vsel %vm3452_vm11, %v3784_v7, 0.0  ;;  %v3395_v35 = vld [vmem:[%s7773_s5 + $0x28] sm:$0xf] }
 0x4f1   :  { %v3764_v53 = vmul.f32 %v7335_v2, %v7340_v48  ;;  %v3773_v9 = vmul.f32 %v7335_v2, %v7355_v29  ;;  %v3779_v15 = vmul.f32 %v7335_v2, %v7370_v26  ;;  %v3787_v47 = vmul.f32 %v3755_v52, %v7375_v63  ;;  %v7483_v7 = vld [vmem:[%s7773_s5 + $0xd0] sm:$0xf] }
 0x4f2   :  { %v3785_v57 = vmul.f32 %v7335_v2, %v7385_v30  ;;  %v3790_v62 = vmul.f32 %v3755_v52, %v7390_v27  ;;  %v3788_v11 = vmul.f32 %v7335_v2, %v7400_v32  ;;  %v3767_v13 = vmul.f32 %v7335_v2, %v7405_v41  ;;  %v7444_v52 = vld [vmem:[%s7773_s5 + $0x98] sm:$0xff] }
 0x4f3   :  { %v3796_v6 = vsel %vm3452_vm11, %v3764_v53, 0.0  ;;  %v3823_v34 = vsel %vm3452_vm11, %v3773_v9, 0.0  ;;  %v3841_v49 = vsel %vm3452_vm11, %v3779_v15, 0.0  ;;  %v3865_v33 = vsel %vm3452_vm11, %v3787_v47, 0.0  ;;  %v7478_v9 = vld [vmem:[%s7773_s5 + $0x88] sm:$0xf] }
 0x4f4   :  { %3830 = vadd.xlane.f32.xlu1 %v3829_v46  ;;  %3803 = vadd.xlane.f32.xlu0 %v3802_v16  ;;  %v3859_v10 = vsel %vm3452_vm11, %v3785_v57, 0.0  ;;  %v3874_v14 = vsel %vm3452_vm11, %v3790_v62, 0.0  ;;  %v3868_v21 = vsel %vm3452_vm11, %v3788_v11, 0.0  ;;  %v3805_v51 = vsel %vm3452_vm11, %v3767_v13, 0.0  ;;  %v3759_v61 = vpop.permute.xlu1 %3758  ;;  %v7459_v46 = vld [vmem:[%s7773_s5 + $0x70] sm:$0xf] }
 0x4f5   :  { %v3791_v31 = vmul.f32 %v7335_v2, %v7416_v58  ;;  %v3770_v22 = vmul.f32 %v7335_v2, %v7421_v39  ;;  %v3776_v4 = vmul.f32 %v7335_v2, %v7432_v0  ;;  %v3765_v37 = vmul.f32 %v3759_v61, %v3392_v23 }
 0x4f6   :  { %v3782_v25 = vmul.f32 %v7335_v2, %v7444_v52  ;;  %v3771_v56 = vmul.f32 %v3759_v61, %v3398_v45  ;;  %v3768_v43 = vmul.f32 %v3759_v61, %v3395_v35  ;;  %v3401_v2 = vld [vmem:[%s7773_s5 + $0x58] sm:$0xf]  ;;  %v3780_v15 = vmul.f32 %v3759_v61, %v7478_v9 }
 0x4f7   :  { %v3877_v54 = vsel %vm3452_vm11, %v3791_v31, 0.0  ;;  %v3814_v18 = vsel %vm3452_vm11, %v3770_v22, 0.0  ;;  %v3832_v50 = vsel %vm3452_vm11, %v3776_v4, 0.0  ;;  %v3799_v55 = vsel %vm3459_vm12, %v3765_v37, 0.0 }
 0x4f8   :  { %3848 = vadd.xlane.f32.xlu1 %v3847_v3  ;;  %3821 = vadd.xlane.f32.xlu0 %v3820_v38  ;;  %v3850_v16 = vsel %vm3452_vm11, %v3782_v25, 0.0  ;;  %v3817_v24 = vsel %vm3459_vm12, %v3771_v56, 0.0  ;;  %v3777_v3 = vmul.f32 %v3759_v61, %v7459_v46  ;;  %v7470_v38 = vld [vmem:[%s7773_s5 + $0xa0] sm:$0xf]  ;;  %v3808_v53 = vsel %vm3459_vm12, %v3768_v43, 0.0 }
 0x4f9   :  { %v3789_v47 = vmul.f32 %v3759_v61, %v7483_v7  ;;  %v3423_v22 = vmul.f32 %v7340_v48, %v7289_v17  ;;  %v3428_v4 = vmul.f32 %v7298_v1, %v7286_v8  ;;  %v3432_v1 = vmul.f32 %v7355_v29, %v7289_v17 }
 0x4fa   :  { %v3835_v60 = vsel %vm3459_vm12, %v3777_v3, 0.0  ;;  %v3433_v29 = vmul.f32 %v3401_v2, %v7292_v28  ;;  %v3436_v43 = vmul.f32 %v7459_v46, %v7292_v28  ;;  %v3437_v46 = vmul.f32 %v7345_v20, %v7286_v8 }
 0x4fb   :  { %v3871_v57 = vsel %vm3459_vm12, %v3789_v47, 0.0  ;;  %v3472_v48 = vsel %vm3452_vm11, %v3428_v4, 0.0 }
 0x4fc   :  { %3797 = vadd.xlane.f32.xlu1 %v3796_v6  ;;  %3839 = vadd.xlane.f32.xlu0 %v3838_v19  ;;  %v3774_v6 = vmul.f32 %v3759_v61, %v3401_v2  ;;  %v3783_v19 = vmul.f32 %v3759_v61, %v7470_v38  ;;  %v3487_v3 = vsel %vm3459_vm12, %v3433_v29, 0.0 }
 0x500   :  { %3824 = vadd.xlane.f32.xlu1 %v3823_v34  ;;  %3857 = vadd.xlane.f32.xlu0 %v3856_v36  ;;  %v3826_v34 = vsel %vm3459_vm12, %v3774_v6, 0.0  ;;  %v3853_v36 = vsel %vm3459_vm12, %v3783_v19, 0.0  ;;  %v3440_v6 = vmul.f32 %v7324_v12, %v7286_v8  ;;  %v3499_v19 = vsel %vm3452_vm11, %v3437_v46, 0.0 }
 0x501   :  { %v3441_v12 = vmul.f32 %v7444_v52, %v7289_v17 }
 0x503   :  { %v3511_v47 = vsel %vm3452_vm11, %v3441_v12, 0.0 }
 0x504   :  { %3842 = vadd.xlane.f32.xlu1 %v3841_v49  ;;  %3866 = vadd.xlane.f32.xlu0 %v3865_v33  ;;  %v7492_v49 = vld [vmem:[%s7773_s5 + $0xb8] sm:$0xf]  ;;  %v3844_v33 = vsel %vm3459_vm12, %v3780_v15, 0.0  ;;  %v3444_v15 = vmul.f32 %v7385_v30, %v7289_v17  ;;  %v3446_v30 = vmul.f32 %v7375_v63, %v7286_v8 }
 0x505   :  { %v3786_v62 = vmul.f32 %v3759_v61, %v7492_v49 }
 0x507   :  { %v3862_v11 = vsel %vm3459_vm12, %v3786_v62, 0.0  ;;  %v3450_v62 = vmul.f32 %v7416_v58, %v7289_v17 }
 0x508   :  { %3860 = vadd.xlane.f32.xlu1 %v3859_v10  ;;  %3875 = vadd.xlane.f32.xlu0 %v3874_v14  ;;  %v3422_v10 = vmul.f32 %v7303_v59, %v7286_v8  ;;  %v7502_v14 = vld [vmem:[%s7773_s5 + $0xe8] sm:$0xf] }
 0x50a   :  { %v3453_v13 = vsel %vm3452_vm11, %v3422_v10, 0.0  ;;  %v3526_v10 = vsel %vm3452_vm11, %v3446_v30, 0.0 }
 0x50c   :  { %3869 = vadd.xlane.f32.xlu1 %v3868_v21  ;;  %3806 = vadd.xlane.f32.xlu0 %v3805_v51  ;;  %v3792_v21 = vmul.f32 %v3759_v61, %v7502_v14  ;;  %v3425_v51 = vmul.f32 %v7315_v40, %v7286_v8  ;;  %v3426_v40 = vmul.f32 %v7405_v41, %v7289_v17 }
 0x50d   :  { %v3429_v41 = vmul.f32 %v7421_v39, %v7289_v17 }
 0x50e   :  { %v3880_v59 = vsel %vm3459_vm12, %v3792_v21, 0.0  ;;  %v3463_v31 = vsel %vm3452_vm11, %v3425_v51, 0.0  ;;  %v3466_v37 = vsel %vm3452_vm11, %v3426_v40, 0.0  ;;  %v3451_v21 = vmul.f32 %v7502_v14, %v7292_v28 }
 0x50f   :  { %v3475_v56 = vsel %vm3452_vm11, %v3429_v41, 0.0 }
 0x510   :  { %3878 = vadd.xlane.f32.xlu1 %v3877_v54  ;;  %3815 = vadd.xlane.f32.xlu0 %v3814_v18  ;;  %v3424_v54 = vmul.f32 %v3392_v23, %v7292_v28  ;;  %v3456_v18 = vsel %vm3452_vm11, %v3423_v22, 0.0  ;;  %v3427_v23 = vmul.f32 %v3395_v35, %v7292_v28  ;;  %v3484_v35 = vsel %vm3452_vm11, %v3432_v1, 0.0 }
 0x512   :  { %v3460_v61 = vsel %vm3459_vm12, %v3424_v54, 0.0 }
 0x514   :  { %3833 = vadd.xlane.f32.xlu0 %v3832_v50  ;;  %3800 = vadd.xlane.f32.xlu1 %v3799_v55  ;;  %v3430_v50 = vmul.f32 %v3398_v45, %v7292_v28  ;;  %v3469_v55 = vsel %vm3459_vm12, %v3427_v23, 0.0  ;;  %v3431_v45 = vmul.f32 %v7329_v42, %v7286_v8  ;;  %v3496_v42 = vsel %vm3459_vm12, %v3436_v43, 0.0 }
 0x516   :  { %v3478_v25 = vsel %vm3459_vm12, %v3430_v50, 0.0 }
 0x518   :  { %3851 = vadd.xlane.f32.xlu0 %v3850_v16  ;;  %3818 = vadd.xlane.f32.xlu1 %v3817_v24  ;;  %v3434_v16 = vmul.f32 %v7310_v5, %v7286_v8  ;;  %v3481_v24 = vsel %vm3452_vm11, %v3431_v45, 0.0  ;;  %v3435_v5 = vmul.f32 %v7432_v0, %v7289_v17  ;;  %v3508_v0 = vsel %vm3452_vm11, %v3440_v6, 0.0 }
 0x51a   :  { %v3490_v39 = vsel %vm3452_vm11, %v3434_v16, 0.0 }
 0x51c   :  { %3809 = vadd.xlane.f32.xlu0 %v3808_v53  ;;  %3836 = vadd.xlane.f32.xlu1 %v3835_v60  ;;  %v3438_v53 = vmul.f32 %v7370_v26, %v7289_v17  ;;  %v3493_v60 = vsel %vm3452_vm11, %v3435_v5, 0.0  ;;  %v3439_v26 = vmul.f32 %v7478_v9, %v7292_v28  ;;  %v3520_v9 = vsel %vm3452_vm11, %v3444_v15, 0.0 }
 0x51e   :  { %v3502_v2 = vsel %vm3452_vm11, %v3438_v53, 0.0 }
 0x520   :  { %3827 = vadd.xlane.f32.xlu0 %v3826_v34  ;;  %3854 = vadd.xlane.f32.xlu1 %v3853_v36  ;;  %v3442_v34 = vmul.f32 %v7470_v38, %v7292_v28  ;;  %v3505_v36 = vsel %vm3459_vm12, %v3439_v26, 0.0  ;;  %v3443_v38 = vmul.f32 %v7360_v44, %v7286_v8  ;;  %v3538_v44 = vsel %vm3452_vm11, %v3450_v62, 0.0 }
 0x522   :  { %v3514_v20 = vsel %vm3459_vm12, %v3442_v34, 0.0 }
 0x524   :  { %3845 = vadd.xlane.f32.xlu0 %v3844_v33  ;;  %3872 = vadd.xlane.f32.xlu1 %v3871_v57  ;;  %v3447_v33 = vmul.f32 %v7400_v32, %v7289_v17  ;;  %v3517_v57 = vsel %vm3452_vm11, %v3443_v38, 0.0  ;;  %v3449_v32 = vmul.f32 %v7390_v27, %v7286_v8  ;;  %v3445_v17 = vmul.f32 %v7492_v49, %v7292_v28 }
 0x525   :  { %v3541_v8 = vsel %vm3459_vm12, %v3451_v21, 0.0 }
 0x526   :  { %v3529_v52 = vsel %vm3452_vm11, %v3447_v33, 0.0  ;;  %v3523_v58 = vsel %vm3459_vm12, %v3445_v17, 0.0 }
 0x528   :  { %3863 = vadd.xlane.f32.xlu0 %v3862_v11  ;;  %3454 = vadd.xlane.f32.xlu1 %v3453_v13  ;;  %v3448_v11 = vmul.f32 %v7483_v7, %v7292_v28  ;;  %v3535_v13 = vsel %vm3452_vm11, %v3449_v32, 0.0  ;;  %vm4081_vm11 = vcmask 9224  }
 0x52a   :  { %v3532_v63 = vsel %vm3459_vm12, %v3448_v11, 0.0 }
 0x52c   :  { %3881 = vadd.xlane.f32.xlu0 %v3880_v59  ;;  %3464 = vadd.xlane.f32.xlu1 %v3463_v31 }
 0x530   :  { %3457 = vadd.xlane.f32.xlu0 %v3456_v18  ;;  %3461 = vadd.xlane.f32.xlu1 %v3460_v61 }
 0x534   :  { %3467 = vadd.xlane.f32.xlu0 %v3466_v37  ;;  %3473 = vadd.xlane.f32.xlu1 %v3472_v48  ;;  %v3574_v37 = vlaneseq }
 0x536   :  { %v3575_v50 = vand.u32 127, %v3574_v37 }
 0x538   :  { %3470 = vadd.xlane.f32.xlu0 %v3469_v55  ;;  %3479 = vadd.xlane.f32.xlu1 %v3478_v25  ;;  %v3580_v41 = vadd.s32 4294967288, %v3575_v50  ;;  %v3587_v1 = vadd.s32 4294967280, %v3575_v50 }
 0x53c   :  { %3476 = vadd.xlane.f32.xlu0 %v3475_v56  ;;  %3485 = vadd.xlane.f32.xlu1 %v3484_v35  ;;  %v3577_v56 = vshrl.u32 %v3574_v37, 7 }
 0x53e   :  { %v7611_v16 = vsub.s32 %v3580_v41, %v3577_v56 }
 0x540   :  { %3482 = vadd.xlane.f32.xlu0 %v3481_v24  ;;  %3491 = vadd.xlane.f32.xlu1 %v3490_v39  ;;  %v7613_v24 = vsub.s32 %v3587_v1, %v3577_v56  ;;  %v7615_v39 = vsub.s32 %v3575_v50, %v3577_v56 }
 0x544   :  { %3488 = vadd.xlane.f32.xlu0 %v3487_v3  ;;  %3497 = vadd.xlane.f32.xlu1 %v3496_v42 }
 0x548   :  { %3494 = vadd.xlane.f32.xlu0 %v3493_v60  ;;  %3503 = vadd.xlane.f32.xlu1 %v3502_v2 }
 0x54c   :  { %3500 = vadd.xlane.f32.xlu0 %v3499_v19  ;;  %3509 = vadd.xlane.f32.xlu1 %v3508_v0 }
 0x550   :  { %3506 = vadd.xlane.f32.xlu0 %v3505_v36  ;;  %3515 = vadd.xlane.f32.xlu1 %v3514_v20 }
 0x554   :  { %3512 = vadd.xlane.f32.xlu0 %v3511_v47  ;;  %3521 = vadd.xlane.f32.xlu1 %v3520_v9 }
 0x558   :  { %3518 = vadd.xlane.f32.xlu0 %v3517_v57  ;;  %3530 = vadd.xlane.f32.xlu1 %v3529_v52 }
 0x55c   :  { %3527 = vadd.xlane.f32.xlu0 %v3526_v10  ;;  %3539 = vadd.xlane.f32.xlu1 %v3538_v44 }
 0x560   :  { %3536 = vadd.xlane.f32.xlu0 %v3535_v13  ;;  %3533 = vadd.xlane.f32.xlu1 %v3532_v63 }
 0x564   :  { %3524 = vadd.xlane.f32.xlu0 %v3523_v58 }
 0x568   :  { %3542 = vadd.xlane.f32.xlu0 %v3541_v8 }
 0x57d   :  { %v3795_v27 = vpop.xlane.xlu0 %3794  ;;  %v3813_v7 = vpop.xlane.xlu1 %3812 }
 0x57e   :  { %v3916_v53 = vrot.slane %v3795_v27, %v7615_v39  ;;  %v3944_v20 = vrot.slane %v3813_v7, %v7615_v39 }
 0x581   :  { %v3804_v51 = vpop.xlane.xlu0 %3803  ;;  %v7591_v59 = vpop.xlane.xlu1 %3830 }
 0x582   :  { %v3930_v60 = vrot.slane %v3804_v51, %v7615_v39  ;;  %v3972_v11 = vrot.slane %v7591_v59, %v7615_v39 }
 0x585   :  { %v3822_v31 = vpop.xlane.xlu0 %3821  ;;  %v7593_v22 = vpop.xlane.xlu1 %3848 }
 0x586   :  { %v3958_v47 = vrot.slane %v3822_v31, %v7615_v39 }
 0x589   :  { %v7595_v49 = vpop.xlane.xlu0 %3839  ;;  %v3798_v54 = vpop.xlane.xlu1 %3797 }
 0x58a   :  { %v3920_v3 = vrot.slane %v3798_v54, %v7611_v16  ;;  %v3986_v17 = vrot.slane %v7595_v49, %v7615_v39 }
 0x58c   :  { %v3921_v0 = vsel %vm3585_vm13, %v3920_v3, %v3916_v53 }
 0x58d   :  { %v7597_v18 = vpop.xlane.xlu0 %3857  ;;  %v3825_v61 = vpop.xlane.xlu1 %3824 }
 0x58e   :  { %v3962_v26 = vrot.slane %v3825_v61, %v7611_v16  ;;  %v4000_v61 = vrot.slane %v7593_v22, %v7615_v39 }
 0x590   :  { %v3963_v62 = vsel %vm3585_vm13, %v3962_v26, %v3958_v47 }
 0x591   :  { %v7599_v40 = vpop.xlane.xlu0 %3866  ;;  %v7601_v28 = vpop.xlane.xlu1 %3842 }
 0x592   :  { %v3990_v10 = vrot.slane %v7601_v28, %v7611_v16  ;;  %v4028_v3 = vrot.slane %v7599_v40, %v7615_v39 }
 0x594   :  { %v3991_v59 = vsel %vm3585_vm13, %v3990_v10, %v3986_v17 }
 0x595   :  { %v7603_v14 = vpop.xlane.xlu0 %3875  ;;  %v7605_v4 = vpop.xlane.xlu1 %3860 }
 0x596   :  { %v4018_v31 = vrot.slane %v7605_v4, %v7611_v16 }
 0x599   :  { %v3807_v48 = vpop.xlane.xlu0 %3806  ;;  %v7607_v23 = vpop.xlane.xlu1 %3869 }
 0x59a   :  { %v3934_v42 = vrot.slane %v3807_v48, %v7611_v16  ;;  %v4014_v48 = vrot.slane %v7597_v18, %v7615_v39  ;;  %v4032_v56 = vrot.slane %v7607_v23, %v7611_v16 }
 0x59c   :  { %v3935_v34 = vsel %vm3585_vm13, %v3934_v42, %v3930_v60  ;;  %v4019_v22 = vsel %vm3585_vm13, %v4018_v31, %v4014_v48  ;;  %v4042_v42 = vrot.slane %v7603_v14, %v7615_v39 }
 0x59d   :  { %v3816_v55 = vpop.xlane.xlu0 %3815  ;;  %v7609_v25 = vpop.xlane.xlu1 %3878 }
 0x59e   :  { %v3948_v6 = vrot.slane %v3816_v55, %v7611_v16  ;;  %v4046_v18 = vrot.slane %v7609_v25, %v7611_v16 }
 0x5a0   :  { %v3949_v57 = vsel %vm3585_vm13, %v3948_v6, %v3944_v20 }
 0x5a1   :  { %v3834_v35 = vpop.xlane.xlu0 %3833  ;;  %v3801_v45 = vpop.xlane.xlu1 %3800 }
 0x5a2   :  { %v3925_v5 = vrot.slane %v3801_v45, %v7613_v24  ;;  %v3976_v52 = vrot.slane %v3834_v35, %v7611_v16 }
 0x5a4   :  { %v3926_v12 = vsel %vm3592_vm14, %v3925_v5, %v3921_v0  ;;  %v3977_v27 = vsel %vm3585_vm13, %v3976_v52, %v3972_v11 }
 0x5a5   :  { %v3852_v29 = vpop.xlane.xlu0 %3851  ;;  %v3819_v43 = vpop.xlane.xlu1 %3818 }
 0x5a6   :  { %v3953_v36 = vrot.slane %v3819_v43, %v7613_v24  ;;  %v4004_v7 = vrot.slane %v3852_v29, %v7611_v16 }
 0x5a8   :  { %v3954_v44 = vsel %vm3592_vm14, %v3953_v36, %v3949_v57  ;;  %v4005_v41 = vsel %vm3585_vm13, %v4004_v7, %v4000_v61 }
 0x5a9   :  { %v3810_v2 = vpop.xlane.xlu0 %3809  ;;  %v3837_v46 = vpop.xlane.xlu1 %3836 }
 0x5aa   :  { %v3939_v19 = vrot.slane %v3810_v2, %v7613_v24  ;;  %v3981_v32 = vrot.slane %v3837_v46, %v7613_v24  ;;  %v4033_v2 = vsel %vm3585_vm13, %v4032_v56, %v4028_v3  ;;  %v4047_v46 = vsel %vm3585_vm13, %v4046_v18, %v4042_v42 }
 0x5ac   :  { %v3940_v15 = vsel %vm3592_vm14, %v3939_v19, %v3935_v34  ;;  %v3982_v54 = vsel %vm3592_vm14, %v3981_v32, %v3977_v27 }
 0x5ad   :  { %v4053_v9 = vsel %vm3720_vm15, %v3940_v15, %v3926_v12  ;;  %v3828_v38 = vpop.xlane.xlu0 %3827  ;;  %v3855_v33 = vpop.xlane.xlu1 %3854 }
 0x5ae   :  { %v3967_v30 = vrot.slane %v3828_v38, %v7613_v24  ;;  %v4054_v63 = vsel %vm3722_vm0, %v3954_v44, %v4053_v9  ;;  %v4009_v49 = vrot.slane %v3855_v33, %v7613_v24 }
 0x5b0   :  { %v3968_v13 = vsel %vm3592_vm14, %v3967_v30, %v3963_v62  ;;  %v4010_v35 = vsel %vm3592_vm14, %v4009_v49, %v4005_v41 }
 0x5b1   :  { %v4055_v58 = vsel %vm3724_vm1, %v3968_v13, %v4054_v63  ;;  %v3846_v21 = vpop.xlane.xlu0 %3845  ;;  %v3873_v8 = vpop.xlane.xlu1 %3872 }
 0x5b2   :  { %v3995_v51 = vrot.slane %v3846_v21, %v7613_v24  ;;  %v4056_v37 = vsel %vm3726_vm2, %v3982_v54, %v4055_v58  ;;  %v4037_v45 = vrot.slane %v3873_v8, %v7613_v24 }
 0x5b4   :  { %v3996_v28 = vsel %vm3592_vm14, %v3995_v51, %v3991_v59  ;;  %v4038_v6 = vsel %vm3592_vm14, %v4037_v45, %v4033_v2 }
 0x5b5   :  { %v3864_v50 = vpop.xlane.xlu0 %3863  ;;  %v7662_v55 = vpop.xlane.xlu1 %3454  ;;  %v4057_v4 = vsel %vm3728_vm3, %v3996_v28, %v4056_v37 }
 0x5b6   :  { %v4023_v1 = vrot.slane %v3864_v50, %v7613_v24  ;;  %v4058_v43 = vsel %vm3730_vm4, %v4010_v35, %v4057_v4  ;;  %v3579_v27 = vrot.slane %v7662_v55, %v7615_v39 }
 0x5b8   :  { %v4024_v29 = vsel %vm3592_vm14, %v4023_v1, %v4019_v22 }
 0x5b9   :  { %v3882_v5 = vpop.xlane.xlu0 %3881  ;;  %v3465_v53 = vpop.xlane.xlu1 %3464  ;;  %v4059_v23 = vsel %vm3732_vm5, %v4024_v29, %v4058_v43 }
 0x5ba   :  { %v4051_v25 = vrot.slane %v3882_v5, %v7613_v24  ;;  %v4063_v60 = vsel %vm3737_vm6, %v4059_v23, 0.0  ;;  %v3597_v7 = vrot.slane %v3465_v53, %v7615_v39 }
 0x5bb   :  { %4064 = vadd.xlane.f32.xlu1 %v4063_v60 }
 0x5bc   :  { %v4052_v40 = vsel %vm3592_vm14, %v4051_v25, %v4047_v46 }
 0x5bd   :  { %v3458_v19 = vpop.xlane.xlu0 %3457  ;;  %v3462_v14 = vpop.xlane.xlu1 %3461  ;;  %v4060_v0 = vsel %vm3720_vm15, %v4052_v40, %v4038_v6 }
 0x5be   :  { %v4066_v26 = vsel %vm3741_vm7, %v4060_v0, 0.0  ;;  %v3584_v63 = vrot.slane %v3458_v19, %v7611_v16  ;;  %v3591_v59 = vrot.slane %v3462_v14, %v7613_v24 }
 0x5bf   :  { %4067 = vadd.xlane.f32.xlu0 %v4066_v26 }
 0x5c0   :  { %v3586_v49 = vsel %vm3585_vm13, %v3584_v63, %v3579_v27 }
 0x5c1   :  { %v3468_v34 = vpop.xlane.xlu0 %3467  ;;  %v3474_v36 = vpop.xlane.xlu1 %3473  ;;  %v3593_v35 = vsel %vm3592_vm14, %v3591_v59, %v3586_v49 }
 0x5c2   :  { %v3601_v17 = vrot.slane %v3468_v34, %v7611_v16  ;;  %v3611_v31 = vrot.slane %v3474_v36, %v7615_v39 }
 0x5c4   :  { %v3602_v61 = vsel %vm3585_vm13, %v3601_v17, %v3597_v7 }
 0x5c5   :  { %v3471_v20 = vpop.xlane.xlu0 %3470  ;;  %v3480_v12 = vpop.xlane.xlu1 %3479 }
 0x5c6   :  { %v3606_v51 = vrot.slane %v3471_v20, %v7613_v24  ;;  %v3620_v1 = vrot.slane %v3480_v12, %v7613_v24 }
 0x5c8   :  { %v3607_v41 = vsel %vm3592_vm14, %v3606_v51, %v3602_v61  ;;  %v3421_v51 = vld [vmem:[%s7774_s6 + $0x8] sm:$0x3] }
 0x5c9   :  { %v3477_v15 = vpop.xlane.xlu0 %3476  ;;  %v3486_v47 = vpop.xlane.xlu1 %3485  ;;  %v3721_v25 = vsel %vm3720_vm15, %v3607_v41, %v3593_v35 }
 0x5ca   :  { %v3615_v8 = vrot.slane %v3477_v15, %v7611_v16  ;;  %v3629_v22 = vrot.slane %v3486_v47, %v7611_v16 }
 0x5cc   :  { %v3616_v48 = vsel %vm3585_vm13, %v3615_v8, %v3611_v31 }
 0x5cd   :  { %v3483_v9 = vpop.xlane.xlu0 %3482  ;;  %v3492_v38 = vpop.xlane.xlu1 %3491  ;;  %v3621_v3 = vsel %vm3592_vm14, %v3620_v1, %v3616_v48 }
 0x5ce   :  { %v3625_v28 = vrot.slane %v3483_v9, %v7615_v39  ;;  %v3639_v50 = vrot.slane %v3492_v38, %v7615_v39  ;;  %v3723_v14 = vsel %vm3722_vm0, %v3621_v3, %v3721_v25 }
 0x5d0   :  { %v3630_v42 = vsel %vm3585_vm13, %v3629_v22, %v3625_v28 }
 0x5d1   :  { %v3489_v33 = vpop.xlane.xlu0 %3488  ;;  %v3498_v57 = vpop.xlane.xlu1 %3497 }
 0x5d2   :  { %v3634_v55 = vrot.slane %v3489_v33, %v7613_v24  ;;  %v3648_v5 = vrot.slane %v3498_v57, %v7613_v24 }
 0x5d4   :  { %v3635_v60 = vsel %vm3592_vm14, %v3634_v55, %v3630_v42 }
 0x5d5   :  { %v3495_v52 = vpop.xlane.xlu0 %3494  ;;  %v3504_v30 = vpop.xlane.xlu1 %3503  ;;  %v3725_v26 = vsel %vm3724_vm1, %v3635_v60, %v3723_v14 }
 0x5d6   :  { %v3643_v54 = vrot.slane %v3495_v52, %v7611_v16  ;;  %v3657_v53 = vrot.slane %v3504_v30, %v7611_v16 }
 0x5d8   :  { %v3644_v45 = vsel %vm3585_vm13, %v3643_v54, %v3639_v50 }
 0x5d9   :  { %v3501_v62 = vpop.xlane.xlu0 %3500  ;;  %v3510_v10 = vpop.xlane.xlu1 %3509  ;;  %v3649_v46 = vsel %vm3592_vm14, %v3648_v5, %v3644_v45 }
 0x5da   :  { %v3653_v56 = vrot.slane %v3501_v62, %v7615_v39  ;;  %v3667_v29 = vrot.slane %v3510_v10, %v7615_v39  ;;  %v3727_v47 = vsel %vm3726_vm2, %v3649_v46, %v3725_v26 }
 0x5dc   :  { %v3658_v6 = vsel %vm3585_vm13, %v3657_v53, %v3653_v56 }
 0x5dd   :  { %v3507_v44 = vpop.xlane.xlu0 %3506  ;;  %v3516_v32 = vpop.xlane.xlu1 %3515 }
 0x5de   :  { %v3662_v43 = vrot.slane %v3507_v44, %v7613_v24  ;;  %v3676_v40 = vrot.slane %v3516_v32, %v7613_v24 }
 0x5e0   :  { %v3663_v0 = vsel %vm3592_vm14, %v3662_v43, %v3658_v6 }
 0x5e1   :  { %v3513_v11 = vpop.xlane.xlu0 %3512  ;;  %v3522_v13 = vpop.xlane.xlu1 %3521  ;;  %v3729_v57 = vsel %vm3728_vm3, %v3663_v0, %v3727_v47 }
 0x5e2   :  { %v3671_v4 = vrot.slane %v3513_v11, %v7611_v16  ;;  %v3685_v34 = vrot.slane %v3522_v13, %v7611_v16 }
 0x5e4   :  { %v3672_v2 = vsel %vm3585_vm13, %v3671_v4, %v3667_v29 }
 0x5e5   :  { %v3519_v58 = vpop.xlane.xlu0 %3518  ;;  %v3531_v21 = vpop.xlane.xlu1 %3530  ;;  %v3677_v12 = vsel %vm3592_vm14, %v3676_v40, %v3672_v2 }
 0x5e6   :  { %v3681_v19 = vrot.slane %v3519_v58, %v7615_v39  ;;  %v3731_v62 = vsel %vm3730_vm4, %v3677_v12, %v3729_v57  ;;  %v3699_v10 = vrot.slane %v3531_v21, %v7611_v16 }
 0x5e8   :  { %v3686_v9 = vsel %vm3585_vm13, %v3685_v34, %v3681_v19 }
 0x5e9   :  { %v3528_v37 = vpop.xlane.xlu0 %3527  ;;  %v3540_v18 = vpop.xlane.xlu1 %3539 }
 0x5ea   :  { %v3695_v38 = vrot.slane %v3528_v37, %v7615_v39  ;;  %v3713_v44 = vrot.slane %v3540_v18, %v7611_v16 }
 0x5ed   :  { %v3537_v23 = vpop.xlane.xlu0 %3536  ;;  %v3534_v36 = vpop.xlane.xlu1 %3533 }
 0x5ee   :  { %v3709_v33 = vrot.slane %v3537_v23, %v7615_v39  ;;  %v3704_v52 = vrot.slane %v3534_v36, %v7613_v24  ;;  %v3700_v39 = vsel %vm3585_vm13, %v3699_v10, %v3695_v38 }
 0x5f0   :  { %v3714_v17 = vsel %vm3585_vm13, %v3713_v44, %v3709_v33  ;;  %v3705_v58 = vsel %vm3592_vm14, %v3704_v52, %v3700_v39 }
 0x5f1   :  { %v3525_v20 = vpop.xlane.xlu0 %3524 }
 0x5f2   :  { %v3690_v15 = vrot.slane %v3525_v20, %v7613_v24 }
 0x5f4   :  { %v3691_v30 = vsel %vm3592_vm14, %v3690_v15, %v3686_v9 }
 0x5f5   :  { %v3543_v32 = vpop.xlane.xlu0 %3542  ;;  %v3733_v11 = vsel %vm3732_vm5, %v3691_v30, %v3731_v62 }
 0x5f6   :  { %v3718_v13 = vrot.slane %v3543_v32, %v7613_v24  ;;  %v3738_v63 = vsel %vm3737_vm6, %v3733_v11, 0.0  ;;  %v3420_v24 = vld [vmem:[%s7774_s6] sm:$0xff] }
 0x5f7   :  { %3739 = vadd.xlane.f32.xlu1 %v3738_v63 }
 0x5f8   :  { %v3719_v8 = vsel %vm3592_vm14, %v3718_v13, %v3714_v17 }
 0x5f9   :  { %v3734_v21 = vsel %vm3720_vm15, %v3719_v8, %v3705_v58 }
 0x5fa   :  { %v3742_v16 = vsel %vm3741_vm7, %v3734_v21, 0.0 }
 0x5fb   :  { %3743 = vadd.xlane.f32.xlu0 %v3742_v16 }
 0x648   :  { %v4065_v27 = vpop.xlane.xlu1 %4064 }
 0x649   :  { %v4069_v7 = vadd.f32 %v4065_v27, %v3420_v24 }
 0x64b   :  { %4073 = vrot.lane.b32.xlu1 %v4069_v7, %s5342_s16 }
 0x64c   :  { %v4068_v59 = vpop.xlane.xlu0 %4067 }
 0x64d   :  { %v4070_v31 = vadd.f32 %v4068_v59, %v3421_v51 }
 0x64f   :  { %4075 = vrot.lane.b32.xlu0 %v4070_v31, %s5342_s16 }
 0x684   :  { %v3740_v54 = vpop.xlane.xlu1 %3739 }
 0x685   :  { %v3745_v49 = vadd.f32 %v3740_v54, %v3420_v24 }
 0x687   :  { %3748 = vst.msk [vmem:[%s7775_s7] sm:$0xff] %vm3747_vm8, %v3745_v49 }
 0x688   :  { %v3744_v61 = vpop.xlane.xlu0 %3743 }
 0x689   :  { %v3746_v28 = vadd.f32 %v3744_v61, %v3421_v51 }
 0x68b   :  { %3750 = vst.msk [vmem:[%s7775_s7 + $0x8] sm:$0x3] %vm3749_vm9, %v3746_v28 }
 0x6bd   :  { %v4074_v37 = vpop.permute.xlu1 %4073 }
 0x6be   :  { %4080 = vst.msk [vmem:[%s7775_s7] sm:$0xff] %vm4079_vm10, %v4074_v37 }
 0x6c1   :  { %v4076_v48 = vpop.permute.xlu0 %4075 }
 0x6c2   :  { %4082 = vst.msk [vmem:[%s7775_s7 + $0x8] sm:$0x3] %vm4081_vm11, %v4076_v48 }

</bundles_post_ra>
